<compile_context>
chip_gen: v7x
topology: tpu7x:2x2x1
jax: 0.10.0
libtpu: 0.0.40
codegen_flags: <defaults>
</compile_context>

<pallas_src>
import functools

import jax
import jax.numpy as jnp
from jax.experimental import pallas as pl
from jax.experimental.pallas import tpu as pltpu


def _make_fused_lstm_encoder_kernel(T, B, D, H, n_layers, num_dirs):
    """Build the fused encoder kernel for a fixed (static) configuration."""
    n_w = n_layers * num_dirs * 3
    num_buf_sets = 1 if n_layers == 1 else 2

    def kernel(len_ref, x_ref, *rest):
        # rest = [w_ih_t, w_hh_t, bias] * (n_layers*num_dirs), hn_ref, scratch...
        w_refs = rest[:n_w]
        hn_ref = rest[n_w]
        scratch = rest[n_w + 1:]
        # scratch: num_buf_sets x num_dirs ping-pong buffers, each (T, B, H) f32
        bufs = [[scratch[s * num_dirs + d] for d in range(num_dirs)]
                for s in range(num_buf_sets)]

        def get_w(layer, d):
            base = (layer * num_dirs + d) * 3
            return w_refs[base], w_refs[base + 1], w_refs[base + 2]

        def run_direction(layer, d, in_bufs, out_buf):
            w_ih_ref, w_hh_ref, b_ref = get_w(layer, d)
            w_hh = w_hh_ref[...]            # (H, 4H), hoisted out of the loop
            bias = b_ref[...]               # (1, 4H) == b_ih + b_hh (folded once)

            # ---- prologue: hoisted input projection (off the h->h chain) ----
            gx = []
            if layer == 0:
                w_ih = w_ih_ref[...]        # (D, 4H)
                for t in range(T):
                    gx.append(jnp.dot(x_ref[t], w_ih,
                                      preferred_element_type=jnp.float32) + bias)
            else:
                # Split the (num_dirs*H, 4H) weight per input direction so the
                # previous layer's per-direction buffers are consumed directly
                # (no feature concat ever built).
                w_parts = [w_ih_ref[dd * H:(dd + 1) * H, :]
                           for dd in range(num_dirs)]
                for t in range(T):
                    acc = bias
                    for dd in range(num_dirs):
                        acc = acc + jnp.dot(in_bufs[dd][t], w_parts[dd],
                                            preferred_element_type=jnp.float32)
                    gx.append(acc)

            # ---- serial recurrence (d == 0: forward time, d == 1: reversed) --
            h = jnp.zeros((B, H), jnp.float32)
            c = jnp.zeros((B, H), jnp.float32)
            for s in range(T):
                t = s if d == 0 else T - 1 - s
                gates = gx[t] + jnp.dot(h, w_hh,
                                        preferred_element_type=jnp.float32)
                i_g = jax.nn.sigmoid(gates[:, 0 * H:1 * H])
                f_g = jax.nn.sigmoid(gates[:, 1 * H:2 * H])
                g_g = jnp.tanh(gates[:, 2 * H:3 * H])
                o_g = jax.nn.sigmoid(gates[:, 3 * H:4 * H])
                c = f_g * c + i_g * g_g
                h = o_g * jnp.tanh(c)
                out_buf[t] = h              # static t -> plain VMEM store

        # ---- layer / direction chaining, all in VMEM -------------------------
        for layer in range(n_layers):
            out_set = layer % num_buf_sets
            in_bufs = None if layer == 0 else bufs[(layer - 1) % num_buf_sets]
            for d in range(num_dirs):
                run_direction(layer, d, in_bufs, bufs[out_set][d])

        # ---- in-kernel gather: hn[b] = outputs[b, trajs_len[b] - 1] ----------
        final_bufs = bufs[(n_layers - 1) % num_buf_sets]
        for b in range(B):                                # B is tiny -> unroll
            t_b = len_ref[b] - 1                          # dynamic scalar (SMEM)
            for d in range(num_dirs):
                slab = final_bufs[d][t_b]                 # (B, H), dynamic idx
                hn_ref[b:b + 1, d * H:(d + 1) * H] = slab[b:b + 1, :]

    return kernel


@functools.partial(jax.jit, static_argnums=(3, 4, 5))
def lstm_encoder_forward(trajs_hidden, trajs_len, params_flat,
                         hidden_size, bidirectional, n_layers):
    """Matches LSTMEncoder.forward:
        outputs, _ = lstm(trajs_hidden)            # (B, T, num_dirs*H)
        hn = outputs[arange(B), trajs_len - 1]     # (B, num_dirs*H)
    """
    num_dirs = 2 if bidirectional else 1
    B, T, D = trajs_hidden.shape
    H = hidden_size

    x_tbd = jnp.transpose(trajs_hidden, (1, 0, 2)).astype(jnp.float32)  # (T,B,D)

    kernel = _make_fused_lstm_encoder_kernel(T, B, D, H, n_layers, num_dirs)

    # All blocks are full arrays (block_shape == array shape), grid is (1,),
    # so constant blocks are not re-fetched and the (8,128) rule is satisfied.
    in_specs = [pl.BlockSpec((T, B, D), lambda i, lens: (0, 0, 0))]
    for layer in range(n_layers):
        d_in = D if layer == 0 else num_dirs * H
        for _ in range(num_dirs):
            in_specs += [
                pl.BlockSpec((d_in, 4 * H), lambda i, lens: (0, 0)),
                pl.BlockSpec((H, 4 * H), lambda i, lens: (0, 0)),
                pl.BlockSpec((1, 4 * H), lambda i, lens: (0, 0)),
            ]

    num_buf_sets = 1 if n_layers == 1 else 2
    scratch_shapes = [pltpu.VMEM((T, B, H), jnp.float32)
                      for _ in range(num_buf_sets * num_dirs)]

    grid_spec = pltpu.PrefetchScalarGridSpec(
        num_scalar_prefetch=1,          # trajs_len -> SMEM, used for the gather
        grid=(1,),                      # whole encoder in one kernel invocation
        in_specs=in_specs,
        out_specs=pl.BlockSpec((B, num_dirs * H), lambda i, lens: (0, 0)),
        scratch_shapes=scratch_shapes,
    )

    hn = pl.pallas_call(
        kernel,
        out_shape=jax.ShapeDtypeStruct((B, num_dirs * H), jnp.float32),
        grid_spec=grid_spec,
        compiler_params=pltpu.CompilerParams(
            dimension_semantics=("arbitrary",),
        ),
    )(trajs_len.astype(jnp.int32), x_tbd, *params_flat)
    return hn


def init_lstm_params(key, input_size, hidden_size, bidirectional, n_layers):
    """Deterministic parameter init (same shapes as nn.LSTM, stored transposed)."""
    num_dirs = 2 if bidirectional else 1
    params = []
    bound = 1.0 / jnp.sqrt(jnp.float32(hidden_size))
    for layer in range(n_layers):
        d_in = input_size if layer == 0 else hidden_size * num_dirs
        layer_p = []
        for _ in range(num_dirs):
            key, k1, k2, k3, k4 = jax.random.split(key, 5)
            w_ih = jax.random.uniform(k1, (4 * hidden_size, d_in),
                                      minval=-bound, maxval=bound, dtype=jnp.float32)
            w_hh = jax.random.uniform(k2, (4 * hidden_size, hidden_size),
                                      minval=-bound, maxval=bound, dtype=jnp.float32)
            b_ih = jax.random.uniform(k3, (4 * hidden_size,),
                                      minval=-bound, maxval=bound, dtype=jnp.float32)
            b_hh = jax.random.uniform(k4, (4 * hidden_size,),
                                      minval=-bound, maxval=bound, dtype=jnp.float32)
            layer_p.append({
                "w_ih_t": w_ih.T,                      # (d_in, 4H)
                "w_hh_t": w_hh.T,                      # (H, 4H)
                "bias": (b_ih + b_hh)[None, :],        # (1, 4H)
            })
        params.append(layer_p)
    return params


# ---------------------------------------------------------------------------
# Pure-JAX reference (lax.scan) for correctness check.
# ---------------------------------------------------------------------------
def _lstm_layer_ref(x_tbd, w_ih_t, w_hh_t, bias):
    T, B, _ = x_tbd.shape
    H = w_hh_t.shape[0]

    def step(carry, x_t):
        h, c = carry
        gates = x_t @ w_ih_t + h @ w_hh_t + bias
        i = jax.nn.sigmoid(gates[:, 0 * H:1 * H])
        f = jax.nn.sigmoid(gates[:, 1 * H:2 * H])
        g = jnp.tanh(gates[:, 2 * H:3 * H])
        o = jax.nn.sigmoid(gates[:, 3 * H:4 * H])
        c = f * c + i * g
        h = o * jnp.tanh(c)
        return (h, c), h

    init = (jnp.zeros((B, H), jnp.float32), jnp.zeros((B, H), jnp.float32))
    _, hs = jax.lax.scan(step, init, x_tbd)
    return hs


def lstm_encoder_ref(trajs_hidden, trajs_len, params, bidirectional, n_layers):
    num_dirs = 2 if bidirectional else 1
    x = jnp.transpose(trajs_hidden, (1, 0, 2))
    for layer in range(n_layers):
        outs = []
        for d in range(num_dirs):
            p = params[layer][d]
            if d == 0:
                o = _lstm_layer_ref(x, p["w_ih_t"], p["w_hh_t"], p["bias"])
            else:
                o = _lstm_layer_ref(x[::-1], p["w_ih_t"], p["w_hh_t"], p["bias"])[::-1]
            outs.append(o)
        x = jnp.concatenate(outs, axis=-1)
    outputs = jnp.transpose(x, (1, 0, 2))
    return outputs[jnp.arange(outputs.shape[0]), trajs_len - 1]


if __name__ == "__main__":
    # Module config
    input_size = 16
    hidden_size = 32
    bidirectional = True
    n_layers = 2

    # Input shapes
    batch = 2
    seq_len = 8

    key = jax.random.PRNGKey(0)
    k_x, k_p = jax.random.split(key)
    trajs_hidden = jax.random.normal(k_x, (batch, seq_len, input_size), dtype=jnp.float32)
    trajs_len = jnp.array([8, 5], dtype=jnp.int32)

    params = init_lstm_params(k_p, input_size, hidden_size, bidirectional, n_layers)
    params_flat = tuple(
        t for layer in params for d in layer for t in (d["w_ih_t"], d["w_hh_t"], d["bias"])
    )

    hn = lstm_encoder_forward(trajs_hidden, trajs_len, params_flat,
                              hidden_size, bidirectional, n_layers)
    hn = jax.block_until_ready(hn)

    hn_ref = lstm_encoder_ref(trajs_hidden, trajs_len, params, bidirectional, n_layers)
    assert hn.shape == (batch, (2 if bidirectional else 1) * hidden_size)
    assert jnp.allclose(hn, hn_ref, atol=1e-4, rtol=1e-4), "mismatch vs JAX reference"

    print("KERNEL_OK")
</pallas_src>

<mosaic_0001>
module attributes {stable_mosaic.version = 11 : i64} {
  func.func @kernel(%arg0: i32, %arg1: memref<2xi32, #tpu.memory_space<smem>>, %arg2: memref<8x2x16xf32, #tpu.memory_space<vmem>>, %arg3: memref<16x128xf32, #tpu.memory_space<vmem>>, %arg4: memref<32x128xf32, #tpu.memory_space<vmem>>, %arg5: memref<1x128xf32, #tpu.memory_space<vmem>>, %arg6: memref<16x128xf32, #tpu.memory_space<vmem>>, %arg7: memref<32x128xf32, #tpu.memory_space<vmem>>, %arg8: memref<1x128xf32, #tpu.memory_space<vmem>>, %arg9: memref<64x128xf32, #tpu.memory_space<vmem>>, %arg10: memref<32x128xf32, #tpu.memory_space<vmem>>, %arg11: memref<1x128xf32, #tpu.memory_space<vmem>>, %arg12: memref<64x128xf32, #tpu.memory_space<vmem>>, %arg13: memref<32x128xf32, #tpu.memory_space<vmem>>, %arg14: memref<1x128xf32, #tpu.memory_space<vmem>>, %arg15: memref<2x64xf32, #tpu.memory_space<vmem>>, %arg16: memref<8x2x32xf32, #tpu.memory_space<vmem>>, %arg17: memref<8x2x32xf32, #tpu.memory_space<vmem>>, %arg18: memref<8x2x32xf32, #tpu.memory_space<vmem>>, %arg19: memref<8x2x32xf32, #tpu.memory_space<vmem>>) attributes {dimension_semantics = [#tpu.dimension_semantics<arbitrary>], iteration_bounds = array<i64: 1>, scalar_prefetch = 1 : i64, scratch_operands = 4 : i64, tpu.core_type = #tpu.core_type<tc>, window_params = [{pipeline_mode = #tpu.pipeline_mode<synchronous>, transform_indices = @transform_0, window_bounds = array<i64: 8, 2, 16>}, {pipeline_mode = #tpu.pipeline_mode<synchronous>, transform_indices = @transform_1, window_bounds = array<i64: 16, 128>}, {pipeline_mode = #tpu.pipeline_mode<synchronous>, transform_indices = @transform_2, window_bounds = array<i64: 32, 128>}, {pipeline_mode = #tpu.pipeline_mode<synchronous>, transform_indices = @transform_3, window_bounds = array<i64: 1, 128>}, {pipeline_mode = #tpu.pipeline_mode<synchronous>, transform_indices = @transform_4, window_bounds = array<i64: 16, 128>}, {pipeline_mode = #tpu.pipeline_mode<synchronous>, transform_indices = @transform_5, window_bounds = array<i64: 32, 128>}, {pipeline_mode = #tpu.pipeline_mode<synchronous>, transform_indices = @transform_6, window_bounds = array<i64: 1, 128>}, {pipeline_mode = #tpu.pipeline_mode<synchronous>, transform_indices = @transform_7, window_bounds = array<i64: 64, 128>}, {pipeline_mode = #tpu.pipeline_mode<synchronous>, transform_indices = @transform_8, window_bounds = array<i64: 32, 128>}, {pipeline_mode = #tpu.pipeline_mode<synchronous>, transform_indices = @transform_9, window_bounds = array<i64: 1, 128>}, {pipeline_mode = #tpu.pipeline_mode<synchronous>, transform_indices = @transform_10, window_bounds = array<i64: 64, 128>}, {pipeline_mode = #tpu.pipeline_mode<synchronous>, transform_indices = @transform_11, window_bounds = array<i64: 32, 128>}, {pipeline_mode = #tpu.pipeline_mode<synchronous>, transform_indices = @transform_12, window_bounds = array<i64: 1, 128>}, {pipeline_mode = #tpu.pipeline_mode<synchronous>, transform_indices = @transform_13, window_bounds = array<i64: 2, 64>}]} {
    %c0 = arith.constant 0 : index
    %c0_0 = arith.constant 0 : index
    %0 = vector.load %arg4[%c0, %c0_0] : memref<32x128xf32, #tpu.memory_space<vmem>>, vector<32x128xf32>
    %c0_1 = arith.constant 0 : index
    %c0_2 = arith.constant 0 : index
    %1 = vector.load %arg5[%c0_1, %c0_2] : memref<1x128xf32, #tpu.memory_space<vmem>>, vector<1x128xf32>
    %c0_3 = arith.constant 0 : index
    %c0_4 = arith.constant 0 : index
    %2 = vector.load %arg3[%c0_3, %c0_4] : memref<16x128xf32, #tpu.memory_space<vmem>>, vector<16x128xf32>
    %c0_5 = arith.constant 0 : index
    %c0_6 = arith.constant 0 : index
    %c0_7 = arith.constant 0 : index
    %3 = vector.load %arg2[%c0_5, %c0_6, %c0_7] : memref<8x2x16xf32, #tpu.memory_space<vmem>>, vector<1x2x16xf32>
    %4 = vector.shape_cast %3 : vector<1x2x16xf32> to vector<2x16xf32>
    %cst = arith.constant dense<0.000000e+00> : vector<2x128xf32>
    %5 = tpu.matmul %4, %2, %cst {dimension_numbers = #tpu.dot_dimension_numbers<[1], [0], [0], [1], [0, 0, 1, 1], [], []>} : vector<2x16xf32>, vector<16x128xf32>, vector<2x128xf32> -> vector<2x128xf32>
    %6 = vector.broadcast %1 : vector<1x128xf32> to vector<2x128xf32>
    %7 = arith.addf %5, %6 : vector<2x128xf32>
    %c1 = arith.constant 1 : index
    %c0_8 = arith.constant 0 : index
    %c0_9 = arith.constant 0 : index
    %8 = vector.load %arg2[%c1, %c0_8, %c0_9] : memref<8x2x16xf32, #tpu.memory_space<vmem>>, vector<1x2x16xf32>
    %9 = vector.shape_cast %8 : vector<1x2x16xf32> to vector<2x16xf32>
    %cst_10 = arith.constant dense<0.000000e+00> : vector<2x128xf32>
    %10 = tpu.matmul %9, %2, %cst_10 {dimension_numbers = #tpu.dot_dimension_numbers<[1], [0], [0], [1], [0, 0, 1, 1], [], []>} : vector<2x16xf32>, vector<16x128xf32>, vector<2x128xf32> -> vector<2x128xf32>
    %11 = vector.broadcast %1 : vector<1x128xf32> to vector<2x128xf32>
    %12 = arith.addf %10, %11 : vector<2x128xf32>
    %c2 = arith.constant 2 : index
    %c0_11 = arith.constant 0 : index
    %c0_12 = arith.constant 0 : index
    %13 = vector.load %arg2[%c2, %c0_11, %c0_12] : memref<8x2x16xf32, #tpu.memory_space<vmem>>, vector<1x2x16xf32>
    %14 = vector.shape_cast %13 : vector<1x2x16xf32> to vector<2x16xf32>
    %cst_13 = arith.constant dense<0.000000e+00> : vector<2x128xf32>
    %15 = tpu.matmul %14, %2, %cst_13 {dimension_numbers = #tpu.dot_dimension_numbers<[1], [0], [0], [1], [0, 0, 1, 1], [], []>} : vector<2x16xf32>, vector<16x128xf32>, vector<2x128xf32> -> vector<2x128xf32>
    %16 = vector.broadcast %1 : vector<1x128xf32> to vector<2x128xf32>
    %17 = arith.addf %15, %16 : vector<2x128xf32>
    %c3 = arith.constant 3 : index
    %c0_14 = arith.constant 0 : index
    %c0_15 = arith.constant 0 : index
    %18 = vector.load %arg2[%c3, %c0_14, %c0_15] : memref<8x2x16xf32, #tpu.memory_space<vmem>>, vector<1x2x16xf32>
    %19 = vector.shape_cast %18 : vector<1x2x16xf32> to vector<2x16xf32>
    %cst_16 = arith.constant dense<0.000000e+00> : vector<2x128xf32>
    %20 = tpu.matmul %19, %2, %cst_16 {dimension_numbers = #tpu.dot_dimension_numbers<[1], [0], [0], [1], [0, 0, 1, 1], [], []>} : vector<2x16xf32>, vector<16x128xf32>, vector<2x128xf32> -> vector<2x128xf32>
    %21 = vector.broadcast %1 : vector<1x128xf32> to vector<2x128xf32>
    %22 = arith.addf %20, %21 : vector<2x128xf32>
    %c4 = arith.constant 4 : index
    %c0_17 = arith.constant 0 : index
    %c0_18 = arith.constant 0 : index
    %23 = vector.load %arg2[%c4, %c0_17, %c0_18] : memref<8x2x16xf32, #tpu.memory_space<vmem>>, vector<1x2x16xf32>
    %24 = vector.shape_cast %23 : vector<1x2x16xf32> to vector<2x16xf32>
    %cst_19 = arith.constant dense<0.000000e+00> : vector<2x128xf32>
    %25 = tpu.matmul %24, %2, %cst_19 {dimension_numbers = #tpu.dot_dimension_numbers<[1], [0], [0], [1], [0, 0, 1, 1], [], []>} : vector<2x16xf32>, vector<16x128xf32>, vector<2x128xf32> -> vector<2x128xf32>
    %26 = vector.broadcast %1 : vector<1x128xf32> to vector<2x128xf32>
    %27 = arith.addf %25, %26 : vector<2x128xf32>
    %c5 = arith.constant 5 : index
    %c0_20 = arith.constant 0 : index
    %c0_21 = arith.constant 0 : index
    %28 = vector.load %arg2[%c5, %c0_20, %c0_21] : memref<8x2x16xf32, #tpu.memory_space<vmem>>, vector<1x2x16xf32>
    %29 = vector.shape_cast %28 : vector<1x2x16xf32> to vector<2x16xf32>
    %cst_22 = arith.constant dense<0.000000e+00> : vector<2x128xf32>
    %30 = tpu.matmul %29, %2, %cst_22 {dimension_numbers = #tpu.dot_dimension_numbers<[1], [0], [0], [1], [0, 0, 1, 1], [], []>} : vector<2x16xf32>, vector<16x128xf32>, vector<2x128xf32> -> vector<2x128xf32>
    %31 = vector.broadcast %1 : vector<1x128xf32> to vector<2x128xf32>
    %32 = arith.addf %30, %31 : vector<2x128xf32>
    %c6 = arith.constant 6 : index
    %c0_23 = arith.constant 0 : index
    %c0_24 = arith.constant 0 : index
    %33 = vector.load %arg2[%c6, %c0_23, %c0_24] : memref<8x2x16xf32, #tpu.memory_space<vmem>>, vector<1x2x16xf32>
    %34 = vector.shape_cast %33 : vector<1x2x16xf32> to vector<2x16xf32>
    %cst_25 = arith.constant dense<0.000000e+00> : vector<2x128xf32>
    %35 = tpu.matmul %34, %2, %cst_25 {dimension_numbers = #tpu.dot_dimension_numbers<[1], [0], [0], [1], [0, 0, 1, 1], [], []>} : vector<2x16xf32>, vector<16x128xf32>, vector<2x128xf32> -> vector<2x128xf32>
    %36 = vector.broadcast %1 : vector<1x128xf32> to vector<2x128xf32>
    %37 = arith.addf %35, %36 : vector<2x128xf32>
    %c7 = arith.constant 7 : index
    %c0_26 = arith.constant 0 : index
    %c0_27 = arith.constant 0 : index
    %38 = vector.load %arg2[%c7, %c0_26, %c0_27] : memref<8x2x16xf32, #tpu.memory_space<vmem>>, vector<1x2x16xf32>
    %39 = vector.shape_cast %38 : vector<1x2x16xf32> to vector<2x16xf32>
    %cst_28 = arith.constant dense<0.000000e+00> : vector<2x128xf32>
    %40 = tpu.matmul %39, %2, %cst_28 {dimension_numbers = #tpu.dot_dimension_numbers<[1], [0], [0], [1], [0, 0, 1, 1], [], []>} : vector<2x16xf32>, vector<16x128xf32>, vector<2x128xf32> -> vector<2x128xf32>
    %41 = vector.broadcast %1 : vector<1x128xf32> to vector<2x128xf32>
    %42 = arith.addf %40, %41 : vector<2x128xf32>
    %cst_29 = arith.constant 0.000000e+00 : f32
    %43 = vector.broadcast %cst_29 : f32 to vector<2x32xf32>
    %cst_30 = arith.constant 0.000000e+00 : f32
    %44 = vector.broadcast %cst_30 : f32 to vector<2x32xf32>
    %cst_31 = arith.constant dense<0.000000e+00> : vector<2x128xf32>
    %45 = tpu.matmul %43, %0, %cst_31 {dimension_numbers = #tpu.dot_dimension_numbers<[1], [0], [0], [1], [0, 0, 1, 1], [], []>} : vector<2x32xf32>, vector<32x128xf32>, vector<2x128xf32> -> vector<2x128xf32>
    %46 = arith.addf %7, %45 : vector<2x128xf32>
    %47 = vector.extract_strided_slice %46 {offsets = [0, 0], sizes = [2, 32], strides = [1, 1]} : vector<2x128xf32> to vector<2x32xf32>
    %48 = arith.negf %47 : vector<2x32xf32>
    %49 = math.exp %48 : vector<2x32xf32>
    %cst_32 = arith.constant 1.000000e+00 : f32
    %50 = vector.broadcast %cst_32 : f32 to vector<2x32xf32>
    %51 = arith.addf %50, %49 : vector<2x32xf32>
    %52 = arith.divf %50, %51 : vector<2x32xf32>
    %53 = vector.extract_strided_slice %46 {offsets = [0, 32], sizes = [2, 32], strides = [1, 1]} : vector<2x128xf32> to vector<2x32xf32>
    %54 = arith.negf %53 : vector<2x32xf32>
    %55 = math.exp %54 : vector<2x32xf32>
    %cst_33 = arith.constant 1.000000e+00 : f32
    %56 = vector.broadcast %cst_33 : f32 to vector<2x32xf32>
    %57 = arith.addf %56, %55 : vector<2x32xf32>
    %58 = arith.divf %56, %57 : vector<2x32xf32>
    %59 = vector.extract_strided_slice %46 {offsets = [0, 64], sizes = [2, 32], strides = [1, 1]} : vector<2x128xf32> to vector<2x32xf32>
    %60 = math.tanh %59 : vector<2x32xf32>
    %61 = vector.extract_strided_slice %46 {offsets = [0, 96], sizes = [2, 32], strides = [1, 1]} : vector<2x128xf32> to vector<2x32xf32>
    %62 = arith.negf %61 : vector<2x32xf32>
    %63 = math.exp %62 : vector<2x32xf32>
    %cst_34 = arith.constant 1.000000e+00 : f32
    %64 = vector.broadcast %cst_34 : f32 to vector<2x32xf32>
    %65 = arith.addf %64, %63 : vector<2x32xf32>
    %66 = arith.divf %64, %65 : vector<2x32xf32>
    %67 = arith.mulf %58, %44 : vector<2x32xf32>
    %68 = arith.mulf %52, %60 : vector<2x32xf32>
    %69 = arith.addf %67, %68 : vector<2x32xf32>
    %70 = math.tanh %69 : vector<2x32xf32>
    %71 = arith.mulf %66, %70 : vector<2x32xf32>
    %c0_35 = arith.constant 0 : index
    %c0_36 = arith.constant 0 : index
    %c0_37 = arith.constant 0 : index
    %72 = vector.load %arg16[%c0_35, %c0_36, %c0_37] : memref<8x2x32xf32, #tpu.memory_space<vmem>>, vector<1x2x32xf32>
    %73 = vector.shape_cast %72 : vector<1x2x32xf32> to vector<2x32xf32>
    %74 = vector.shape_cast %71 : vector<2x32xf32> to vector<1x2x32xf32>
    tpu.vector_store %arg16[%c0_35, %c0_36, %c0_37], %74 {strides = array<i32>} : memref<8x2x32xf32, #tpu.memory_space<vmem>>, vector<1x2x32xf32>,
    %cst_38 = arith.constant dense<0.000000e+00> : vector<2x128xf32>
    %75 = tpu.matmul %71, %0, %cst_38 {dimension_numbers = #tpu.dot_dimension_numbers<[1], [0], [0], [1], [0, 0, 1, 1], [], []>} : vector<2x32xf32>, vector<32x128xf32>, vector<2x128xf32> -> vector<2x128xf32>
    %76 = arith.addf %12, %75 : vector<2x128xf32>
    %77 = vector.extract_strided_slice %76 {offsets = [0, 0], sizes = [2, 32], strides = [1, 1]} : vector<2x128xf32> to vector<2x32xf32>
    %78 = arith.negf %77 : vector<2x32xf32>
    %79 = math.exp %78 : vector<2x32xf32>
    %cst_39 = arith.constant 1.000000e+00 : f32
    %80 = vector.broadcast %cst_39 : f32 to vector<2x32xf32>
    %81 = arith.addf %80, %79 : vector<2x32xf32>
    %82 = arith.divf %80, %81 : vector<2x32xf32>
    %83 = vector.extract_strided_slice %76 {offsets = [0, 32], sizes = [2, 32], strides = [1, 1]} : vector<2x128xf32> to vector<2x32xf32>
    %84 = arith.negf %83 : vector<2x32xf32>
    %85 = math.exp %84 : vector<2x32xf32>
    %cst_40 = arith.constant 1.000000e+00 : f32
    %86 = vector.broadcast %cst_40 : f32 to vector<2x32xf32>
    %87 = arith.addf %86, %85 : vector<2x32xf32>
    %88 = arith.divf %86, %87 : vector<2x32xf32>
    %89 = vector.extract_strided_slice %76 {offsets = [0, 64], sizes = [2, 32], strides = [1, 1]} : vector<2x128xf32> to vector<2x32xf32>
    %90 = math.tanh %89 : vector<2x32xf32>
    %91 = vector.extract_strided_slice %76 {offsets = [0, 96], sizes = [2, 32], strides = [1, 1]} : vector<2x128xf32> to vector<2x32xf32>
    %92 = arith.negf %91 : vector<2x32xf32>
    %93 = math.exp %92 : vector<2x32xf32>
    %cst_41 = arith.constant 1.000000e+00 : f32
    %94 = vector.broadcast %cst_41 : f32 to vector<2x32xf32>
    %95 = arith.addf %94, %93 : vector<2x32xf32>
    %96 = arith.divf %94, %95 : vector<2x32xf32>
    %97 = arith.mulf %88, %69 : vector<2x32xf32>
    %98 = arith.mulf %82, %90 : vector<2x32xf32>
    %99 = arith.addf %97, %98 : vector<2x32xf32>
    %100 = math.tanh %99 : vector<2x32xf32>
    %101 = arith.mulf %96, %100 : vector<2x32xf32>
    %c1_42 = arith.constant 1 : index
    %c0_43 = arith.constant 0 : index
    %c0_44 = arith.constant 0 : index
    %102 = vector.load %arg16[%c1_42, %c0_43, %c0_44] : memref<8x2x32xf32, #tpu.memory_space<vmem>>, vector<1x2x32xf32>
    %103 = vector.shape_cast %102 : vector<1x2x32xf32> to vector<2x32xf32>
    %104 = vector.shape_cast %101 : vector<2x32xf32> to vector<1x2x32xf32>
    tpu.vector_store %arg16[%c1_42, %c0_43, %c0_44], %104 {strides = array<i32>} : memref<8x2x32xf32, #tpu.memory_space<vmem>>, vector<1x2x32xf32>,
    %cst_45 = arith.constant dense<0.000000e+00> : vector<2x128xf32>
    %105 = tpu.matmul %101, %0, %cst_45 {dimension_numbers = #tpu.dot_dimension_numbers<[1], [0], [0], [1], [0, 0, 1, 1], [], []>} : vector<2x32xf32>, vector<32x128xf32>, vector<2x128xf32> -> vector<2x128xf32>
    %106 = arith.addf %17, %105 : vector<2x128xf32>
    %107 = vector.extract_strided_slice %106 {offsets = [0, 0], sizes = [2, 32], strides = [1, 1]} : vector<2x128xf32> to vector<2x32xf32>
    %108 = arith.negf %107 : vector<2x32xf32>
    %109 = math.exp %108 : vector<2x32xf32>
    %cst_46 = arith.constant 1.000000e+00 : f32
    %110 = vector.broadcast %cst_46 : f32 to vector<2x32xf32>
    %111 = arith.addf %110, %109 : vector<2x32xf32>
    %112 = arith.divf %110, %111 : vector<2x32xf32>
    %113 = vector.extract_strided_slice %106 {offsets = [0, 32], sizes = [2, 32], strides = [1, 1]} : vector<2x128xf32> to vector<2x32xf32>
    %114 = arith.negf %113 : vector<2x32xf32>
    %115 = math.exp %114 : vector<2x32xf32>
    %cst_47 = arith.constant 1.000000e+00 : f32
    %116 = vector.broadcast %cst_47 : f32 to vector<2x32xf32>
    %117 = arith.addf %116, %115 : vector<2x32xf32>
    %118 = arith.divf %116, %117 : vector<2x32xf32>
    %119 = vector.extract_strided_slice %106 {offsets = [0, 64], sizes = [2, 32], strides = [1, 1]} : vector<2x128xf32> to vector<2x32xf32>
    %120 = math.tanh %119 : vector<2x32xf32>
    %121 = vector.extract_strided_slice %106 {offsets = [0, 96], sizes = [2, 32], strides = [1, 1]} : vector<2x128xf32> to vector<2x32xf32>
    %122 = arith.negf %121 : vector<2x32xf32>
    %123 = math.exp %122 : vector<2x32xf32>
    %cst_48 = arith.constant 1.000000e+00 : f32
    %124 = vector.broadcast %cst_48 : f32 to vector<2x32xf32>
    %125 = arith.addf %124, %123 : vector<2x32xf32>
    %126 = arith.divf %124, %125 : vector<2x32xf32>
    %127 = arith.mulf %118, %99 : vector<2x32xf32>
    %128 = arith.mulf %112, %120 : vector<2x32xf32>
    %129 = arith.addf %127, %128 : vector<2x32xf32>
    %130 = math.tanh %129 : vector<2x32xf32>
    %131 = arith.mulf %126, %130 : vector<2x32xf32>
    %c2_49 = arith.constant 2 : index
    %c0_50 = arith.constant 0 : index
    %c0_51 = arith.constant 0 : index
    %132 = vector.load %arg16[%c2_49, %c0_50, %c0_51] : memref<8x2x32xf32, #tpu.memory_space<vmem>>, vector<1x2x32xf32>
    %133 = vector.shape_cast %132 : vector<1x2x32xf32> to vector<2x32xf32>
    %134 = vector.shape_cast %131 : vector<2x32xf32> to vector<1x2x32xf32>
    tpu.vector_store %arg16[%c2_49, %c0_50, %c0_51], %134 {strides = array<i32>} : memref<8x2x32xf32, #tpu.memory_space<vmem>>, vector<1x2x32xf32>,
    %cst_52 = arith.constant dense<0.000000e+00> : vector<2x128xf32>
    %135 = tpu.matmul %131, %0, %cst_52 {dimension_numbers = #tpu.dot_dimension_numbers<[1], [0], [0], [1], [0, 0, 1, 1], [], []>} : vector<2x32xf32>, vector<32x128xf32>, vector<2x128xf32> -> vector<2x128xf32>
    %136 = arith.addf %22, %135 : vector<2x128xf32>
    %137 = vector.extract_strided_slice %136 {offsets = [0, 0], sizes = [2, 32], strides = [1, 1]} : vector<2x128xf32> to vector<2x32xf32>
    %138 = arith.negf %137 : vector<2x32xf32>
    %139 = math.exp %138 : vector<2x32xf32>
    %cst_53 = arith.constant 1.000000e+00 : f32
    %140 = vector.broadcast %cst_53 : f32 to vector<2x32xf32>
    %141 = arith.addf %140, %139 : vector<2x32xf32>
    %142 = arith.divf %140, %141 : vector<2x32xf32>
    %143 = vector.extract_strided_slice %136 {offsets = [0, 32], sizes = [2, 32], strides = [1, 1]} : vector<2x128xf32> to vector<2x32xf32>
    %144 = arith.negf %143 : vector<2x32xf32>
    %145 = math.exp %144 : vector<2x32xf32>
    %cst_54 = arith.constant 1.000000e+00 : f32
    %146 = vector.broadcast %cst_54 : f32 to vector<2x32xf32>
    %147 = arith.addf %146, %145 : vector<2x32xf32>
    %148 = arith.divf %146, %147 : vector<2x32xf32>
    %149 = vector.extract_strided_slice %136 {offsets = [0, 64], sizes = [2, 32], strides = [1, 1]} : vector<2x128xf32> to vector<2x32xf32>
    %150 = math.tanh %149 : vector<2x32xf32>
    %151 = vector.extract_strided_slice %136 {offsets = [0, 96], sizes = [2, 32], strides = [1, 1]} : vector<2x128xf32> to vector<2x32xf32>
    %152 = arith.negf %151 : vector<2x32xf32>
    %153 = math.exp %152 : vector<2x32xf32>
    %cst_55 = arith.constant 1.000000e+00 : f32
    %154 = vector.broadcast %cst_55 : f32 to vector<2x32xf32>
    %155 = arith.addf %154, %153 : vector<2x32xf32>
    %156 = arith.divf %154, %155 : vector<2x32xf32>
    %157 = arith.mulf %148, %129 : vector<2x32xf32>
    %158 = arith.mulf %142, %150 : vector<2x32xf32>
    %159 = arith.addf %157, %158 : vector<2x32xf32>
    %160 = math.tanh %159 : vector<2x32xf32>
    %161 = arith.mulf %156, %160 : vector<2x32xf32>
    %c3_56 = arith.constant 3 : index
    %c0_57 = arith.constant 0 : index
    %c0_58 = arith.constant 0 : index
    %162 = vector.load %arg16[%c3_56, %c0_57, %c0_58] : memref<8x2x32xf32, #tpu.memory_space<vmem>>, vector<1x2x32xf32>
    %163 = vector.shape_cast %162 : vector<1x2x32xf32> to vector<2x32xf32>
    %164 = vector.shape_cast %161 : vector<2x32xf32> to vector<1x2x32xf32>
    tpu.vector_store %arg16[%c3_56, %c0_57, %c0_58], %164 {strides = array<i32>} : memref<8x2x32xf32, #tpu.memory_space<vmem>>, vector<1x2x32xf32>,
    %cst_59 = arith.constant dense<0.000000e+00> : vector<2x128xf32>
    %165 = tpu.matmul %161, %0, %cst_59 {dimension_numbers = #tpu.dot_dimension_numbers<[1], [0], [0], [1], [0, 0, 1, 1], [], []>} : vector<2x32xf32>, vector<32x128xf32>, vector<2x128xf32> -> vector<2x128xf32>
    %166 = arith.addf %27, %165 : vector<2x128xf32>
    %167 = vector.extract_strided_slice %166 {offsets = [0, 0], sizes = [2, 32], strides = [1, 1]} : vector<2x128xf32> to vector<2x32xf32>
    %168 = arith.negf %167 : vector<2x32xf32>
    %169 = math.exp %168 : vector<2x32xf32>
    %cst_60 = arith.constant 1.000000e+00 : f32
    %170 = vector.broadcast %cst_60 : f32 to vector<2x32xf32>
    %171 = arith.addf %170, %169 : vector<2x32xf32>
    %172 = arith.divf %170, %171 : vector<2x32xf32>
    %173 = vector.extract_strided_slice %166 {offsets = [0, 32], sizes = [2, 32], strides = [1, 1]} : vector<2x128xf32> to vector<2x32xf32>
    %174 = arith.negf %173 : vector<2x32xf32>
    %175 = math.exp %174 : vector<2x32xf32>
    %cst_61 = arith.constant 1.000000e+00 : f32
    %176 = vector.broadcast %cst_61 : f32 to vector<2x32xf32>
    %177 = arith.addf %176, %175 : vector<2x32xf32>
    %178 = arith.divf %176, %177 : vector<2x32xf32>
    %179 = vector.extract_strided_slice %166 {offsets = [0, 64], sizes = [2, 32], strides = [1, 1]} : vector<2x128xf32> to vector<2x32xf32>
    %180 = math.tanh %179 : vector<2x32xf32>
    %181 = vector.extract_strided_slice %166 {offsets = [0, 96], sizes = [2, 32], strides = [1, 1]} : vector<2x128xf32> to vector<2x32xf32>
    %182 = arith.negf %181 : vector<2x32xf32>
    %183 = math.exp %182 : vector<2x32xf32>
    %cst_62 = arith.constant 1.000000e+00 : f32
    %184 = vector.broadcast %cst_62 : f32 to vector<2x32xf32>
    %185 = arith.addf %184, %183 : vector<2x32xf32>
    %186 = arith.divf %184, %185 : vector<2x32xf32>
    %187 = arith.mulf %178, %159 : vector<2x32xf32>
    %188 = arith.mulf %172, %180 : vector<2x32xf32>
    %189 = arith.addf %187, %188 : vector<2x32xf32>
    %190 = math.tanh %189 : vector<2x32xf32>
    %191 = arith.mulf %186, %190 : vector<2x32xf32>
    %c4_63 = arith.constant 4 : index
    %c0_64 = arith.constant 0 : index
    %c0_65 = arith.constant 0 : index
    %192 = vector.load %arg16[%c4_63, %c0_64, %c0_65] : memref<8x2x32xf32, #tpu.memory_space<vmem>>, vector<1x2x32xf32>
    %193 = vector.shape_cast %192 : vector<1x2x32xf32> to vector<2x32xf32>
    %194 = vector.shape_cast %191 : vector<2x32xf32> to vector<1x2x32xf32>
    tpu.vector_store %arg16[%c4_63, %c0_64, %c0_65], %194 {strides = array<i32>} : memref<8x2x32xf32, #tpu.memory_space<vmem>>, vector<1x2x32xf32>,
    %cst_66 = arith.constant dense<0.000000e+00> : vector<2x128xf32>
    %195 = tpu.matmul %191, %0, %cst_66 {dimension_numbers = #tpu.dot_dimension_numbers<[1], [0], [0], [1], [0, 0, 1, 1], [], []>} : vector<2x32xf32>, vector<32x128xf32>, vector<2x128xf32> -> vector<2x128xf32>
    %196 = arith.addf %32, %195 : vector<2x128xf32>
    %197 = vector.extract_strided_slice %196 {offsets = [0, 0], sizes = [2, 32], strides = [1, 1]} : vector<2x128xf32> to vector<2x32xf32>
    %198 = arith.negf %197 : vector<2x32xf32>
    %199 = math.exp %198 : vector<2x32xf32>
    %cst_67 = arith.constant 1.000000e+00 : f32
    %200 = vector.broadcast %cst_67 : f32 to vector<2x32xf32>
    %201 = arith.addf %200, %199 : vector<2x32xf32>
    %202 = arith.divf %200, %201 : vector<2x32xf32>
    %203 = vector.extract_strided_slice %196 {offsets = [0, 32], sizes = [2, 32], strides = [1, 1]} : vector<2x128xf32> to vector<2x32xf32>
    %204 = arith.negf %203 : vector<2x32xf32>
    %205 = math.exp %204 : vector<2x32xf32>
    %cst_68 = arith.constant 1.000000e+00 : f32
    %206 = vector.broadcast %cst_68 : f32 to vector<2x32xf32>
    %207 = arith.addf %206, %205 : vector<2x32xf32>
    %208 = arith.divf %206, %207 : vector<2x32xf32>
    %209 = vector.extract_strided_slice %196 {offsets = [0, 64], sizes = [2, 32], strides = [1, 1]} : vector<2x128xf32> to vector<2x32xf32>
    %210 = math.tanh %209 : vector<2x32xf32>
    %211 = vector.extract_strided_slice %196 {offsets = [0, 96], sizes = [2, 32], strides = [1, 1]} : vector<2x128xf32> to vector<2x32xf32>
    %212 = arith.negf %211 : vector<2x32xf32>
    %213 = math.exp %212 : vector<2x32xf32>
    %cst_69 = arith.constant 1.000000e+00 : f32
    %214 = vector.broadcast %cst_69 : f32 to vector<2x32xf32>
    %215 = arith.addf %214, %213 : vector<2x32xf32>
    %216 = arith.divf %214, %215 : vector<2x32xf32>
    %217 = arith.mulf %208, %189 : vector<2x32xf32>
    %218 = arith.mulf %202, %210 : vector<2x32xf32>
    %219 = arith.addf %217, %218 : vector<2x32xf32>
    %220 = math.tanh %219 : vector<2x32xf32>
    %221 = arith.mulf %216, %220 : vector<2x32xf32>
    %c5_70 = arith.constant 5 : index
    %c0_71 = arith.constant 0 : index
    %c0_72 = arith.constant 0 : index
    %222 = vector.load %arg16[%c5_70, %c0_71, %c0_72] : memref<8x2x32xf32, #tpu.memory_space<vmem>>, vector<1x2x32xf32>
    %223 = vector.shape_cast %222 : vector<1x2x32xf32> to vector<2x32xf32>
    %224 = vector.shape_cast %221 : vector<2x32xf32> to vector<1x2x32xf32>
    tpu.vector_store %arg16[%c5_70, %c0_71, %c0_72], %224 {strides = array<i32>} : memref<8x2x32xf32, #tpu.memory_space<vmem>>, vector<1x2x32xf32>,
    %cst_73 = arith.constant dense<0.000000e+00> : vector<2x128xf32>
    %225 = tpu.matmul %221, %0, %cst_73 {dimension_numbers = #tpu.dot_dimension_numbers<[1], [0], [0], [1], [0, 0, 1, 1], [], []>} : vector<2x32xf32>, vector<32x128xf32>, vector<2x128xf32> -> vector<2x128xf32>
    %226 = arith.addf %37, %225 : vector<2x128xf32>
    %227 = vector.extract_strided_slice %226 {offsets = [0, 0], sizes = [2, 32], strides = [1, 1]} : vector<2x128xf32> to vector<2x32xf32>
    %228 = arith.negf %227 : vector<2x32xf32>
    %229 = math.exp %228 : vector<2x32xf32>
    %cst_74 = arith.constant 1.000000e+00 : f32
    %230 = vector.broadcast %cst_74 : f32 to vector<2x32xf32>
    %231 = arith.addf %230, %229 : vector<2x32xf32>
    %232 = arith.divf %230, %231 : vector<2x32xf32>
    %233 = vector.extract_strided_slice %226 {offsets = [0, 32], sizes = [2, 32], strides = [1, 1]} : vector<2x128xf32> to vector<2x32xf32>
    %234 = arith.negf %233 : vector<2x32xf32>
    %235 = math.exp %234 : vector<2x32xf32>
    %cst_75 = arith.constant 1.000000e+00 : f32
    %236 = vector.broadcast %cst_75 : f32 to vector<2x32xf32>
    %237 = arith.addf %236, %235 : vector<2x32xf32>
    %238 = arith.divf %236, %237 : vector<2x32xf32>
    %239 = vector.extract_strided_slice %226 {offsets = [0, 64], sizes = [2, 32], strides = [1, 1]} : vector<2x128xf32> to vector<2x32xf32>
    %240 = math.tanh %239 : vector<2x32xf32>
    %241 = vector.extract_strided_slice %226 {offsets = [0, 96], sizes = [2, 32], strides = [1, 1]} : vector<2x128xf32> to vector<2x32xf32>
    %242 = arith.negf %241 : vector<2x32xf32>
    %243 = math.exp %242 : vector<2x32xf32>
    %cst_76 = arith.constant 1.000000e+00 : f32
    %244 = vector.broadcast %cst_76 : f32 to vector<2x32xf32>
    %245 = arith.addf %244, %243 : vector<2x32xf32>
    %246 = arith.divf %244, %245 : vector<2x32xf32>
    %247 = arith.mulf %238, %219 : vector<2x32xf32>
    %248 = arith.mulf %232, %240 : vector<2x32xf32>
    %249 = arith.addf %247, %248 : vector<2x32xf32>
    %250 = math.tanh %249 : vector<2x32xf32>
    %251 = arith.mulf %246, %250 : vector<2x32xf32>
    %c6_77 = arith.constant 6 : index
    %c0_78 = arith.constant 0 : index
    %c0_79 = arith.constant 0 : index
    %252 = vector.load %arg16[%c6_77, %c0_78, %c0_79] : memref<8x2x32xf32, #tpu.memory_space<vmem>>, vector<1x2x32xf32>
    %253 = vector.shape_cast %252 : vector<1x2x32xf32> to vector<2x32xf32>
    %254 = vector.shape_cast %251 : vector<2x32xf32> to vector<1x2x32xf32>
    tpu.vector_store %arg16[%c6_77, %c0_78, %c0_79], %254 {strides = array<i32>} : memref<8x2x32xf32, #tpu.memory_space<vmem>>, vector<1x2x32xf32>,
    %cst_80 = arith.constant dense<0.000000e+00> : vector<2x128xf32>
    %255 = tpu.matmul %251, %0, %cst_80 {dimension_numbers = #tpu.dot_dimension_numbers<[1], [0], [0], [1], [0, 0, 1, 1], [], []>} : vector<2x32xf32>, vector<32x128xf32>, vector<2x128xf32> -> vector<2x128xf32>
    %256 = arith.addf %42, %255 : vector<2x128xf32>
    %257 = vector.extract_strided_slice %256 {offsets = [0, 0], sizes = [2, 32], strides = [1, 1]} : vector<2x128xf32> to vector<2x32xf32>
    %258 = arith.negf %257 : vector<2x32xf32>
    %259 = math.exp %258 : vector<2x32xf32>
    %cst_81 = arith.constant 1.000000e+00 : f32
    %260 = vector.broadcast %cst_81 : f32 to vector<2x32xf32>
    %261 = arith.addf %260, %259 : vector<2x32xf32>
    %262 = arith.divf %260, %261 : vector<2x32xf32>
    %263 = vector.extract_strided_slice %256 {offsets = [0, 32], sizes = [2, 32], strides = [1, 1]} : vector<2x128xf32> to vector<2x32xf32>
    %264 = arith.negf %263 : vector<2x32xf32>
    %265 = math.exp %264 : vector<2x32xf32>
    %cst_82 = arith.constant 1.000000e+00 : f32
    %266 = vector.broadcast %cst_82 : f32 to vector<2x32xf32>
    %267 = arith.addf %266, %265 : vector<2x32xf32>
    %268 = arith.divf %266, %267 : vector<2x32xf32>
    %269 = vector.extract_strided_slice %256 {offsets = [0, 64], sizes = [2, 32], strides = [1, 1]} : vector<2x128xf32> to vector<2x32xf32>
    %270 = math.tanh %269 : vector<2x32xf32>
    %271 = vector.extract_strided_slice %256 {offsets = [0, 96], sizes = [2, 32], strides = [1, 1]} : vector<2x128xf32> to vector<2x32xf32>
    %272 = arith.negf %271 : vector<2x32xf32>
    %273 = math.exp %272 : vector<2x32xf32>
    %cst_83 = arith.constant 1.000000e+00 : f32
    %274 = vector.broadcast %cst_83 : f32 to vector<2x32xf32>
    %275 = arith.addf %274, %273 : vector<2x32xf32>
    %276 = arith.divf %274, %275 : vector<2x32xf32>
    %277 = arith.mulf %268, %249 : vector<2x32xf32>
    %278 = arith.mulf %262, %270 : vector<2x32xf32>
    %279 = arith.addf %277, %278 : vector<2x32xf32>
    %280 = math.tanh %279 : vector<2x32xf32>
    %281 = arith.mulf %276, %280 : vector<2x32xf32>
    %c7_84 = arith.constant 7 : index
    %c0_85 = arith.constant 0 : index
    %c0_86 = arith.constant 0 : index
    %282 = vector.load %arg16[%c7_84, %c0_85, %c0_86] : memref<8x2x32xf32, #tpu.memory_space<vmem>>, vector<1x2x32xf32>
    %283 = vector.shape_cast %282 : vector<1x2x32xf32> to vector<2x32xf32>
    %284 = vector.shape_cast %281 : vector<2x32xf32> to vector<1x2x32xf32>
    tpu.vector_store %arg16[%c7_84, %c0_85, %c0_86], %284 {strides = array<i32>} : memref<8x2x32xf32, #tpu.memory_space<vmem>>, vector<1x2x32xf32>,
    %c0_87 = arith.constant 0 : index
    %c0_88 = arith.constant 0 : index
    %285 = vector.load %arg7[%c0_87, %c0_88] : memref<32x128xf32, #tpu.memory_space<vmem>>, vector<32x128xf32>
    %c0_89 = arith.constant 0 : index
    %c0_90 = arith.constant 0 : index
    %286 = vector.load %arg8[%c0_89, %c0_90] : memref<1x128xf32, #tpu.memory_space<vmem>>, vector<1x128xf32>
    %c0_91 = arith.constant 0 : index
    %c0_92 = arith.constant 0 : index
    %287 = vector.load %arg6[%c0_91, %c0_92] : memref<16x128xf32, #tpu.memory_space<vmem>>, vector<16x128xf32>
    %c0_93 = arith.constant 0 : index
    %c0_94 = arith.constant 0 : index
    %c0_95 = arith.constant 0 : index
    %288 = vector.load %arg2[%c0_93, %c0_94, %c0_95] : memref<8x2x16xf32, #tpu.memory_space<vmem>>, vector<1x2x16xf32>
    %289 = vector.shape_cast %288 : vector<1x2x16xf32> to vector<2x16xf32>
    %cst_96 = arith.constant dense<0.000000e+00> : vector<2x128xf32>
    %290 = tpu.matmul %289, %287, %cst_96 {dimension_numbers = #tpu.dot_dimension_numbers<[1], [0], [0], [1], [0, 0, 1, 1], [], []>} : vector<2x16xf32>, vector<16x128xf32>, vector<2x128xf32> -> vector<2x128xf32>
    %291 = vector.broadcast %286 : vector<1x128xf32> to vector<2x128xf32>
    %292 = arith.addf %290, %291 : vector<2x128xf32>
    %c1_97 = arith.constant 1 : index
    %c0_98 = arith.constant 0 : index
    %c0_99 = arith.constant 0 : index
    %293 = vector.load %arg2[%c1_97, %c0_98, %c0_99] : memref<8x2x16xf32, #tpu.memory_space<vmem>>, vector<1x2x16xf32>
    %294 = vector.shape_cast %293 : vector<1x2x16xf32> to vector<2x16xf32>
    %cst_100 = arith.constant dense<0.000000e+00> : vector<2x128xf32>
    %295 = tpu.matmul %294, %287, %cst_100 {dimension_numbers = #tpu.dot_dimension_numbers<[1], [0], [0], [1], [0, 0, 1, 1], [], []>} : vector<2x16xf32>, vector<16x128xf32>, vector<2x128xf32> -> vector<2x128xf32>
    %296 = vector.broadcast %286 : vector<1x128xf32> to vector<2x128xf32>
    %297 = arith.addf %295, %296 : vector<2x128xf32>
    %c2_101 = arith.constant 2 : index
    %c0_102 = arith.constant 0 : index
    %c0_103 = arith.constant 0 : index
    %298 = vector.load %arg2[%c2_101, %c0_102, %c0_103] : memref<8x2x16xf32, #tpu.memory_space<vmem>>, vector<1x2x16xf32>
    %299 = vector.shape_cast %298 : vector<1x2x16xf32> to vector<2x16xf32>
    %cst_104 = arith.constant dense<0.000000e+00> : vector<2x128xf32>
    %300 = tpu.matmul %299, %287, %cst_104 {dimension_numbers = #tpu.dot_dimension_numbers<[1], [0], [0], [1], [0, 0, 1, 1], [], []>} : vector<2x16xf32>, vector<16x128xf32>, vector<2x128xf32> -> vector<2x128xf32>
    %301 = vector.broadcast %286 : vector<1x128xf32> to vector<2x128xf32>
    %302 = arith.addf %300, %301 : vector<2x128xf32>
    %c3_105 = arith.constant 3 : index
    %c0_106 = arith.constant 0 : index
    %c0_107 = arith.constant 0 : index
    %303 = vector.load %arg2[%c3_105, %c0_106, %c0_107] : memref<8x2x16xf32, #tpu.memory_space<vmem>>, vector<1x2x16xf32>
    %304 = vector.shape_cast %303 : vector<1x2x16xf32> to vector<2x16xf32>
    %cst_108 = arith.constant dense<0.000000e+00> : vector<2x128xf32>
    %305 = tpu.matmul %304, %287, %cst_108 {dimension_numbers = #tpu.dot_dimension_numbers<[1], [0], [0], [1], [0, 0, 1, 1], [], []>} : vector<2x16xf32>, vector<16x128xf32>, vector<2x128xf32> -> vector<2x128xf32>
    %306 = vector.broadcast %286 : vector<1x128xf32> to vector<2x128xf32>
    %307 = arith.addf %305, %306 : vector<2x128xf32>
    %c4_109 = arith.constant 4 : index
    %c0_110 = arith.constant 0 : index
    %c0_111 = arith.constant 0 : index
    %308 = vector.load %arg2[%c4_109, %c0_110, %c0_111] : memref<8x2x16xf32, #tpu.memory_space<vmem>>, vector<1x2x16xf32>
    %309 = vector.shape_cast %308 : vector<1x2x16xf32> to vector<2x16xf32>
    %cst_112 = arith.constant dense<0.000000e+00> : vector<2x128xf32>
    %310 = tpu.matmul %309, %287, %cst_112 {dimension_numbers = #tpu.dot_dimension_numbers<[1], [0], [0], [1], [0, 0, 1, 1], [], []>} : vector<2x16xf32>, vector<16x128xf32>, vector<2x128xf32> -> vector<2x128xf32>
    %311 = vector.broadcast %286 : vector<1x128xf32> to vector<2x128xf32>
    %312 = arith.addf %310, %311 : vector<2x128xf32>
    %c5_113 = arith.constant 5 : index
    %c0_114 = arith.constant 0 : index
    %c0_115 = arith.constant 0 : index
    %313 = vector.load %arg2[%c5_113, %c0_114, %c0_115] : memref<8x2x16xf32, #tpu.memory_space<vmem>>, vector<1x2x16xf32>
    %314 = vector.shape_cast %313 : vector<1x2x16xf32> to vector<2x16xf32>
    %cst_116 = arith.constant dense<0.000000e+00> : vector<2x128xf32>
    %315 = tpu.matmul %314, %287, %cst_116 {dimension_numbers = #tpu.dot_dimension_numbers<[1], [0], [0], [1], [0, 0, 1, 1], [], []>} : vector<2x16xf32>, vector<16x128xf32>, vector<2x128xf32> -> vector<2x128xf32>
    %316 = vector.broadcast %286 : vector<1x128xf32> to vector<2x128xf32>
    %317 = arith.addf %315, %316 : vector<2x128xf32>
    %c6_117 = arith.constant 6 : index
    %c0_118 = arith.constant 0 : index
    %c0_119 = arith.constant 0 : index
    %318 = vector.load %arg2[%c6_117, %c0_118, %c0_119] : memref<8x2x16xf32, #tpu.memory_space<vmem>>, vector<1x2x16xf32>
    %319 = vector.shape_cast %318 : vector<1x2x16xf32> to vector<2x16xf32>
    %cst_120 = arith.constant dense<0.000000e+00> : vector<2x128xf32>
    %320 = tpu.matmul %319, %287, %cst_120 {dimension_numbers = #tpu.dot_dimension_numbers<[1], [0], [0], [1], [0, 0, 1, 1], [], []>} : vector<2x16xf32>, vector<16x128xf32>, vector<2x128xf32> -> vector<2x128xf32>
    %321 = vector.broadcast %286 : vector<1x128xf32> to vector<2x128xf32>
    %322 = arith.addf %320, %321 : vector<2x128xf32>
    %c7_121 = arith.constant 7 : index
    %c0_122 = arith.constant 0 : index
    %c0_123 = arith.constant 0 : index
    %323 = vector.load %arg2[%c7_121, %c0_122, %c0_123] : memref<8x2x16xf32, #tpu.memory_space<vmem>>, vector<1x2x16xf32>
    %324 = vector.shape_cast %323 : vector<1x2x16xf32> to vector<2x16xf32>
    %cst_124 = arith.constant dense<0.000000e+00> : vector<2x128xf32>
    %325 = tpu.matmul %324, %287, %cst_124 {dimension_numbers = #tpu.dot_dimension_numbers<[1], [0], [0], [1], [0, 0, 1, 1], [], []>} : vector<2x16xf32>, vector<16x128xf32>, vector<2x128xf32> -> vector<2x128xf32>
    %326 = vector.broadcast %286 : vector<1x128xf32> to vector<2x128xf32>
    %327 = arith.addf %325, %326 : vector<2x128xf32>
    %cst_125 = arith.constant 0.000000e+00 : f32
    %328 = vector.broadcast %cst_125 : f32 to vector<2x32xf32>
    %cst_126 = arith.constant 0.000000e+00 : f32
    %329 = vector.broadcast %cst_126 : f32 to vector<2x32xf32>
    %cst_127 = arith.constant dense<0.000000e+00> : vector<2x128xf32>
    %330 = tpu.matmul %328, %285, %cst_127 {dimension_numbers = #tpu.dot_dimension_numbers<[1], [0], [0], [1], [0, 0, 1, 1], [], []>} : vector<2x32xf32>, vector<32x128xf32>, vector<2x128xf32> -> vector<2x128xf32>
    %331 = arith.addf %327, %330 : vector<2x128xf32>
    %332 = vector.extract_strided_slice %331 {offsets = [0, 0], sizes = [2, 32], strides = [1, 1]} : vector<2x128xf32> to vector<2x32xf32>
    %333 = arith.negf %332 : vector<2x32xf32>
    %334 = math.exp %333 : vector<2x32xf32>
    %cst_128 = arith.constant 1.000000e+00 : f32
    %335 = vector.broadcast %cst_128 : f32 to vector<2x32xf32>
    %336 = arith.addf %335, %334 : vector<2x32xf32>
    %337 = arith.divf %335, %336 : vector<2x32xf32>
    %338 = vector.extract_strided_slice %331 {offsets = [0, 32], sizes = [2, 32], strides = [1, 1]} : vector<2x128xf32> to vector<2x32xf32>
    %339 = arith.negf %338 : vector<2x32xf32>
    %340 = math.exp %339 : vector<2x32xf32>
    %cst_129 = arith.constant 1.000000e+00 : f32
    %341 = vector.broadcast %cst_129 : f32 to vector<2x32xf32>
    %342 = arith.addf %341, %340 : vector<2x32xf32>
    %343 = arith.divf %341, %342 : vector<2x32xf32>
    %344 = vector.extract_strided_slice %331 {offsets = [0, 64], sizes = [2, 32], strides = [1, 1]} : vector<2x128xf32> to vector<2x32xf32>
    %345 = math.tanh %344 : vector<2x32xf32>
    %346 = vector.extract_strided_slice %331 {offsets = [0, 96], sizes = [2, 32], strides = [1, 1]} : vector<2x128xf32> to vector<2x32xf32>
    %347 = arith.negf %346 : vector<2x32xf32>
    %348 = math.exp %347 : vector<2x32xf32>
    %cst_130 = arith.constant 1.000000e+00 : f32
    %349 = vector.broadcast %cst_130 : f32 to vector<2x32xf32>
    %350 = arith.addf %349, %348 : vector<2x32xf32>
    %351 = arith.divf %349, %350 : vector<2x32xf32>
    %352 = arith.mulf %343, %329 : vector<2x32xf32>
    %353 = arith.mulf %337, %345 : vector<2x32xf32>
    %354 = arith.addf %352, %353 : vector<2x32xf32>
    %355 = math.tanh %354 : vector<2x32xf32>
    %356 = arith.mulf %351, %355 : vector<2x32xf32>
    %c7_131 = arith.constant 7 : index
    %c0_132 = arith.constant 0 : index
    %c0_133 = arith.constant 0 : index
    %357 = vector.load %arg17[%c7_131, %c0_132, %c0_133] : memref<8x2x32xf32, #tpu.memory_space<vmem>>, vector<1x2x32xf32>
    %358 = vector.shape_cast %357 : vector<1x2x32xf32> to vector<2x32xf32>
    %359 = vector.shape_cast %356 : vector<2x32xf32> to vector<1x2x32xf32>
    tpu.vector_store %arg17[%c7_131, %c0_132, %c0_133], %359 {strides = array<i32>} : memref<8x2x32xf32, #tpu.memory_space<vmem>>, vector<1x2x32xf32>,
    %cst_134 = arith.constant dense<0.000000e+00> : vector<2x128xf32>
    %360 = tpu.matmul %356, %285, %cst_134 {dimension_numbers = #tpu.dot_dimension_numbers<[1], [0], [0], [1], [0, 0, 1, 1], [], []>} : vector<2x32xf32>, vector<32x128xf32>, vector<2x128xf32> -> vector<2x128xf32>
    %361 = arith.addf %322, %360 : vector<2x128xf32>
    %362 = vector.extract_strided_slice %361 {offsets = [0, 0], sizes = [2, 32], strides = [1, 1]} : vector<2x128xf32> to vector<2x32xf32>
    %363 = arith.negf %362 : vector<2x32xf32>
    %364 = math.exp %363 : vector<2x32xf32>
    %cst_135 = arith.constant 1.000000e+00 : f32
    %365 = vector.broadcast %cst_135 : f32 to vector<2x32xf32>
    %366 = arith.addf %365, %364 : vector<2x32xf32>
    %367 = arith.divf %365, %366 : vector<2x32xf32>
    %368 = vector.extract_strided_slice %361 {offsets = [0, 32], sizes = [2, 32], strides = [1, 1]} : vector<2x128xf32> to vector<2x32xf32>
    %369 = arith.negf %368 : vector<2x32xf32>
    %370 = math.exp %369 : vector<2x32xf32>
    %cst_136 = arith.constant 1.000000e+00 : f32
    %371 = vector.broadcast %cst_136 : f32 to vector<2x32xf32>
    %372 = arith.addf %371, %370 : vector<2x32xf32>
    %373 = arith.divf %371, %372 : vector<2x32xf32>
    %374 = vector.extract_strided_slice %361 {offsets = [0, 64], sizes = [2, 32], strides = [1, 1]} : vector<2x128xf32> to vector<2x32xf32>
    %375 = math.tanh %374 : vector<2x32xf32>
    %376 = vector.extract_strided_slice %361 {offsets = [0, 96], sizes = [2, 32], strides = [1, 1]} : vector<2x128xf32> to vector<2x32xf32>
    %377 = arith.negf %376 : vector<2x32xf32>
    %378 = math.exp %377 : vector<2x32xf32>
    %cst_137 = arith.constant 1.000000e+00 : f32
    %379 = vector.broadcast %cst_137 : f32 to vector<2x32xf32>
    %380 = arith.addf %379, %378 : vector<2x32xf32>
    %381 = arith.divf %379, %380 : vector<2x32xf32>
    %382 = arith.mulf %373, %354 : vector<2x32xf32>
    %383 = arith.mulf %367, %375 : vector<2x32xf32>
    %384 = arith.addf %382, %383 : vector<2x32xf32>
    %385 = math.tanh %384 : vector<2x32xf32>
    %386 = arith.mulf %381, %385 : vector<2x32xf32>
    %c6_138 = arith.constant 6 : index
    %c0_139 = arith.constant 0 : index
    %c0_140 = arith.constant 0 : index
    %387 = vector.load %arg17[%c6_138, %c0_139, %c0_140] : memref<8x2x32xf32, #tpu.memory_space<vmem>>, vector<1x2x32xf32>
    %388 = vector.shape_cast %387 : vector<1x2x32xf32> to vector<2x32xf32>
    %389 = vector.shape_cast %386 : vector<2x32xf32> to vector<1x2x32xf32>
    tpu.vector_store %arg17[%c6_138, %c0_139, %c0_140], %389 {strides = array<i32>} : memref<8x2x32xf32, #tpu.memory_space<vmem>>, vector<1x2x32xf32>,
    %cst_141 = arith.constant dense<0.000000e+00> : vector<2x128xf32>
    %390 = tpu.matmul %386, %285, %cst_141 {dimension_numbers = #tpu.dot_dimension_numbers<[1], [0], [0], [1], [0, 0, 1, 1], [], []>} : vector<2x32xf32>, vector<32x128xf32>, vector<2x128xf32> -> vector<2x128xf32>
    %391 = arith.addf %317, %390 : vector<2x128xf32>
    %392 = vector.extract_strided_slice %391 {offsets = [0, 0], sizes = [2, 32], strides = [1, 1]} : vector<2x128xf32> to vector<2x32xf32>
    %393 = arith.negf %392 : vector<2x32xf32>
    %394 = math.exp %393 : vector<2x32xf32>
    %cst_142 = arith.constant 1.000000e+00 : f32
    %395 = vector.broadcast %cst_142 : f32 to vector<2x32xf32>
    %396 = arith.addf %395, %394 : vector<2x32xf32>
    %397 = arith.divf %395, %396 : vector<2x32xf32>
    %398 = vector.extract_strided_slice %391 {offsets = [0, 32], sizes = [2, 32], strides = [1, 1]} : vector<2x128xf32> to vector<2x32xf32>
    %399 = arith.negf %398 : vector<2x32xf32>
    %400 = math.exp %399 : vector<2x32xf32>
    %cst_143 = arith.constant 1.000000e+00 : f32
    %401 = vector.broadcast %cst_143 : f32 to vector<2x32xf32>
    %402 = arith.addf %401, %400 : vector<2x32xf32>
    %403 = arith.divf %401, %402 : vector<2x32xf32>
    %404 = vector.extract_strided_slice %391 {offsets = [0, 64], sizes = [2, 32], strides = [1, 1]} : vector<2x128xf32> to vector<2x32xf32>
    %405 = math.tanh %404 : vector<2x32xf32>
    %406 = vector.extract_strided_slice %391 {offsets = [0, 96], sizes = [2, 32], strides = [1, 1]} : vector<2x128xf32> to vector<2x32xf32>
    %407 = arith.negf %406 : vector<2x32xf32>
    %408 = math.exp %407 : vector<2x32xf32>
    %cst_144 = arith.constant 1.000000e+00 : f32
    %409 = vector.broadcast %cst_144 : f32 to vector<2x32xf32>
    %410 = arith.addf %409, %408 : vector<2x32xf32>
    %411 = arith.divf %409, %410 : vector<2x32xf32>
    %412 = arith.mulf %403, %384 : vector<2x32xf32>
    %413 = arith.mulf %397, %405 : vector<2x32xf32>
    %414 = arith.addf %412, %413 : vector<2x32xf32>
    %415 = math.tanh %414 : vector<2x32xf32>
    %416 = arith.mulf %411, %415 : vector<2x32xf32>
    %c5_145 = arith.constant 5 : index
    %c0_146 = arith.constant 0 : index
    %c0_147 = arith.constant 0 : index
    %417 = vector.load %arg17[%c5_145, %c0_146, %c0_147] : memref<8x2x32xf32, #tpu.memory_space<vmem>>, vector<1x2x32xf32>
    %418 = vector.shape_cast %417 : vector<1x2x32xf32> to vector<2x32xf32>
    %419 = vector.shape_cast %416 : vector<2x32xf32> to vector<1x2x32xf32>
    tpu.vector_store %arg17[%c5_145, %c0_146, %c0_147], %419 {strides = array<i32>} : memref<8x2x32xf32, #tpu.memory_space<vmem>>, vector<1x2x32xf32>,
    %cst_148 = arith.constant dense<0.000000e+00> : vector<2x128xf32>
    %420 = tpu.matmul %416, %285, %cst_148 {dimension_numbers = #tpu.dot_dimension_numbers<[1], [0], [0], [1], [0, 0, 1, 1], [], []>} : vector<2x32xf32>, vector<32x128xf32>, vector<2x128xf32> -> vector<2x128xf32>
    %421 = arith.addf %312, %420 : vector<2x128xf32>
    %422 = vector.extract_strided_slice %421 {offsets = [0, 0], sizes = [2, 32], strides = [1, 1]} : vector<2x128xf32> to vector<2x32xf32>
    %423 = arith.negf %422 : vector<2x32xf32>
    %424 = math.exp %423 : vector<2x32xf32>
    %cst_149 = arith.constant 1.000000e+00 : f32
    %425 = vector.broadcast %cst_149 : f32 to vector<2x32xf32>
    %426 = arith.addf %425, %424 : vector<2x32xf32>
    %427 = arith.divf %425, %426 : vector<2x32xf32>
    %428 = vector.extract_strided_slice %421 {offsets = [0, 32], sizes = [2, 32], strides = [1, 1]} : vector<2x128xf32> to vector<2x32xf32>
    %429 = arith.negf %428 : vector<2x32xf32>
    %430 = math.exp %429 : vector<2x32xf32>
    %cst_150 = arith.constant 1.000000e+00 : f32
    %431 = vector.broadcast %cst_150 : f32 to vector<2x32xf32>
    %432 = arith.addf %431, %430 : vector<2x32xf32>
    %433 = arith.divf %431, %432 : vector<2x32xf32>
    %434 = vector.extract_strided_slice %421 {offsets = [0, 64], sizes = [2, 32], strides = [1, 1]} : vector<2x128xf32> to vector<2x32xf32>
    %435 = math.tanh %434 : vector<2x32xf32>
    %436 = vector.extract_strided_slice %421 {offsets = [0, 96], sizes = [2, 32], strides = [1, 1]} : vector<2x128xf32> to vector<2x32xf32>
    %437 = arith.negf %436 : vector<2x32xf32>
    %438 = math.exp %437 : vector<2x32xf32>
    %cst_151 = arith.constant 1.000000e+00 : f32
    %439 = vector.broadcast %cst_151 : f32 to vector<2x32xf32>
    %440 = arith.addf %439, %438 : vector<2x32xf32>
    %441 = arith.divf %439, %440 : vector<2x32xf32>
    %442 = arith.mulf %433, %414 : vector<2x32xf32>
    %443 = arith.mulf %427, %435 : vector<2x32xf32>
    %444 = arith.addf %442, %443 : vector<2x32xf32>
    %445 = math.tanh %444 : vector<2x32xf32>
    %446 = arith.mulf %441, %445 : vector<2x32xf32>
    %c4_152 = arith.constant 4 : index
    %c0_153 = arith.constant 0 : index
    %c0_154 = arith.constant 0 : index
    %447 = vector.load %arg17[%c4_152, %c0_153, %c0_154] : memref<8x2x32xf32, #tpu.memory_space<vmem>>, vector<1x2x32xf32>
    %448 = vector.shape_cast %447 : vector<1x2x32xf32> to vector<2x32xf32>
    %449 = vector.shape_cast %446 : vector<2x32xf32> to vector<1x2x32xf32>
    tpu.vector_store %arg17[%c4_152, %c0_153, %c0_154], %449 {strides = array<i32>} : memref<8x2x32xf32, #tpu.memory_space<vmem>>, vector<1x2x32xf32>,
    %cst_155 = arith.constant dense<0.000000e+00> : vector<2x128xf32>
    %450 = tpu.matmul %446, %285, %cst_155 {dimension_numbers = #tpu.dot_dimension_numbers<[1], [0], [0], [1], [0, 0, 1, 1], [], []>} : vector<2x32xf32>, vector<32x128xf32>, vector<2x128xf32> -> vector<2x128xf32>
    %451 = arith.addf %307, %450 : vector<2x128xf32>
    %452 = vector.extract_strided_slice %451 {offsets = [0, 0], sizes = [2, 32], strides = [1, 1]} : vector<2x128xf32> to vector<2x32xf32>
    %453 = arith.negf %452 : vector<2x32xf32>
    %454 = math.exp %453 : vector<2x32xf32>
    %cst_156 = arith.constant 1.000000e+00 : f32
    %455 = vector.broadcast %cst_156 : f32 to vector<2x32xf32>
    %456 = arith.addf %455, %454 : vector<2x32xf32>
    %457 = arith.divf %455, %456 : vector<2x32xf32>
    %458 = vector.extract_strided_slice %451 {offsets = [0, 32], sizes = [2, 32], strides = [1, 1]} : vector<2x128xf32> to vector<2x32xf32>
    %459 = arith.negf %458 : vector<2x32xf32>
    %460 = math.exp %459 : vector<2x32xf32>
    %cst_157 = arith.constant 1.000000e+00 : f32
    %461 = vector.broadcast %cst_157 : f32 to vector<2x32xf32>
    %462 = arith.addf %461, %460 : vector<2x32xf32>
    %463 = arith.divf %461, %462 : vector<2x32xf32>
    %464 = vector.extract_strided_slice %451 {offsets = [0, 64], sizes = [2, 32], strides = [1, 1]} : vector<2x128xf32> to vector<2x32xf32>
    %465 = math.tanh %464 : vector<2x32xf32>
    %466 = vector.extract_strided_slice %451 {offsets = [0, 96], sizes = [2, 32], strides = [1, 1]} : vector<2x128xf32> to vector<2x32xf32>
    %467 = arith.negf %466 : vector<2x32xf32>
    %468 = math.exp %467 : vector<2x32xf32>
    %cst_158 = arith.constant 1.000000e+00 : f32
    %469 = vector.broadcast %cst_158 : f32 to vector<2x32xf32>
    %470 = arith.addf %469, %468 : vector<2x32xf32>
    %471 = arith.divf %469, %470 : vector<2x32xf32>
    %472 = arith.mulf %463, %444 : vector<2x32xf32>
    %473 = arith.mulf %457, %465 : vector<2x32xf32>
    %474 = arith.addf %472, %473 : vector<2x32xf32>
    %475 = math.tanh %474 : vector<2x32xf32>
    %476 = arith.mulf %471, %475 : vector<2x32xf32>
    %c3_159 = arith.constant 3 : index
    %c0_160 = arith.constant 0 : index
    %c0_161 = arith.constant 0 : index
    %477 = vector.load %arg17[%c3_159, %c0_160, %c0_161] : memref<8x2x32xf32, #tpu.memory_space<vmem>>, vector<1x2x32xf32>
    %478 = vector.shape_cast %477 : vector<1x2x32xf32> to vector<2x32xf32>
    %479 = vector.shape_cast %476 : vector<2x32xf32> to vector<1x2x32xf32>
    tpu.vector_store %arg17[%c3_159, %c0_160, %c0_161], %479 {strides = array<i32>} : memref<8x2x32xf32, #tpu.memory_space<vmem>>, vector<1x2x32xf32>,
    %cst_162 = arith.constant dense<0.000000e+00> : vector<2x128xf32>
    %480 = tpu.matmul %476, %285, %cst_162 {dimension_numbers = #tpu.dot_dimension_numbers<[1], [0], [0], [1], [0, 0, 1, 1], [], []>} : vector<2x32xf32>, vector<32x128xf32>, vector<2x128xf32> -> vector<2x128xf32>
    %481 = arith.addf %302, %480 : vector<2x128xf32>
    %482 = vector.extract_strided_slice %481 {offsets = [0, 0], sizes = [2, 32], strides = [1, 1]} : vector<2x128xf32> to vector<2x32xf32>
    %483 = arith.negf %482 : vector<2x32xf32>
    %484 = math.exp %483 : vector<2x32xf32>
    %cst_163 = arith.constant 1.000000e+00 : f32
    %485 = vector.broadcast %cst_163 : f32 to vector<2x32xf32>
    %486 = arith.addf %485, %484 : vector<2x32xf32>
    %487 = arith.divf %485, %486 : vector<2x32xf32>
    %488 = vector.extract_strided_slice %481 {offsets = [0, 32], sizes = [2, 32], strides = [1, 1]} : vector<2x128xf32> to vector<2x32xf32>
    %489 = arith.negf %488 : vector<2x32xf32>
    %490 = math.exp %489 : vector<2x32xf32>
    %cst_164 = arith.constant 1.000000e+00 : f32
    %491 = vector.broadcast %cst_164 : f32 to vector<2x32xf32>
    %492 = arith.addf %491, %490 : vector<2x32xf32>
    %493 = arith.divf %491, %492 : vector<2x32xf32>
    %494 = vector.extract_strided_slice %481 {offsets = [0, 64], sizes = [2, 32], strides = [1, 1]} : vector<2x128xf32> to vector<2x32xf32>
    %495 = math.tanh %494 : vector<2x32xf32>
    %496 = vector.extract_strided_slice %481 {offsets = [0, 96], sizes = [2, 32], strides = [1, 1]} : vector<2x128xf32> to vector<2x32xf32>
    %497 = arith.negf %496 : vector<2x32xf32>
    %498 = math.exp %497 : vector<2x32xf32>
    %cst_165 = arith.constant 1.000000e+00 : f32
    %499 = vector.broadcast %cst_165 : f32 to vector<2x32xf32>
    %500 = arith.addf %499, %498 : vector<2x32xf32>
    %501 = arith.divf %499, %500 : vector<2x32xf32>
    %502 = arith.mulf %493, %474 : vector<2x32xf32>
    %503 = arith.mulf %487, %495 : vector<2x32xf32>
    %504 = arith.addf %502, %503 : vector<2x32xf32>
    %505 = math.tanh %504 : vector<2x32xf32>
    %506 = arith.mulf %501, %505 : vector<2x32xf32>
    %c2_166 = arith.constant 2 : index
    %c0_167 = arith.constant 0 : index
    %c0_168 = arith.constant 0 : index
    %507 = vector.load %arg17[%c2_166, %c0_167, %c0_168] : memref<8x2x32xf32, #tpu.memory_space<vmem>>, vector<1x2x32xf32>
    %508 = vector.shape_cast %507 : vector<1x2x32xf32> to vector<2x32xf32>
    %509 = vector.shape_cast %506 : vector<2x32xf32> to vector<1x2x32xf32>
    tpu.vector_store %arg17[%c2_166, %c0_167, %c0_168], %509 {strides = array<i32>} : memref<8x2x32xf32, #tpu.memory_space<vmem>>, vector<1x2x32xf32>,
    %cst_169 = arith.constant dense<0.000000e+00> : vector<2x128xf32>
    %510 = tpu.matmul %506, %285, %cst_169 {dimension_numbers = #tpu.dot_dimension_numbers<[1], [0], [0], [1], [0, 0, 1, 1], [], []>} : vector<2x32xf32>, vector<32x128xf32>, vector<2x128xf32> -> vector<2x128xf32>
    %511 = arith.addf %297, %510 : vector<2x128xf32>
    %512 = vector.extract_strided_slice %511 {offsets = [0, 0], sizes = [2, 32], strides = [1, 1]} : vector<2x128xf32> to vector<2x32xf32>
    %513 = arith.negf %512 : vector<2x32xf32>
    %514 = math.exp %513 : vector<2x32xf32>
    %cst_170 = arith.constant 1.000000e+00 : f32
    %515 = vector.broadcast %cst_170 : f32 to vector<2x32xf32>
    %516 = arith.addf %515, %514 : vector<2x32xf32>
    %517 = arith.divf %515, %516 : vector<2x32xf32>
    %518 = vector.extract_strided_slice %511 {offsets = [0, 32], sizes = [2, 32], strides = [1, 1]} : vector<2x128xf32> to vector<2x32xf32>
    %519 = arith.negf %518 : vector<2x32xf32>
    %520 = math.exp %519 : vector<2x32xf32>
    %cst_171 = arith.constant 1.000000e+00 : f32
    %521 = vector.broadcast %cst_171 : f32 to vector<2x32xf32>
    %522 = arith.addf %521, %520 : vector<2x32xf32>
    %523 = arith.divf %521, %522 : vector<2x32xf32>
    %524 = vector.extract_strided_slice %511 {offsets = [0, 64], sizes = [2, 32], strides = [1, 1]} : vector<2x128xf32> to vector<2x32xf32>
    %525 = math.tanh %524 : vector<2x32xf32>
    %526 = vector.extract_strided_slice %511 {offsets = [0, 96], sizes = [2, 32], strides = [1, 1]} : vector<2x128xf32> to vector<2x32xf32>
    %527 = arith.negf %526 : vector<2x32xf32>
    %528 = math.exp %527 : vector<2x32xf32>
    %cst_172 = arith.constant 1.000000e+00 : f32
    %529 = vector.broadcast %cst_172 : f32 to vector<2x32xf32>
    %530 = arith.addf %529, %528 : vector<2x32xf32>
    %531 = arith.divf %529, %530 : vector<2x32xf32>
    %532 = arith.mulf %523, %504 : vector<2x32xf32>
    %533 = arith.mulf %517, %525 : vector<2x32xf32>
    %534 = arith.addf %532, %533 : vector<2x32xf32>
    %535 = math.tanh %534 : vector<2x32xf32>
    %536 = arith.mulf %531, %535 : vector<2x32xf32>
    %c1_173 = arith.constant 1 : index
    %c0_174 = arith.constant 0 : index
    %c0_175 = arith.constant 0 : index
    %537 = vector.load %arg17[%c1_173, %c0_174, %c0_175] : memref<8x2x32xf32, #tpu.memory_space<vmem>>, vector<1x2x32xf32>
    %538 = vector.shape_cast %537 : vector<1x2x32xf32> to vector<2x32xf32>
    %539 = vector.shape_cast %536 : vector<2x32xf32> to vector<1x2x32xf32>
    tpu.vector_store %arg17[%c1_173, %c0_174, %c0_175], %539 {strides = array<i32>} : memref<8x2x32xf32, #tpu.memory_space<vmem>>, vector<1x2x32xf32>,
    %cst_176 = arith.constant dense<0.000000e+00> : vector<2x128xf32>
    %540 = tpu.matmul %536, %285, %cst_176 {dimension_numbers = #tpu.dot_dimension_numbers<[1], [0], [0], [1], [0, 0, 1, 1], [], []>} : vector<2x32xf32>, vector<32x128xf32>, vector<2x128xf32> -> vector<2x128xf32>
    %541 = arith.addf %292, %540 : vector<2x128xf32>
    %542 = vector.extract_strided_slice %541 {offsets = [0, 0], sizes = [2, 32], strides = [1, 1]} : vector<2x128xf32> to vector<2x32xf32>
    %543 = arith.negf %542 : vector<2x32xf32>
    %544 = math.exp %543 : vector<2x32xf32>
    %cst_177 = arith.constant 1.000000e+00 : f32
    %545 = vector.broadcast %cst_177 : f32 to vector<2x32xf32>
    %546 = arith.addf %545, %544 : vector<2x32xf32>
    %547 = arith.divf %545, %546 : vector<2x32xf32>
    %548 = vector.extract_strided_slice %541 {offsets = [0, 32], sizes = [2, 32], strides = [1, 1]} : vector<2x128xf32> to vector<2x32xf32>
    %549 = arith.negf %548 : vector<2x32xf32>
    %550 = math.exp %549 : vector<2x32xf32>
    %cst_178 = arith.constant 1.000000e+00 : f32
    %551 = vector.broadcast %cst_178 : f32 to vector<2x32xf32>
    %552 = arith.addf %551, %550 : vector<2x32xf32>
    %553 = arith.divf %551, %552 : vector<2x32xf32>
    %554 = vector.extract_strided_slice %541 {offsets = [0, 64], sizes = [2, 32], strides = [1, 1]} : vector<2x128xf32> to vector<2x32xf32>
    %555 = math.tanh %554 : vector<2x32xf32>
    %556 = vector.extract_strided_slice %541 {offsets = [0, 96], sizes = [2, 32], strides = [1, 1]} : vector<2x128xf32> to vector<2x32xf32>
    %557 = arith.negf %556 : vector<2x32xf32>
    %558 = math.exp %557 : vector<2x32xf32>
    %cst_179 = arith.constant 1.000000e+00 : f32
    %559 = vector.broadcast %cst_179 : f32 to vector<2x32xf32>
    %560 = arith.addf %559, %558 : vector<2x32xf32>
    %561 = arith.divf %559, %560 : vector<2x32xf32>
    %562 = arith.mulf %553, %534 : vector<2x32xf32>
    %563 = arith.mulf %547, %555 : vector<2x32xf32>
    %564 = arith.addf %562, %563 : vector<2x32xf32>
    %565 = math.tanh %564 : vector<2x32xf32>
    %566 = arith.mulf %561, %565 : vector<2x32xf32>
    %c0_180 = arith.constant 0 : index
    %c0_181 = arith.constant 0 : index
    %c0_182 = arith.constant 0 : index
    %567 = vector.load %arg17[%c0_180, %c0_181, %c0_182] : memref<8x2x32xf32, #tpu.memory_space<vmem>>, vector<1x2x32xf32>
    %568 = vector.shape_cast %567 : vector<1x2x32xf32> to vector<2x32xf32>
    %569 = vector.shape_cast %566 : vector<2x32xf32> to vector<1x2x32xf32>
    tpu.vector_store %arg17[%c0_180, %c0_181, %c0_182], %569 {strides = array<i32>} : memref<8x2x32xf32, #tpu.memory_space<vmem>>, vector<1x2x32xf32>,
    %c0_183 = arith.constant 0 : index
    %c0_184 = arith.constant 0 : index
    %570 = vector.load %arg10[%c0_183, %c0_184] : memref<32x128xf32, #tpu.memory_space<vmem>>, vector<32x128xf32>
    %c0_185 = arith.constant 0 : index
    %c0_186 = arith.constant 0 : index
    %571 = vector.load %arg11[%c0_185, %c0_186] : memref<1x128xf32, #tpu.memory_space<vmem>>, vector<1x128xf32>
    %c0_187 = arith.constant 0 : index
    %c0_188 = arith.constant 0 : index
    %572 = vector.load %arg9[%c0_187, %c0_188] : memref<64x128xf32, #tpu.memory_space<vmem>>, vector<32x128xf32>
    %c32 = arith.constant 32 : index
    %c0_189 = arith.constant 0 : index
    %573 = vector.load %arg9[%c32, %c0_189] : memref<64x128xf32, #tpu.memory_space<vmem>>, vector<32x128xf32>
    %c0_190 = arith.constant 0 : index
    %c0_191 = arith.constant 0 : index
    %c0_192 = arith.constant 0 : index
    %574 = vector.load %arg16[%c0_190, %c0_191, %c0_192] : memref<8x2x32xf32, #tpu.memory_space<vmem>>, vector<1x2x32xf32>
    %575 = vector.shape_cast %574 : vector<1x2x32xf32> to vector<2x32xf32>
    %cst_193 = arith.constant dense<0.000000e+00> : vector<2x128xf32>
    %576 = tpu.matmul %575, %572, %cst_193 {dimension_numbers = #tpu.dot_dimension_numbers<[1], [0], [0], [1], [0, 0, 1, 1], [], []>} : vector<2x32xf32>, vector<32x128xf32>, vector<2x128xf32> -> vector<2x128xf32>
    %577 = vector.broadcast %571 : vector<1x128xf32> to vector<2x128xf32>
    %578 = arith.addf %577, %576 : vector<2x128xf32>
    %c0_194 = arith.constant 0 : index
    %c0_195 = arith.constant 0 : index
    %c0_196 = arith.constant 0 : index
    %579 = vector.load %arg17[%c0_194, %c0_195, %c0_196] : memref<8x2x32xf32, #tpu.memory_space<vmem>>, vector<1x2x32xf32>
    %580 = vector.shape_cast %579 : vector<1x2x32xf32> to vector<2x32xf32>
    %cst_197 = arith.constant dense<0.000000e+00> : vector<2x128xf32>
    %581 = tpu.matmul %580, %573, %cst_197 {dimension_numbers = #tpu.dot_dimension_numbers<[1], [0], [0], [1], [0, 0, 1, 1], [], []>} : vector<2x32xf32>, vector<32x128xf32>, vector<2x128xf32> -> vector<2x128xf32>
    %582 = arith.addf %578, %581 : vector<2x128xf32>
    %c1_198 = arith.constant 1 : index
    %c0_199 = arith.constant 0 : index
    %c0_200 = arith.constant 0 : index
    %583 = vector.load %arg16[%c1_198, %c0_199, %c0_200] : memref<8x2x32xf32, #tpu.memory_space<vmem>>, vector<1x2x32xf32>
    %584 = vector.shape_cast %583 : vector<1x2x32xf32> to vector<2x32xf32>
    %cst_201 = arith.constant dense<0.000000e+00> : vector<2x128xf32>
    %585 = tpu.matmul %584, %572, %cst_201 {dimension_numbers = #tpu.dot_dimension_numbers<[1], [0], [0], [1], [0, 0, 1, 1], [], []>} : vector<2x32xf32>, vector<32x128xf32>, vector<2x128xf32> -> vector<2x128xf32>
    %586 = vector.broadcast %571 : vector<1x128xf32> to vector<2x128xf32>
    %587 = arith.addf %586, %585 : vector<2x128xf32>
    %c1_202 = arith.constant 1 : index
    %c0_203 = arith.constant 0 : index
    %c0_204 = arith.constant 0 : index
    %588 = vector.load %arg17[%c1_202, %c0_203, %c0_204] : memref<8x2x32xf32, #tpu.memory_space<vmem>>, vector<1x2x32xf32>
    %589 = vector.shape_cast %588 : vector<1x2x32xf32> to vector<2x32xf32>
    %cst_205 = arith.constant dense<0.000000e+00> : vector<2x128xf32>
    %590 = tpu.matmul %589, %573, %cst_205 {dimension_numbers = #tpu.dot_dimension_numbers<[1], [0], [0], [1], [0, 0, 1, 1], [], []>} : vector<2x32xf32>, vector<32x128xf32>, vector<2x128xf32> -> vector<2x128xf32>
    %591 = arith.addf %587, %590 : vector<2x128xf32>
    %c2_206 = arith.constant 2 : index
    %c0_207 = arith.constant 0 : index
    %c0_208 = arith.constant 0 : index
    %592 = vector.load %arg16[%c2_206, %c0_207, %c0_208] : memref<8x2x32xf32, #tpu.memory_space<vmem>>, vector<1x2x32xf32>
    %593 = vector.shape_cast %592 : vector<1x2x32xf32> to vector<2x32xf32>
    %cst_209 = arith.constant dense<0.000000e+00> : vector<2x128xf32>
    %594 = tpu.matmul %593, %572, %cst_209 {dimension_numbers = #tpu.dot_dimension_numbers<[1], [0], [0], [1], [0, 0, 1, 1], [], []>} : vector<2x32xf32>, vector<32x128xf32>, vector<2x128xf32> -> vector<2x128xf32>
    %595 = vector.broadcast %571 : vector<1x128xf32> to vector<2x128xf32>
    %596 = arith.addf %595, %594 : vector<2x128xf32>
    %c2_210 = arith.constant 2 : index
    %c0_211 = arith.constant 0 : index
    %c0_212 = arith.constant 0 : index
    %597 = vector.load %arg17[%c2_210, %c0_211, %c0_212] : memref<8x2x32xf32, #tpu.memory_space<vmem>>, vector<1x2x32xf32>
    %598 = vector.shape_cast %597 : vector<1x2x32xf32> to vector<2x32xf32>
    %cst_213 = arith.constant dense<0.000000e+00> : vector<2x128xf32>
    %599 = tpu.matmul %598, %573, %cst_213 {dimension_numbers = #tpu.dot_dimension_numbers<[1], [0], [0], [1], [0, 0, 1, 1], [], []>} : vector<2x32xf32>, vector<32x128xf32>, vector<2x128xf32> -> vector<2x128xf32>
    %600 = arith.addf %596, %599 : vector<2x128xf32>
    %c3_214 = arith.constant 3 : index
    %c0_215 = arith.constant 0 : index
    %c0_216 = arith.constant 0 : index
    %601 = vector.load %arg16[%c3_214, %c0_215, %c0_216] : memref<8x2x32xf32, #tpu.memory_space<vmem>>, vector<1x2x32xf32>
    %602 = vector.shape_cast %601 : vector<1x2x32xf32> to vector<2x32xf32>
    %cst_217 = arith.constant dense<0.000000e+00> : vector<2x128xf32>
    %603 = tpu.matmul %602, %572, %cst_217 {dimension_numbers = #tpu.dot_dimension_numbers<[1], [0], [0], [1], [0, 0, 1, 1], [], []>} : vector<2x32xf32>, vector<32x128xf32>, vector<2x128xf32> -> vector<2x128xf32>
    %604 = vector.broadcast %571 : vector<1x128xf32> to vector<2x128xf32>
    %605 = arith.addf %604, %603 : vector<2x128xf32>
    %c3_218 = arith.constant 3 : index
    %c0_219 = arith.constant 0 : index
    %c0_220 = arith.constant 0 : index
    %606 = vector.load %arg17[%c3_218, %c0_219, %c0_220] : memref<8x2x32xf32, #tpu.memory_space<vmem>>, vector<1x2x32xf32>
    %607 = vector.shape_cast %606 : vector<1x2x32xf32> to vector<2x32xf32>
    %cst_221 = arith.constant dense<0.000000e+00> : vector<2x128xf32>
    %608 = tpu.matmul %607, %573, %cst_221 {dimension_numbers = #tpu.dot_dimension_numbers<[1], [0], [0], [1], [0, 0, 1, 1], [], []>} : vector<2x32xf32>, vector<32x128xf32>, vector<2x128xf32> -> vector<2x128xf32>
    %609 = arith.addf %605, %608 : vector<2x128xf32>
    %c4_222 = arith.constant 4 : index
    %c0_223 = arith.constant 0 : index
    %c0_224 = arith.constant 0 : index
    %610 = vector.load %arg16[%c4_222, %c0_223, %c0_224] : memref<8x2x32xf32, #tpu.memory_space<vmem>>, vector<1x2x32xf32>
    %611 = vector.shape_cast %610 : vector<1x2x32xf32> to vector<2x32xf32>
    %cst_225 = arith.constant dense<0.000000e+00> : vector<2x128xf32>
    %612 = tpu.matmul %611, %572, %cst_225 {dimension_numbers = #tpu.dot_dimension_numbers<[1], [0], [0], [1], [0, 0, 1, 1], [], []>} : vector<2x32xf32>, vector<32x128xf32>, vector<2x128xf32> -> vector<2x128xf32>
    %613 = vector.broadcast %571 : vector<1x128xf32> to vector<2x128xf32>
    %614 = arith.addf %613, %612 : vector<2x128xf32>
    %c4_226 = arith.constant 4 : index
    %c0_227 = arith.constant 0 : index
    %c0_228 = arith.constant 0 : index
    %615 = vector.load %arg17[%c4_226, %c0_227, %c0_228] : memref<8x2x32xf32, #tpu.memory_space<vmem>>, vector<1x2x32xf32>
    %616 = vector.shape_cast %615 : vector<1x2x32xf32> to vector<2x32xf32>
    %cst_229 = arith.constant dense<0.000000e+00> : vector<2x128xf32>
    %617 = tpu.matmul %616, %573, %cst_229 {dimension_numbers = #tpu.dot_dimension_numbers<[1], [0], [0], [1], [0, 0, 1, 1], [], []>} : vector<2x32xf32>, vector<32x128xf32>, vector<2x128xf32> -> vector<2x128xf32>
    %618 = arith.addf %614, %617 : vector<2x128xf32>
    %c5_230 = arith.constant 5 : index
    %c0_231 = arith.constant 0 : index
    %c0_232 = arith.constant 0 : index
    %619 = vector.load %arg16[%c5_230, %c0_231, %c0_232] : memref<8x2x32xf32, #tpu.memory_space<vmem>>, vector<1x2x32xf32>
    %620 = vector.shape_cast %619 : vector<1x2x32xf32> to vector<2x32xf32>
    %cst_233 = arith.constant dense<0.000000e+00> : vector<2x128xf32>
    %621 = tpu.matmul %620, %572, %cst_233 {dimension_numbers = #tpu.dot_dimension_numbers<[1], [0], [0], [1], [0, 0, 1, 1], [], []>} : vector<2x32xf32>, vector<32x128xf32>, vector<2x128xf32> -> vector<2x128xf32>
    %622 = vector.broadcast %571 : vector<1x128xf32> to vector<2x128xf32>
    %623 = arith.addf %622, %621 : vector<2x128xf32>
    %c5_234 = arith.constant 5 : index
    %c0_235 = arith.constant 0 : index
    %c0_236 = arith.constant 0 : index
    %624 = vector.load %arg17[%c5_234, %c0_235, %c0_236] : memref<8x2x32xf32, #tpu.memory_space<vmem>>, vector<1x2x32xf32>
    %625 = vector.shape_cast %624 : vector<1x2x32xf32> to vector<2x32xf32>
    %cst_237 = arith.constant dense<0.000000e+00> : vector<2x128xf32>
    %626 = tpu.matmul %625, %573, %cst_237 {dimension_numbers = #tpu.dot_dimension_numbers<[1], [0], [0], [1], [0, 0, 1, 1], [], []>} : vector<2x32xf32>, vector<32x128xf32>, vector<2x128xf32> -> vector<2x128xf32>
    %627 = arith.addf %623, %626 : vector<2x128xf32>
    %c6_238 = arith.constant 6 : index
    %c0_239 = arith.constant 0 : index
    %c0_240 = arith.constant 0 : index
    %628 = vector.load %arg16[%c6_238, %c0_239, %c0_240] : memref<8x2x32xf32, #tpu.memory_space<vmem>>, vector<1x2x32xf32>
    %629 = vector.shape_cast %628 : vector<1x2x32xf32> to vector<2x32xf32>
    %cst_241 = arith.constant dense<0.000000e+00> : vector<2x128xf32>
    %630 = tpu.matmul %629, %572, %cst_241 {dimension_numbers = #tpu.dot_dimension_numbers<[1], [0], [0], [1], [0, 0, 1, 1], [], []>} : vector<2x32xf32>, vector<32x128xf32>, vector<2x128xf32> -> vector<2x128xf32>
    %631 = vector.broadcast %571 : vector<1x128xf32> to vector<2x128xf32>
    %632 = arith.addf %631, %630 : vector<2x128xf32>
    %c6_242 = arith.constant 6 : index
    %c0_243 = arith.constant 0 : index
    %c0_244 = arith.constant 0 : index
    %633 = vector.load %arg17[%c6_242, %c0_243, %c0_244] : memref<8x2x32xf32, #tpu.memory_space<vmem>>, vector<1x2x32xf32>
    %634 = vector.shape_cast %633 : vector<1x2x32xf32> to vector<2x32xf32>
    %cst_245 = arith.constant dense<0.000000e+00> : vector<2x128xf32>
    %635 = tpu.matmul %634, %573, %cst_245 {dimension_numbers = #tpu.dot_dimension_numbers<[1], [0], [0], [1], [0, 0, 1, 1], [], []>} : vector<2x32xf32>, vector<32x128xf32>, vector<2x128xf32> -> vector<2x128xf32>
    %636 = arith.addf %632, %635 : vector<2x128xf32>
    %c7_246 = arith.constant 7 : index
    %c0_247 = arith.constant 0 : index
    %c0_248 = arith.constant 0 : index
    %637 = vector.load %arg16[%c7_246, %c0_247, %c0_248] : memref<8x2x32xf32, #tpu.memory_space<vmem>>, vector<1x2x32xf32>
    %638 = vector.shape_cast %637 : vector<1x2x32xf32> to vector<2x32xf32>
    %cst_249 = arith.constant dense<0.000000e+00> : vector<2x128xf32>
    %639 = tpu.matmul %638, %572, %cst_249 {dimension_numbers = #tpu.dot_dimension_numbers<[1], [0], [0], [1], [0, 0, 1, 1], [], []>} : vector<2x32xf32>, vector<32x128xf32>, vector<2x128xf32> -> vector<2x128xf32>
    %640 = vector.broadcast %571 : vector<1x128xf32> to vector<2x128xf32>
    %641 = arith.addf %640, %639 : vector<2x128xf32>
    %c7_250 = arith.constant 7 : index
    %c0_251 = arith.constant 0 : index
    %c0_252 = arith.constant 0 : index
    %642 = vector.load %arg17[%c7_250, %c0_251, %c0_252] : memref<8x2x32xf32, #tpu.memory_space<vmem>>, vector<1x2x32xf32>
    %643 = vector.shape_cast %642 : vector<1x2x32xf32> to vector<2x32xf32>
    %cst_253 = arith.constant dense<0.000000e+00> : vector<2x128xf32>
    %644 = tpu.matmul %643, %573, %cst_253 {dimension_numbers = #tpu.dot_dimension_numbers<[1], [0], [0], [1], [0, 0, 1, 1], [], []>} : vector<2x32xf32>, vector<32x128xf32>, vector<2x128xf32> -> vector<2x128xf32>
    %645 = arith.addf %641, %644 : vector<2x128xf32>
    %cst_254 = arith.constant 0.000000e+00 : f32
    %646 = vector.broadcast %cst_254 : f32 to vector<2x32xf32>
    %cst_255 = arith.constant 0.000000e+00 : f32
    %647 = vector.broadcast %cst_255 : f32 to vector<2x32xf32>
    %cst_256 = arith.constant dense<0.000000e+00> : vector<2x128xf32>
    %648 = tpu.matmul %646, %570, %cst_256 {dimension_numbers = #tpu.dot_dimension_numbers<[1], [0], [0], [1], [0, 0, 1, 1], [], []>} : vector<2x32xf32>, vector<32x128xf32>, vector<2x128xf32> -> vector<2x128xf32>
    %649 = arith.addf %582, %648 : vector<2x128xf32>
    %650 = vector.extract_strided_slice %649 {offsets = [0, 0], sizes = [2, 32], strides = [1, 1]} : vector<2x128xf32> to vector<2x32xf32>
    %651 = arith.negf %650 : vector<2x32xf32>
    %652 = math.exp %651 : vector<2x32xf32>
    %cst_257 = arith.constant 1.000000e+00 : f32
    %653 = vector.broadcast %cst_257 : f32 to vector<2x32xf32>
    %654 = arith.addf %653, %652 : vector<2x32xf32>
    %655 = arith.divf %653, %654 : vector<2x32xf32>
    %656 = vector.extract_strided_slice %649 {offsets = [0, 32], sizes = [2, 32], strides = [1, 1]} : vector<2x128xf32> to vector<2x32xf32>
    %657 = arith.negf %656 : vector<2x32xf32>
    %658 = math.exp %657 : vector<2x32xf32>
    %cst_258 = arith.constant 1.000000e+00 : f32
    %659 = vector.broadcast %cst_258 : f32 to vector<2x32xf32>
    %660 = arith.addf %659, %658 : vector<2x32xf32>
    %661 = arith.divf %659, %660 : vector<2x32xf32>
    %662 = vector.extract_strided_slice %649 {offsets = [0, 64], sizes = [2, 32], strides = [1, 1]} : vector<2x128xf32> to vector<2x32xf32>
    %663 = math.tanh %662 : vector<2x32xf32>
    %664 = vector.extract_strided_slice %649 {offsets = [0, 96], sizes = [2, 32], strides = [1, 1]} : vector<2x128xf32> to vector<2x32xf32>
    %665 = arith.negf %664 : vector<2x32xf32>
    %666 = math.exp %665 : vector<2x32xf32>
    %cst_259 = arith.constant 1.000000e+00 : f32
    %667 = vector.broadcast %cst_259 : f32 to vector<2x32xf32>
    %668 = arith.addf %667, %666 : vector<2x32xf32>
    %669 = arith.divf %667, %668 : vector<2x32xf32>
    %670 = arith.mulf %661, %647 : vector<2x32xf32>
    %671 = arith.mulf %655, %663 : vector<2x32xf32>
    %672 = arith.addf %670, %671 : vector<2x32xf32>
    %673 = math.tanh %672 : vector<2x32xf32>
    %674 = arith.mulf %669, %673 : vector<2x32xf32>
    %c0_260 = arith.constant 0 : index
    %c0_261 = arith.constant 0 : index
    %c0_262 = arith.constant 0 : index
    %675 = vector.load %arg18[%c0_260, %c0_261, %c0_262] : memref<8x2x32xf32, #tpu.memory_space<vmem>>, vector<1x2x32xf32>
    %676 = vector.shape_cast %675 : vector<1x2x32xf32> to vector<2x32xf32>
    %677 = vector.shape_cast %674 : vector<2x32xf32> to vector<1x2x32xf32>
    tpu.vector_store %arg18[%c0_260, %c0_261, %c0_262], %677 {strides = array<i32>} : memref<8x2x32xf32, #tpu.memory_space<vmem>>, vector<1x2x32xf32>,
    %cst_263 = arith.constant dense<0.000000e+00> : vector<2x128xf32>
    %678 = tpu.matmul %674, %570, %cst_263 {dimension_numbers = #tpu.dot_dimension_numbers<[1], [0], [0], [1], [0, 0, 1, 1], [], []>} : vector<2x32xf32>, vector<32x128xf32>, vector<2x128xf32> -> vector<2x128xf32>
    %679 = arith.addf %591, %678 : vector<2x128xf32>
    %680 = vector.extract_strided_slice %679 {offsets = [0, 0], sizes = [2, 32], strides = [1, 1]} : vector<2x128xf32> to vector<2x32xf32>
    %681 = arith.negf %680 : vector<2x32xf32>
    %682 = math.exp %681 : vector<2x32xf32>
    %cst_264 = arith.constant 1.000000e+00 : f32
    %683 = vector.broadcast %cst_264 : f32 to vector<2x32xf32>
    %684 = arith.addf %683, %682 : vector<2x32xf32>
    %685 = arith.divf %683, %684 : vector<2x32xf32>
    %686 = vector.extract_strided_slice %679 {offsets = [0, 32], sizes = [2, 32], strides = [1, 1]} : vector<2x128xf32> to vector<2x32xf32>
    %687 = arith.negf %686 : vector<2x32xf32>
    %688 = math.exp %687 : vector<2x32xf32>
    %cst_265 = arith.constant 1.000000e+00 : f32
    %689 = vector.broadcast %cst_265 : f32 to vector<2x32xf32>
    %690 = arith.addf %689, %688 : vector<2x32xf32>
    %691 = arith.divf %689, %690 : vector<2x32xf32>
    %692 = vector.extract_strided_slice %679 {offsets = [0, 64], sizes = [2, 32], strides = [1, 1]} : vector<2x128xf32> to vector<2x32xf32>
    %693 = math.tanh %692 : vector<2x32xf32>
    %694 = vector.extract_strided_slice %679 {offsets = [0, 96], sizes = [2, 32], strides = [1, 1]} : vector<2x128xf32> to vector<2x32xf32>
    %695 = arith.negf %694 : vector<2x32xf32>
    %696 = math.exp %695 : vector<2x32xf32>
    %cst_266 = arith.constant 1.000000e+00 : f32
    %697 = vector.broadcast %cst_266 : f32 to vector<2x32xf32>
    %698 = arith.addf %697, %696 : vector<2x32xf32>
    %699 = arith.divf %697, %698 : vector<2x32xf32>
    %700 = arith.mulf %691, %672 : vector<2x32xf32>
    %701 = arith.mulf %685, %693 : vector<2x32xf32>
    %702 = arith.addf %700, %701 : vector<2x32xf32>
    %703 = math.tanh %702 : vector<2x32xf32>
    %704 = arith.mulf %699, %703 : vector<2x32xf32>
    %c1_267 = arith.constant 1 : index
    %c0_268 = arith.constant 0 : index
    %c0_269 = arith.constant 0 : index
    %705 = vector.load %arg18[%c1_267, %c0_268, %c0_269] : memref<8x2x32xf32, #tpu.memory_space<vmem>>, vector<1x2x32xf32>
    %706 = vector.shape_cast %705 : vector<1x2x32xf32> to vector<2x32xf32>
    %707 = vector.shape_cast %704 : vector<2x32xf32> to vector<1x2x32xf32>
    tpu.vector_store %arg18[%c1_267, %c0_268, %c0_269], %707 {strides = array<i32>} : memref<8x2x32xf32, #tpu.memory_space<vmem>>, vector<1x2x32xf32>,
    %cst_270 = arith.constant dense<0.000000e+00> : vector<2x128xf32>
    %708 = tpu.matmul %704, %570, %cst_270 {dimension_numbers = #tpu.dot_dimension_numbers<[1], [0], [0], [1], [0, 0, 1, 1], [], []>} : vector<2x32xf32>, vector<32x128xf32>, vector<2x128xf32> -> vector<2x128xf32>
    %709 = arith.addf %600, %708 : vector<2x128xf32>
    %710 = vector.extract_strided_slice %709 {offsets = [0, 0], sizes = [2, 32], strides = [1, 1]} : vector<2x128xf32> to vector<2x32xf32>
    %711 = arith.negf %710 : vector<2x32xf32>
    %712 = math.exp %711 : vector<2x32xf32>
    %cst_271 = arith.constant 1.000000e+00 : f32
    %713 = vector.broadcast %cst_271 : f32 to vector<2x32xf32>
    %714 = arith.addf %713, %712 : vector<2x32xf32>
    %715 = arith.divf %713, %714 : vector<2x32xf32>
    %716 = vector.extract_strided_slice %709 {offsets = [0, 32], sizes = [2, 32], strides = [1, 1]} : vector<2x128xf32> to vector<2x32xf32>
    %717 = arith.negf %716 : vector<2x32xf32>
    %718 = math.exp %717 : vector<2x32xf32>
    %cst_272 = arith.constant 1.000000e+00 : f32
    %719 = vector.broadcast %cst_272 : f32 to vector<2x32xf32>
    %720 = arith.addf %719, %718 : vector<2x32xf32>
    %721 = arith.divf %719, %720 : vector<2x32xf32>
    %722 = vector.extract_strided_slice %709 {offsets = [0, 64], sizes = [2, 32], strides = [1, 1]} : vector<2x128xf32> to vector<2x32xf32>
    %723 = math.tanh %722 : vector<2x32xf32>
    %724 = vector.extract_strided_slice %709 {offsets = [0, 96], sizes = [2, 32], strides = [1, 1]} : vector<2x128xf32> to vector<2x32xf32>
    %725 = arith.negf %724 : vector<2x32xf32>
    %726 = math.exp %725 : vector<2x32xf32>
    %cst_273 = arith.constant 1.000000e+00 : f32
    %727 = vector.broadcast %cst_273 : f32 to vector<2x32xf32>
    %728 = arith.addf %727, %726 : vector<2x32xf32>
    %729 = arith.divf %727, %728 : vector<2x32xf32>
    %730 = arith.mulf %721, %702 : vector<2x32xf32>
    %731 = arith.mulf %715, %723 : vector<2x32xf32>
    %732 = arith.addf %730, %731 : vector<2x32xf32>
    %733 = math.tanh %732 : vector<2x32xf32>
    %734 = arith.mulf %729, %733 : vector<2x32xf32>
    %c2_274 = arith.constant 2 : index
    %c0_275 = arith.constant 0 : index
    %c0_276 = arith.constant 0 : index
    %735 = vector.load %arg18[%c2_274, %c0_275, %c0_276] : memref<8x2x32xf32, #tpu.memory_space<vmem>>, vector<1x2x32xf32>
    %736 = vector.shape_cast %735 : vector<1x2x32xf32> to vector<2x32xf32>
    %737 = vector.shape_cast %734 : vector<2x32xf32> to vector<1x2x32xf32>
    tpu.vector_store %arg18[%c2_274, %c0_275, %c0_276], %737 {strides = array<i32>} : memref<8x2x32xf32, #tpu.memory_space<vmem>>, vector<1x2x32xf32>,
    %cst_277 = arith.constant dense<0.000000e+00> : vector<2x128xf32>
    %738 = tpu.matmul %734, %570, %cst_277 {dimension_numbers = #tpu.dot_dimension_numbers<[1], [0], [0], [1], [0, 0, 1, 1], [], []>} : vector<2x32xf32>, vector<32x128xf32>, vector<2x128xf32> -> vector<2x128xf32>
    %739 = arith.addf %609, %738 : vector<2x128xf32>
    %740 = vector.extract_strided_slice %739 {offsets = [0, 0], sizes = [2, 32], strides = [1, 1]} : vector<2x128xf32> to vector<2x32xf32>
    %741 = arith.negf %740 : vector<2x32xf32>
    %742 = math.exp %741 : vector<2x32xf32>
    %cst_278 = arith.constant 1.000000e+00 : f32
    %743 = vector.broadcast %cst_278 : f32 to vector<2x32xf32>
    %744 = arith.addf %743, %742 : vector<2x32xf32>
    %745 = arith.divf %743, %744 : vector<2x32xf32>
    %746 = vector.extract_strided_slice %739 {offsets = [0, 32], sizes = [2, 32], strides = [1, 1]} : vector<2x128xf32> to vector<2x32xf32>
    %747 = arith.negf %746 : vector<2x32xf32>
    %748 = math.exp %747 : vector<2x32xf32>
    %cst_279 = arith.constant 1.000000e+00 : f32
    %749 = vector.broadcast %cst_279 : f32 to vector<2x32xf32>
    %750 = arith.addf %749, %748 : vector<2x32xf32>
    %751 = arith.divf %749, %750 : vector<2x32xf32>
    %752 = vector.extract_strided_slice %739 {offsets = [0, 64], sizes = [2, 32], strides = [1, 1]} : vector<2x128xf32> to vector<2x32xf32>
    %753 = math.tanh %752 : vector<2x32xf32>
    %754 = vector.extract_strided_slice %739 {offsets = [0, 96], sizes = [2, 32], strides = [1, 1]} : vector<2x128xf32> to vector<2x32xf32>
    %755 = arith.negf %754 : vector<2x32xf32>
    %756 = math.exp %755 : vector<2x32xf32>
    %cst_280 = arith.constant 1.000000e+00 : f32
    %757 = vector.broadcast %cst_280 : f32 to vector<2x32xf32>
    %758 = arith.addf %757, %756 : vector<2x32xf32>
    %759 = arith.divf %757, %758 : vector<2x32xf32>
    %760 = arith.mulf %751, %732 : vector<2x32xf32>
    %761 = arith.mulf %745, %753 : vector<2x32xf32>
    %762 = arith.addf %760, %761 : vector<2x32xf32>
    %763 = math.tanh %762 : vector<2x32xf32>
    %764 = arith.mulf %759, %763 : vector<2x32xf32>
    %c3_281 = arith.constant 3 : index
    %c0_282 = arith.constant 0 : index
    %c0_283 = arith.constant 0 : index
    %765 = vector.load %arg18[%c3_281, %c0_282, %c0_283] : memref<8x2x32xf32, #tpu.memory_space<vmem>>, vector<1x2x32xf32>
    %766 = vector.shape_cast %765 : vector<1x2x32xf32> to vector<2x32xf32>
    %767 = vector.shape_cast %764 : vector<2x32xf32> to vector<1x2x32xf32>
    tpu.vector_store %arg18[%c3_281, %c0_282, %c0_283], %767 {strides = array<i32>} : memref<8x2x32xf32, #tpu.memory_space<vmem>>, vector<1x2x32xf32>,
    %cst_284 = arith.constant dense<0.000000e+00> : vector<2x128xf32>
    %768 = tpu.matmul %764, %570, %cst_284 {dimension_numbers = #tpu.dot_dimension_numbers<[1], [0], [0], [1], [0, 0, 1, 1], [], []>} : vector<2x32xf32>, vector<32x128xf32>, vector<2x128xf32> -> vector<2x128xf32>
    %769 = arith.addf %618, %768 : vector<2x128xf32>
    %770 = vector.extract_strided_slice %769 {offsets = [0, 0], sizes = [2, 32], strides = [1, 1]} : vector<2x128xf32> to vector<2x32xf32>
    %771 = arith.negf %770 : vector<2x32xf32>
    %772 = math.exp %771 : vector<2x32xf32>
    %cst_285 = arith.constant 1.000000e+00 : f32
    %773 = vector.broadcast %cst_285 : f32 to vector<2x32xf32>
    %774 = arith.addf %773, %772 : vector<2x32xf32>
    %775 = arith.divf %773, %774 : vector<2x32xf32>
    %776 = vector.extract_strided_slice %769 {offsets = [0, 32], sizes = [2, 32], strides = [1, 1]} : vector<2x128xf32> to vector<2x32xf32>
    %777 = arith.negf %776 : vector<2x32xf32>
    %778 = math.exp %777 : vector<2x32xf32>
    %cst_286 = arith.constant 1.000000e+00 : f32
    %779 = vector.broadcast %cst_286 : f32 to vector<2x32xf32>
    %780 = arith.addf %779, %778 : vector<2x32xf32>
    %781 = arith.divf %779, %780 : vector<2x32xf32>
    %782 = vector.extract_strided_slice %769 {offsets = [0, 64], sizes = [2, 32], strides = [1, 1]} : vector<2x128xf32> to vector<2x32xf32>
    %783 = math.tanh %782 : vector<2x32xf32>
    %784 = vector.extract_strided_slice %769 {offsets = [0, 96], sizes = [2, 32], strides = [1, 1]} : vector<2x128xf32> to vector<2x32xf32>
    %785 = arith.negf %784 : vector<2x32xf32>
    %786 = math.exp %785 : vector<2x32xf32>
    %cst_287 = arith.constant 1.000000e+00 : f32
    %787 = vector.broadcast %cst_287 : f32 to vector<2x32xf32>
    %788 = arith.addf %787, %786 : vector<2x32xf32>
    %789 = arith.divf %787, %788 : vector<2x32xf32>
    %790 = arith.mulf %781, %762 : vector<2x32xf32>
    %791 = arith.mulf %775, %783 : vector<2x32xf32>
    %792 = arith.addf %790, %791 : vector<2x32xf32>
    %793 = math.tanh %792 : vector<2x32xf32>
    %794 = arith.mulf %789, %793 : vector<2x32xf32>
    %c4_288 = arith.constant 4 : index
    %c0_289 = arith.constant 0 : index
    %c0_290 = arith.constant 0 : index
    %795 = vector.load %arg18[%c4_288, %c0_289, %c0_290] : memref<8x2x32xf32, #tpu.memory_space<vmem>>, vector<1x2x32xf32>
    %796 = vector.shape_cast %795 : vector<1x2x32xf32> to vector<2x32xf32>
    %797 = vector.shape_cast %794 : vector<2x32xf32> to vector<1x2x32xf32>
    tpu.vector_store %arg18[%c4_288, %c0_289, %c0_290], %797 {strides = array<i32>} : memref<8x2x32xf32, #tpu.memory_space<vmem>>, vector<1x2x32xf32>,
    %cst_291 = arith.constant dense<0.000000e+00> : vector<2x128xf32>
    %798 = tpu.matmul %794, %570, %cst_291 {dimension_numbers = #tpu.dot_dimension_numbers<[1], [0], [0], [1], [0, 0, 1, 1], [], []>} : vector<2x32xf32>, vector<32x128xf32>, vector<2x128xf32> -> vector<2x128xf32>
    %799 = arith.addf %627, %798 : vector<2x128xf32>
    %800 = vector.extract_strided_slice %799 {offsets = [0, 0], sizes = [2, 32], strides = [1, 1]} : vector<2x128xf32> to vector<2x32xf32>
    %801 = arith.negf %800 : vector<2x32xf32>
    %802 = math.exp %801 : vector<2x32xf32>
    %cst_292 = arith.constant 1.000000e+00 : f32
    %803 = vector.broadcast %cst_292 : f32 to vector<2x32xf32>
    %804 = arith.addf %803, %802 : vector<2x32xf32>
    %805 = arith.divf %803, %804 : vector<2x32xf32>
    %806 = vector.extract_strided_slice %799 {offsets = [0, 32], sizes = [2, 32], strides = [1, 1]} : vector<2x128xf32> to vector<2x32xf32>
    %807 = arith.negf %806 : vector<2x32xf32>
    %808 = math.exp %807 : vector<2x32xf32>
    %cst_293 = arith.constant 1.000000e+00 : f32
    %809 = vector.broadcast %cst_293 : f32 to vector<2x32xf32>
    %810 = arith.addf %809, %808 : vector<2x32xf32>
    %811 = arith.divf %809, %810 : vector<2x32xf32>
    %812 = vector.extract_strided_slice %799 {offsets = [0, 64], sizes = [2, 32], strides = [1, 1]} : vector<2x128xf32> to vector<2x32xf32>
    %813 = math.tanh %812 : vector<2x32xf32>
    %814 = vector.extract_strided_slice %799 {offsets = [0, 96], sizes = [2, 32], strides = [1, 1]} : vector<2x128xf32> to vector<2x32xf32>
    %815 = arith.negf %814 : vector<2x32xf32>
    %816 = math.exp %815 : vector<2x32xf32>
    %cst_294 = arith.constant 1.000000e+00 : f32
    %817 = vector.broadcast %cst_294 : f32 to vector<2x32xf32>
    %818 = arith.addf %817, %816 : vector<2x32xf32>
    %819 = arith.divf %817, %818 : vector<2x32xf32>
    %820 = arith.mulf %811, %792 : vector<2x32xf32>
    %821 = arith.mulf %805, %813 : vector<2x32xf32>
    %822 = arith.addf %820, %821 : vector<2x32xf32>
    %823 = math.tanh %822 : vector<2x32xf32>
    %824 = arith.mulf %819, %823 : vector<2x32xf32>
    %c5_295 = arith.constant 5 : index
    %c0_296 = arith.constant 0 : index
    %c0_297 = arith.constant 0 : index
    %825 = vector.load %arg18[%c5_295, %c0_296, %c0_297] : memref<8x2x32xf32, #tpu.memory_space<vmem>>, vector<1x2x32xf32>
    %826 = vector.shape_cast %825 : vector<1x2x32xf32> to vector<2x32xf32>
    %827 = vector.shape_cast %824 : vector<2x32xf32> to vector<1x2x32xf32>
    tpu.vector_store %arg18[%c5_295, %c0_296, %c0_297], %827 {strides = array<i32>} : memref<8x2x32xf32, #tpu.memory_space<vmem>>, vector<1x2x32xf32>,
    %cst_298 = arith.constant dense<0.000000e+00> : vector<2x128xf32>
    %828 = tpu.matmul %824, %570, %cst_298 {dimension_numbers = #tpu.dot_dimension_numbers<[1], [0], [0], [1], [0, 0, 1, 1], [], []>} : vector<2x32xf32>, vector<32x128xf32>, vector<2x128xf32> -> vector<2x128xf32>
    %829 = arith.addf %636, %828 : vector<2x128xf32>
    %830 = vector.extract_strided_slice %829 {offsets = [0, 0], sizes = [2, 32], strides = [1, 1]} : vector<2x128xf32> to vector<2x32xf32>
    %831 = arith.negf %830 : vector<2x32xf32>
    %832 = math.exp %831 : vector<2x32xf32>
    %cst_299 = arith.constant 1.000000e+00 : f32
    %833 = vector.broadcast %cst_299 : f32 to vector<2x32xf32>
    %834 = arith.addf %833, %832 : vector<2x32xf32>
    %835 = arith.divf %833, %834 : vector<2x32xf32>
    %836 = vector.extract_strided_slice %829 {offsets = [0, 32], sizes = [2, 32], strides = [1, 1]} : vector<2x128xf32> to vector<2x32xf32>
    %837 = arith.negf %836 : vector<2x32xf32>
    %838 = math.exp %837 : vector<2x32xf32>
    %cst_300 = arith.constant 1.000000e+00 : f32
    %839 = vector.broadcast %cst_300 : f32 to vector<2x32xf32>
    %840 = arith.addf %839, %838 : vector<2x32xf32>
    %841 = arith.divf %839, %840 : vector<2x32xf32>
    %842 = vector.extract_strided_slice %829 {offsets = [0, 64], sizes = [2, 32], strides = [1, 1]} : vector<2x128xf32> to vector<2x32xf32>
    %843 = math.tanh %842 : vector<2x32xf32>
    %844 = vector.extract_strided_slice %829 {offsets = [0, 96], sizes = [2, 32], strides = [1, 1]} : vector<2x128xf32> to vector<2x32xf32>
    %845 = arith.negf %844 : vector<2x32xf32>
    %846 = math.exp %845 : vector<2x32xf32>
    %cst_301 = arith.constant 1.000000e+00 : f32
    %847 = vector.broadcast %cst_301 : f32 to vector<2x32xf32>
    %848 = arith.addf %847, %846 : vector<2x32xf32>
    %849 = arith.divf %847, %848 : vector<2x32xf32>
    %850 = arith.mulf %841, %822 : vector<2x32xf32>
    %851 = arith.mulf %835, %843 : vector<2x32xf32>
    %852 = arith.addf %850, %851 : vector<2x32xf32>
    %853 = math.tanh %852 : vector<2x32xf32>
    %854 = arith.mulf %849, %853 : vector<2x32xf32>
    %c6_302 = arith.constant 6 : index
    %c0_303 = arith.constant 0 : index
    %c0_304 = arith.constant 0 : index
    %855 = vector.load %arg18[%c6_302, %c0_303, %c0_304] : memref<8x2x32xf32, #tpu.memory_space<vmem>>, vector<1x2x32xf32>
    %856 = vector.shape_cast %855 : vector<1x2x32xf32> to vector<2x32xf32>
    %857 = vector.shape_cast %854 : vector<2x32xf32> to vector<1x2x32xf32>
    tpu.vector_store %arg18[%c6_302, %c0_303, %c0_304], %857 {strides = array<i32>} : memref<8x2x32xf32, #tpu.memory_space<vmem>>, vector<1x2x32xf32>,
    %cst_305 = arith.constant dense<0.000000e+00> : vector<2x128xf32>
    %858 = tpu.matmul %854, %570, %cst_305 {dimension_numbers = #tpu.dot_dimension_numbers<[1], [0], [0], [1], [0, 0, 1, 1], [], []>} : vector<2x32xf32>, vector<32x128xf32>, vector<2x128xf32> -> vector<2x128xf32>
    %859 = arith.addf %645, %858 : vector<2x128xf32>
    %860 = vector.extract_strided_slice %859 {offsets = [0, 0], sizes = [2, 32], strides = [1, 1]} : vector<2x128xf32> to vector<2x32xf32>
    %861 = arith.negf %860 : vector<2x32xf32>
    %862 = math.exp %861 : vector<2x32xf32>
    %cst_306 = arith.constant 1.000000e+00 : f32
    %863 = vector.broadcast %cst_306 : f32 to vector<2x32xf32>
    %864 = arith.addf %863, %862 : vector<2x32xf32>
    %865 = arith.divf %863, %864 : vector<2x32xf32>
    %866 = vector.extract_strided_slice %859 {offsets = [0, 32], sizes = [2, 32], strides = [1, 1]} : vector<2x128xf32> to vector<2x32xf32>
    %867 = arith.negf %866 : vector<2x32xf32>
    %868 = math.exp %867 : vector<2x32xf32>
    %cst_307 = arith.constant 1.000000e+00 : f32
    %869 = vector.broadcast %cst_307 : f32 to vector<2x32xf32>
    %870 = arith.addf %869, %868 : vector<2x32xf32>
    %871 = arith.divf %869, %870 : vector<2x32xf32>
    %872 = vector.extract_strided_slice %859 {offsets = [0, 64], sizes = [2, 32], strides = [1, 1]} : vector<2x128xf32> to vector<2x32xf32>
    %873 = math.tanh %872 : vector<2x32xf32>
    %874 = vector.extract_strided_slice %859 {offsets = [0, 96], sizes = [2, 32], strides = [1, 1]} : vector<2x128xf32> to vector<2x32xf32>
    %875 = arith.negf %874 : vector<2x32xf32>
    %876 = math.exp %875 : vector<2x32xf32>
    %cst_308 = arith.constant 1.000000e+00 : f32
    %877 = vector.broadcast %cst_308 : f32 to vector<2x32xf32>
    %878 = arith.addf %877, %876 : vector<2x32xf32>
    %879 = arith.divf %877, %878 : vector<2x32xf32>
    %880 = arith.mulf %871, %852 : vector<2x32xf32>
    %881 = arith.mulf %865, %873 : vector<2x32xf32>
    %882 = arith.addf %880, %881 : vector<2x32xf32>
    %883 = math.tanh %882 : vector<2x32xf32>
    %884 = arith.mulf %879, %883 : vector<2x32xf32>
    %c7_309 = arith.constant 7 : index
    %c0_310 = arith.constant 0 : index
    %c0_311 = arith.constant 0 : index
    %885 = vector.load %arg18[%c7_309, %c0_310, %c0_311] : memref<8x2x32xf32, #tpu.memory_space<vmem>>, vector<1x2x32xf32>
    %886 = vector.shape_cast %885 : vector<1x2x32xf32> to vector<2x32xf32>
    %887 = vector.shape_cast %884 : vector<2x32xf32> to vector<1x2x32xf32>
    tpu.vector_store %arg18[%c7_309, %c0_310, %c0_311], %887 {strides = array<i32>} : memref<8x2x32xf32, #tpu.memory_space<vmem>>, vector<1x2x32xf32>,
    %c0_312 = arith.constant 0 : index
    %c0_313 = arith.constant 0 : index
    %888 = vector.load %arg13[%c0_312, %c0_313] : memref<32x128xf32, #tpu.memory_space<vmem>>, vector<32x128xf32>
    %c0_314 = arith.constant 0 : index
    %c0_315 = arith.constant 0 : index
    %889 = vector.load %arg14[%c0_314, %c0_315] : memref<1x128xf32, #tpu.memory_space<vmem>>, vector<1x128xf32>
    %c0_316 = arith.constant 0 : index
    %c0_317 = arith.constant 0 : index
    %890 = vector.load %arg12[%c0_316, %c0_317] : memref<64x128xf32, #tpu.memory_space<vmem>>, vector<32x128xf32>
    %c32_318 = arith.constant 32 : index
    %c0_319 = arith.constant 0 : index
    %891 = vector.load %arg12[%c32_318, %c0_319] : memref<64x128xf32, #tpu.memory_space<vmem>>, vector<32x128xf32>
    %c0_320 = arith.constant 0 : index
    %c0_321 = arith.constant 0 : index
    %c0_322 = arith.constant 0 : index
    %892 = vector.load %arg16[%c0_320, %c0_321, %c0_322] : memref<8x2x32xf32, #tpu.memory_space<vmem>>, vector<1x2x32xf32>
    %893 = vector.shape_cast %892 : vector<1x2x32xf32> to vector<2x32xf32>
    %cst_323 = arith.constant dense<0.000000e+00> : vector<2x128xf32>
    %894 = tpu.matmul %893, %890, %cst_323 {dimension_numbers = #tpu.dot_dimension_numbers<[1], [0], [0], [1], [0, 0, 1, 1], [], []>} : vector<2x32xf32>, vector<32x128xf32>, vector<2x128xf32> -> vector<2x128xf32>
    %895 = vector.broadcast %889 : vector<1x128xf32> to vector<2x128xf32>
    %896 = arith.addf %895, %894 : vector<2x128xf32>
    %c0_324 = arith.constant 0 : index
    %c0_325 = arith.constant 0 : index
    %c0_326 = arith.constant 0 : index
    %897 = vector.load %arg17[%c0_324, %c0_325, %c0_326] : memref<8x2x32xf32, #tpu.memory_space<vmem>>, vector<1x2x32xf32>
    %898 = vector.shape_cast %897 : vector<1x2x32xf32> to vector<2x32xf32>
    %cst_327 = arith.constant dense<0.000000e+00> : vector<2x128xf32>
    %899 = tpu.matmul %898, %891, %cst_327 {dimension_numbers = #tpu.dot_dimension_numbers<[1], [0], [0], [1], [0, 0, 1, 1], [], []>} : vector<2x32xf32>, vector<32x128xf32>, vector<2x128xf32> -> vector<2x128xf32>
    %900 = arith.addf %896, %899 : vector<2x128xf32>
    %c1_328 = arith.constant 1 : index
    %c0_329 = arith.constant 0 : index
    %c0_330 = arith.constant 0 : index
    %901 = vector.load %arg16[%c1_328, %c0_329, %c0_330] : memref<8x2x32xf32, #tpu.memory_space<vmem>>, vector<1x2x32xf32>
    %902 = vector.shape_cast %901 : vector<1x2x32xf32> to vector<2x32xf32>
    %cst_331 = arith.constant dense<0.000000e+00> : vector<2x128xf32>
    %903 = tpu.matmul %902, %890, %cst_331 {dimension_numbers = #tpu.dot_dimension_numbers<[1], [0], [0], [1], [0, 0, 1, 1], [], []>} : vector<2x32xf32>, vector<32x128xf32>, vector<2x128xf32> -> vector<2x128xf32>
    %904 = vector.broadcast %889 : vector<1x128xf32> to vector<2x128xf32>
    %905 = arith.addf %904, %903 : vector<2x128xf32>
    %c1_332 = arith.constant 1 : index
    %c0_333 = arith.constant 0 : index
    %c0_334 = arith.constant 0 : index
    %906 = vector.load %arg17[%c1_332, %c0_333, %c0_334] : memref<8x2x32xf32, #tpu.memory_space<vmem>>, vector<1x2x32xf32>
    %907 = vector.shape_cast %906 : vector<1x2x32xf32> to vector<2x32xf32>
    %cst_335 = arith.constant dense<0.000000e+00> : vector<2x128xf32>
    %908 = tpu.matmul %907, %891, %cst_335 {dimension_numbers = #tpu.dot_dimension_numbers<[1], [0], [0], [1], [0, 0, 1, 1], [], []>} : vector<2x32xf32>, vector<32x128xf32>, vector<2x128xf32> -> vector<2x128xf32>
    %909 = arith.addf %905, %908 : vector<2x128xf32>
    %c2_336 = arith.constant 2 : index
    %c0_337 = arith.constant 0 : index
    %c0_338 = arith.constant 0 : index
    %910 = vector.load %arg16[%c2_336, %c0_337, %c0_338] : memref<8x2x32xf32, #tpu.memory_space<vmem>>, vector<1x2x32xf32>
    %911 = vector.shape_cast %910 : vector<1x2x32xf32> to vector<2x32xf32>
    %cst_339 = arith.constant dense<0.000000e+00> : vector<2x128xf32>
    %912 = tpu.matmul %911, %890, %cst_339 {dimension_numbers = #tpu.dot_dimension_numbers<[1], [0], [0], [1], [0, 0, 1, 1], [], []>} : vector<2x32xf32>, vector<32x128xf32>, vector<2x128xf32> -> vector<2x128xf32>
    %913 = vector.broadcast %889 : vector<1x128xf32> to vector<2x128xf32>
    %914 = arith.addf %913, %912 : vector<2x128xf32>
    %c2_340 = arith.constant 2 : index
    %c0_341 = arith.constant 0 : index
    %c0_342 = arith.constant 0 : index
    %915 = vector.load %arg17[%c2_340, %c0_341, %c0_342] : memref<8x2x32xf32, #tpu.memory_space<vmem>>, vector<1x2x32xf32>
    %916 = vector.shape_cast %915 : vector<1x2x32xf32> to vector<2x32xf32>
    %cst_343 = arith.constant dense<0.000000e+00> : vector<2x128xf32>
    %917 = tpu.matmul %916, %891, %cst_343 {dimension_numbers = #tpu.dot_dimension_numbers<[1], [0], [0], [1], [0, 0, 1, 1], [], []>} : vector<2x32xf32>, vector<32x128xf32>, vector<2x128xf32> -> vector<2x128xf32>
    %918 = arith.addf %914, %917 : vector<2x128xf32>
    %c3_344 = arith.constant 3 : index
    %c0_345 = arith.constant 0 : index
    %c0_346 = arith.constant 0 : index
    %919 = vector.load %arg16[%c3_344, %c0_345, %c0_346] : memref<8x2x32xf32, #tpu.memory_space<vmem>>, vector<1x2x32xf32>
    %920 = vector.shape_cast %919 : vector<1x2x32xf32> to vector<2x32xf32>
    %cst_347 = arith.constant dense<0.000000e+00> : vector<2x128xf32>
    %921 = tpu.matmul %920, %890, %cst_347 {dimension_numbers = #tpu.dot_dimension_numbers<[1], [0], [0], [1], [0, 0, 1, 1], [], []>} : vector<2x32xf32>, vector<32x128xf32>, vector<2x128xf32> -> vector<2x128xf32>
    %922 = vector.broadcast %889 : vector<1x128xf32> to vector<2x128xf32>
    %923 = arith.addf %922, %921 : vector<2x128xf32>
    %c3_348 = arith.constant 3 : index
    %c0_349 = arith.constant 0 : index
    %c0_350 = arith.constant 0 : index
    %924 = vector.load %arg17[%c3_348, %c0_349, %c0_350] : memref<8x2x32xf32, #tpu.memory_space<vmem>>, vector<1x2x32xf32>
    %925 = vector.shape_cast %924 : vector<1x2x32xf32> to vector<2x32xf32>
    %cst_351 = arith.constant dense<0.000000e+00> : vector<2x128xf32>
    %926 = tpu.matmul %925, %891, %cst_351 {dimension_numbers = #tpu.dot_dimension_numbers<[1], [0], [0], [1], [0, 0, 1, 1], [], []>} : vector<2x32xf32>, vector<32x128xf32>, vector<2x128xf32> -> vector<2x128xf32>
    %927 = arith.addf %923, %926 : vector<2x128xf32>
    %c4_352 = arith.constant 4 : index
    %c0_353 = arith.constant 0 : index
    %c0_354 = arith.constant 0 : index
    %928 = vector.load %arg16[%c4_352, %c0_353, %c0_354] : memref<8x2x32xf32, #tpu.memory_space<vmem>>, vector<1x2x32xf32>
    %929 = vector.shape_cast %928 : vector<1x2x32xf32> to vector<2x32xf32>
    %cst_355 = arith.constant dense<0.000000e+00> : vector<2x128xf32>
    %930 = tpu.matmul %929, %890, %cst_355 {dimension_numbers = #tpu.dot_dimension_numbers<[1], [0], [0], [1], [0, 0, 1, 1], [], []>} : vector<2x32xf32>, vector<32x128xf32>, vector<2x128xf32> -> vector<2x128xf32>
    %931 = vector.broadcast %889 : vector<1x128xf32> to vector<2x128xf32>
    %932 = arith.addf %931, %930 : vector<2x128xf32>
    %c4_356 = arith.constant 4 : index
    %c0_357 = arith.constant 0 : index
    %c0_358 = arith.constant 0 : index
    %933 = vector.load %arg17[%c4_356, %c0_357, %c0_358] : memref<8x2x32xf32, #tpu.memory_space<vmem>>, vector<1x2x32xf32>
    %934 = vector.shape_cast %933 : vector<1x2x32xf32> to vector<2x32xf32>
    %cst_359 = arith.constant dense<0.000000e+00> : vector<2x128xf32>
    %935 = tpu.matmul %934, %891, %cst_359 {dimension_numbers = #tpu.dot_dimension_numbers<[1], [0], [0], [1], [0, 0, 1, 1], [], []>} : vector<2x32xf32>, vector<32x128xf32>, vector<2x128xf32> -> vector<2x128xf32>
    %936 = arith.addf %932, %935 : vector<2x128xf32>
    %c5_360 = arith.constant 5 : index
    %c0_361 = arith.constant 0 : index
    %c0_362 = arith.constant 0 : index
    %937 = vector.load %arg16[%c5_360, %c0_361, %c0_362] : memref<8x2x32xf32, #tpu.memory_space<vmem>>, vector<1x2x32xf32>
    %938 = vector.shape_cast %937 : vector<1x2x32xf32> to vector<2x32xf32>
    %cst_363 = arith.constant dense<0.000000e+00> : vector<2x128xf32>
    %939 = tpu.matmul %938, %890, %cst_363 {dimension_numbers = #tpu.dot_dimension_numbers<[1], [0], [0], [1], [0, 0, 1, 1], [], []>} : vector<2x32xf32>, vector<32x128xf32>, vector<2x128xf32> -> vector<2x128xf32>
    %940 = vector.broadcast %889 : vector<1x128xf32> to vector<2x128xf32>
    %941 = arith.addf %940, %939 : vector<2x128xf32>
    %c5_364 = arith.constant 5 : index
    %c0_365 = arith.constant 0 : index
    %c0_366 = arith.constant 0 : index
    %942 = vector.load %arg17[%c5_364, %c0_365, %c0_366] : memref<8x2x32xf32, #tpu.memory_space<vmem>>, vector<1x2x32xf32>
    %943 = vector.shape_cast %942 : vector<1x2x32xf32> to vector<2x32xf32>
    %cst_367 = arith.constant dense<0.000000e+00> : vector<2x128xf32>
    %944 = tpu.matmul %943, %891, %cst_367 {dimension_numbers = #tpu.dot_dimension_numbers<[1], [0], [0], [1], [0, 0, 1, 1], [], []>} : vector<2x32xf32>, vector<32x128xf32>, vector<2x128xf32> -> vector<2x128xf32>
    %945 = arith.addf %941, %944 : vector<2x128xf32>
    %c6_368 = arith.constant 6 : index
    %c0_369 = arith.constant 0 : index
    %c0_370 = arith.constant 0 : index
    %946 = vector.load %arg16[%c6_368, %c0_369, %c0_370] : memref<8x2x32xf32, #tpu.memory_space<vmem>>, vector<1x2x32xf32>
    %947 = vector.shape_cast %946 : vector<1x2x32xf32> to vector<2x32xf32>
    %cst_371 = arith.constant dense<0.000000e+00> : vector<2x128xf32>
    %948 = tpu.matmul %947, %890, %cst_371 {dimension_numbers = #tpu.dot_dimension_numbers<[1], [0], [0], [1], [0, 0, 1, 1], [], []>} : vector<2x32xf32>, vector<32x128xf32>, vector<2x128xf32> -> vector<2x128xf32>
    %949 = vector.broadcast %889 : vector<1x128xf32> to vector<2x128xf32>
    %950 = arith.addf %949, %948 : vector<2x128xf32>
    %c6_372 = arith.constant 6 : index
    %c0_373 = arith.constant 0 : index
    %c0_374 = arith.constant 0 : index
    %951 = vector.load %arg17[%c6_372, %c0_373, %c0_374] : memref<8x2x32xf32, #tpu.memory_space<vmem>>, vector<1x2x32xf32>
    %952 = vector.shape_cast %951 : vector<1x2x32xf32> to vector<2x32xf32>
    %cst_375 = arith.constant dense<0.000000e+00> : vector<2x128xf32>
    %953 = tpu.matmul %952, %891, %cst_375 {dimension_numbers = #tpu.dot_dimension_numbers<[1], [0], [0], [1], [0, 0, 1, 1], [], []>} : vector<2x32xf32>, vector<32x128xf32>, vector<2x128xf32> -> vector<2x128xf32>
    %954 = arith.addf %950, %953 : vector<2x128xf32>
    %c7_376 = arith.constant 7 : index
    %c0_377 = arith.constant 0 : index
    %c0_378 = arith.constant 0 : index
    %955 = vector.load %arg16[%c7_376, %c0_377, %c0_378] : memref<8x2x32xf32, #tpu.memory_space<vmem>>, vector<1x2x32xf32>
    %956 = vector.shape_cast %955 : vector<1x2x32xf32> to vector<2x32xf32>
    %cst_379 = arith.constant dense<0.000000e+00> : vector<2x128xf32>
    %957 = tpu.matmul %956, %890, %cst_379 {dimension_numbers = #tpu.dot_dimension_numbers<[1], [0], [0], [1], [0, 0, 1, 1], [], []>} : vector<2x32xf32>, vector<32x128xf32>, vector<2x128xf32> -> vector<2x128xf32>
    %958 = vector.broadcast %889 : vector<1x128xf32> to vector<2x128xf32>
    %959 = arith.addf %958, %957 : vector<2x128xf32>
    %c7_380 = arith.constant 7 : index
    %c0_381 = arith.constant 0 : index
    %c0_382 = arith.constant 0 : index
    %960 = vector.load %arg17[%c7_380, %c0_381, %c0_382] : memref<8x2x32xf32, #tpu.memory_space<vmem>>, vector<1x2x32xf32>
    %961 = vector.shape_cast %960 : vector<1x2x32xf32> to vector<2x32xf32>
    %cst_383 = arith.constant dense<0.000000e+00> : vector<2x128xf32>
    %962 = tpu.matmul %961, %891, %cst_383 {dimension_numbers = #tpu.dot_dimension_numbers<[1], [0], [0], [1], [0, 0, 1, 1], [], []>} : vector<2x32xf32>, vector<32x128xf32>, vector<2x128xf32> -> vector<2x128xf32>
    %963 = arith.addf %959, %962 : vector<2x128xf32>
    %cst_384 = arith.constant 0.000000e+00 : f32
    %964 = vector.broadcast %cst_384 : f32 to vector<2x32xf32>
    %cst_385 = arith.constant 0.000000e+00 : f32
    %965 = vector.broadcast %cst_385 : f32 to vector<2x32xf32>
    %cst_386 = arith.constant dense<0.000000e+00> : vector<2x128xf32>
    %966 = tpu.matmul %964, %888, %cst_386 {dimension_numbers = #tpu.dot_dimension_numbers<[1], [0], [0], [1], [0, 0, 1, 1], [], []>} : vector<2x32xf32>, vector<32x128xf32>, vector<2x128xf32> -> vector<2x128xf32>
    %967 = arith.addf %963, %966 : vector<2x128xf32>
    %968 = vector.extract_strided_slice %967 {offsets = [0, 0], sizes = [2, 32], strides = [1, 1]} : vector<2x128xf32> to vector<2x32xf32>
    %969 = arith.negf %968 : vector<2x32xf32>
    %970 = math.exp %969 : vector<2x32xf32>
    %cst_387 = arith.constant 1.000000e+00 : f32
    %971 = vector.broadcast %cst_387 : f32 to vector<2x32xf32>
    %972 = arith.addf %971, %970 : vector<2x32xf32>
    %973 = arith.divf %971, %972 : vector<2x32xf32>
    %974 = vector.extract_strided_slice %967 {offsets = [0, 32], sizes = [2, 32], strides = [1, 1]} : vector<2x128xf32> to vector<2x32xf32>
    %975 = arith.negf %974 : vector<2x32xf32>
    %976 = math.exp %975 : vector<2x32xf32>
    %cst_388 = arith.constant 1.000000e+00 : f32
    %977 = vector.broadcast %cst_388 : f32 to vector<2x32xf32>
    %978 = arith.addf %977, %976 : vector<2x32xf32>
    %979 = arith.divf %977, %978 : vector<2x32xf32>
    %980 = vector.extract_strided_slice %967 {offsets = [0, 64], sizes = [2, 32], strides = [1, 1]} : vector<2x128xf32> to vector<2x32xf32>
    %981 = math.tanh %980 : vector<2x32xf32>
    %982 = vector.extract_strided_slice %967 {offsets = [0, 96], sizes = [2, 32], strides = [1, 1]} : vector<2x128xf32> to vector<2x32xf32>
    %983 = arith.negf %982 : vector<2x32xf32>
    %984 = math.exp %983 : vector<2x32xf32>
    %cst_389 = arith.constant 1.000000e+00 : f32
    %985 = vector.broadcast %cst_389 : f32 to vector<2x32xf32>
    %986 = arith.addf %985, %984 : vector<2x32xf32>
    %987 = arith.divf %985, %986 : vector<2x32xf32>
    %988 = arith.mulf %979, %965 : vector<2x32xf32>
    %989 = arith.mulf %973, %981 : vector<2x32xf32>
    %990 = arith.addf %988, %989 : vector<2x32xf32>
    %991 = math.tanh %990 : vector<2x32xf32>
    %992 = arith.mulf %987, %991 : vector<2x32xf32>
    %c7_390 = arith.constant 7 : index
    %c0_391 = arith.constant 0 : index
    %c0_392 = arith.constant 0 : index
    %993 = vector.load %arg19[%c7_390, %c0_391, %c0_392] : memref<8x2x32xf32, #tpu.memory_space<vmem>>, vector<1x2x32xf32>
    %994 = vector.shape_cast %993 : vector<1x2x32xf32> to vector<2x32xf32>
    %995 = vector.shape_cast %992 : vector<2x32xf32> to vector<1x2x32xf32>
    tpu.vector_store %arg19[%c7_390, %c0_391, %c0_392], %995 {strides = array<i32>} : memref<8x2x32xf32, #tpu.memory_space<vmem>>, vector<1x2x32xf32>,
    %cst_393 = arith.constant dense<0.000000e+00> : vector<2x128xf32>
    %996 = tpu.matmul %992, %888, %cst_393 {dimension_numbers = #tpu.dot_dimension_numbers<[1], [0], [0], [1], [0, 0, 1, 1], [], []>} : vector<2x32xf32>, vector<32x128xf32>, vector<2x128xf32> -> vector<2x128xf32>
    %997 = arith.addf %954, %996 : vector<2x128xf32>
    %998 = vector.extract_strided_slice %997 {offsets = [0, 0], sizes = [2, 32], strides = [1, 1]} : vector<2x128xf32> to vector<2x32xf32>
    %999 = arith.negf %998 : vector<2x32xf32>
    %1000 = math.exp %999 : vector<2x32xf32>
    %cst_394 = arith.constant 1.000000e+00 : f32
    %1001 = vector.broadcast %cst_394 : f32 to vector<2x32xf32>
    %1002 = arith.addf %1001, %1000 : vector<2x32xf32>
    %1003 = arith.divf %1001, %1002 : vector<2x32xf32>
    %1004 = vector.extract_strided_slice %997 {offsets = [0, 32], sizes = [2, 32], strides = [1, 1]} : vector<2x128xf32> to vector<2x32xf32>
    %1005 = arith.negf %1004 : vector<2x32xf32>
    %1006 = math.exp %1005 : vector<2x32xf32>
    %cst_395 = arith.constant 1.000000e+00 : f32
    %1007 = vector.broadcast %cst_395 : f32 to vector<2x32xf32>
    %1008 = arith.addf %1007, %1006 : vector<2x32xf32>
    %1009 = arith.divf %1007, %1008 : vector<2x32xf32>
    %1010 = vector.extract_strided_slice %997 {offsets = [0, 64], sizes = [2, 32], strides = [1, 1]} : vector<2x128xf32> to vector<2x32xf32>
    %1011 = math.tanh %1010 : vector<2x32xf32>
    %1012 = vector.extract_strided_slice %997 {offsets = [0, 96], sizes = [2, 32], strides = [1, 1]} : vector<2x128xf32> to vector<2x32xf32>
    %1013 = arith.negf %1012 : vector<2x32xf32>
    %1014 = math.exp %1013 : vector<2x32xf32>
    %cst_396 = arith.constant 1.000000e+00 : f32
    %1015 = vector.broadcast %cst_396 : f32 to vector<2x32xf32>
    %1016 = arith.addf %1015, %1014 : vector<2x32xf32>
    %1017 = arith.divf %1015, %1016 : vector<2x32xf32>
    %1018 = arith.mulf %1009, %990 : vector<2x32xf32>
    %1019 = arith.mulf %1003, %1011 : vector<2x32xf32>
    %1020 = arith.addf %1018, %1019 : vector<2x32xf32>
    %1021 = math.tanh %1020 : vector<2x32xf32>
    %1022 = arith.mulf %1017, %1021 : vector<2x32xf32>
    %c6_397 = arith.constant 6 : index
    %c0_398 = arith.constant 0 : index
    %c0_399 = arith.constant 0 : index
    %1023 = vector.load %arg19[%c6_397, %c0_398, %c0_399] : memref<8x2x32xf32, #tpu.memory_space<vmem>>, vector<1x2x32xf32>
    %1024 = vector.shape_cast %1023 : vector<1x2x32xf32> to vector<2x32xf32>
    %1025 = vector.shape_cast %1022 : vector<2x32xf32> to vector<1x2x32xf32>
    tpu.vector_store %arg19[%c6_397, %c0_398, %c0_399], %1025 {strides = array<i32>} : memref<8x2x32xf32, #tpu.memory_space<vmem>>, vector<1x2x32xf32>,
    %cst_400 = arith.constant dense<0.000000e+00> : vector<2x128xf32>
    %1026 = tpu.matmul %1022, %888, %cst_400 {dimension_numbers = #tpu.dot_dimension_numbers<[1], [0], [0], [1], [0, 0, 1, 1], [], []>} : vector<2x32xf32>, vector<32x128xf32>, vector<2x128xf32> -> vector<2x128xf32>
    %1027 = arith.addf %945, %1026 : vector<2x128xf32>
    %1028 = vector.extract_strided_slice %1027 {offsets = [0, 0], sizes = [2, 32], strides = [1, 1]} : vector<2x128xf32> to vector<2x32xf32>
    %1029 = arith.negf %1028 : vector<2x32xf32>
    %1030 = math.exp %1029 : vector<2x32xf32>
    %cst_401 = arith.constant 1.000000e+00 : f32
    %1031 = vector.broadcast %cst_401 : f32 to vector<2x32xf32>
    %1032 = arith.addf %1031, %1030 : vector<2x32xf32>
    %1033 = arith.divf %1031, %1032 : vector<2x32xf32>
    %1034 = vector.extract_strided_slice %1027 {offsets = [0, 32], sizes = [2, 32], strides = [1, 1]} : vector<2x128xf32> to vector<2x32xf32>
    %1035 = arith.negf %1034 : vector<2x32xf32>
    %1036 = math.exp %1035 : vector<2x32xf32>
    %cst_402 = arith.constant 1.000000e+00 : f32
    %1037 = vector.broadcast %cst_402 : f32 to vector<2x32xf32>
    %1038 = arith.addf %1037, %1036 : vector<2x32xf32>
    %1039 = arith.divf %1037, %1038 : vector<2x32xf32>
    %1040 = vector.extract_strided_slice %1027 {offsets = [0, 64], sizes = [2, 32], strides = [1, 1]} : vector<2x128xf32> to vector<2x32xf32>
    %1041 = math.tanh %1040 : vector<2x32xf32>
    %1042 = vector.extract_strided_slice %1027 {offsets = [0, 96], sizes = [2, 32], strides = [1, 1]} : vector<2x128xf32> to vector<2x32xf32>
    %1043 = arith.negf %1042 : vector<2x32xf32>
    %1044 = math.exp %1043 : vector<2x32xf32>
    %cst_403 = arith.constant 1.000000e+00 : f32
    %1045 = vector.broadcast %cst_403 : f32 to vector<2x32xf32>
    %1046 = arith.addf %1045, %1044 : vector<2x32xf32>
    %1047 = arith.divf %1045, %1046 : vector<2x32xf32>
    %1048 = arith.mulf %1039, %1020 : vector<2x32xf32>
    %1049 = arith.mulf %1033, %1041 : vector<2x32xf32>
    %1050 = arith.addf %1048, %1049 : vector<2x32xf32>
    %1051 = math.tanh %1050 : vector<2x32xf32>
    %1052 = arith.mulf %1047, %1051 : vector<2x32xf32>
    %c5_404 = arith.constant 5 : index
    %c0_405 = arith.constant 0 : index
    %c0_406 = arith.constant 0 : index
    %1053 = vector.load %arg19[%c5_404, %c0_405, %c0_406] : memref<8x2x32xf32, #tpu.memory_space<vmem>>, vector<1x2x32xf32>
    %1054 = vector.shape_cast %1053 : vector<1x2x32xf32> to vector<2x32xf32>
    %1055 = vector.shape_cast %1052 : vector<2x32xf32> to vector<1x2x32xf32>
    tpu.vector_store %arg19[%c5_404, %c0_405, %c0_406], %1055 {strides = array<i32>} : memref<8x2x32xf32, #tpu.memory_space<vmem>>, vector<1x2x32xf32>,
    %cst_407 = arith.constant dense<0.000000e+00> : vector<2x128xf32>
    %1056 = tpu.matmul %1052, %888, %cst_407 {dimension_numbers = #tpu.dot_dimension_numbers<[1], [0], [0], [1], [0, 0, 1, 1], [], []>} : vector<2x32xf32>, vector<32x128xf32>, vector<2x128xf32> -> vector<2x128xf32>
    %1057 = arith.addf %936, %1056 : vector<2x128xf32>
    %1058 = vector.extract_strided_slice %1057 {offsets = [0, 0], sizes = [2, 32], strides = [1, 1]} : vector<2x128xf32> to vector<2x32xf32>
    %1059 = arith.negf %1058 : vector<2x32xf32>
    %1060 = math.exp %1059 : vector<2x32xf32>
    %cst_408 = arith.constant 1.000000e+00 : f32
    %1061 = vector.broadcast %cst_408 : f32 to vector<2x32xf32>
    %1062 = arith.addf %1061, %1060 : vector<2x32xf32>
    %1063 = arith.divf %1061, %1062 : vector<2x32xf32>
    %1064 = vector.extract_strided_slice %1057 {offsets = [0, 32], sizes = [2, 32], strides = [1, 1]} : vector<2x128xf32> to vector<2x32xf32>
    %1065 = arith.negf %1064 : vector<2x32xf32>
    %1066 = math.exp %1065 : vector<2x32xf32>
    %cst_409 = arith.constant 1.000000e+00 : f32
    %1067 = vector.broadcast %cst_409 : f32 to vector<2x32xf32>
    %1068 = arith.addf %1067, %1066 : vector<2x32xf32>
    %1069 = arith.divf %1067, %1068 : vector<2x32xf32>
    %1070 = vector.extract_strided_slice %1057 {offsets = [0, 64], sizes = [2, 32], strides = [1, 1]} : vector<2x128xf32> to vector<2x32xf32>
    %1071 = math.tanh %1070 : vector<2x32xf32>
    %1072 = vector.extract_strided_slice %1057 {offsets = [0, 96], sizes = [2, 32], strides = [1, 1]} : vector<2x128xf32> to vector<2x32xf32>
    %1073 = arith.negf %1072 : vector<2x32xf32>
    %1074 = math.exp %1073 : vector<2x32xf32>
    %cst_410 = arith.constant 1.000000e+00 : f32
    %1075 = vector.broadcast %cst_410 : f32 to vector<2x32xf32>
    %1076 = arith.addf %1075, %1074 : vector<2x32xf32>
    %1077 = arith.divf %1075, %1076 : vector<2x32xf32>
    %1078 = arith.mulf %1069, %1050 : vector<2x32xf32>
    %1079 = arith.mulf %1063, %1071 : vector<2x32xf32>
    %1080 = arith.addf %1078, %1079 : vector<2x32xf32>
    %1081 = math.tanh %1080 : vector<2x32xf32>
    %1082 = arith.mulf %1077, %1081 : vector<2x32xf32>
    %c4_411 = arith.constant 4 : index
    %c0_412 = arith.constant 0 : index
    %c0_413 = arith.constant 0 : index
    %1083 = vector.load %arg19[%c4_411, %c0_412, %c0_413] : memref<8x2x32xf32, #tpu.memory_space<vmem>>, vector<1x2x32xf32>
    %1084 = vector.shape_cast %1083 : vector<1x2x32xf32> to vector<2x32xf32>
    %1085 = vector.shape_cast %1082 : vector<2x32xf32> to vector<1x2x32xf32>
    tpu.vector_store %arg19[%c4_411, %c0_412, %c0_413], %1085 {strides = array<i32>} : memref<8x2x32xf32, #tpu.memory_space<vmem>>, vector<1x2x32xf32>,
    %cst_414 = arith.constant dense<0.000000e+00> : vector<2x128xf32>
    %1086 = tpu.matmul %1082, %888, %cst_414 {dimension_numbers = #tpu.dot_dimension_numbers<[1], [0], [0], [1], [0, 0, 1, 1], [], []>} : vector<2x32xf32>, vector<32x128xf32>, vector<2x128xf32> -> vector<2x128xf32>
    %1087 = arith.addf %927, %1086 : vector<2x128xf32>
    %1088 = vector.extract_strided_slice %1087 {offsets = [0, 0], sizes = [2, 32], strides = [1, 1]} : vector<2x128xf32> to vector<2x32xf32>
    %1089 = arith.negf %1088 : vector<2x32xf32>
    %1090 = math.exp %1089 : vector<2x32xf32>
    %cst_415 = arith.constant 1.000000e+00 : f32
    %1091 = vector.broadcast %cst_415 : f32 to vector<2x32xf32>
    %1092 = arith.addf %1091, %1090 : vector<2x32xf32>
    %1093 = arith.divf %1091, %1092 : vector<2x32xf32>
    %1094 = vector.extract_strided_slice %1087 {offsets = [0, 32], sizes = [2, 32], strides = [1, 1]} : vector<2x128xf32> to vector<2x32xf32>
    %1095 = arith.negf %1094 : vector<2x32xf32>
    %1096 = math.exp %1095 : vector<2x32xf32>
    %cst_416 = arith.constant 1.000000e+00 : f32
    %1097 = vector.broadcast %cst_416 : f32 to vector<2x32xf32>
    %1098 = arith.addf %1097, %1096 : vector<2x32xf32>
    %1099 = arith.divf %1097, %1098 : vector<2x32xf32>
    %1100 = vector.extract_strided_slice %1087 {offsets = [0, 64], sizes = [2, 32], strides = [1, 1]} : vector<2x128xf32> to vector<2x32xf32>
    %1101 = math.tanh %1100 : vector<2x32xf32>
    %1102 = vector.extract_strided_slice %1087 {offsets = [0, 96], sizes = [2, 32], strides = [1, 1]} : vector<2x128xf32> to vector<2x32xf32>
    %1103 = arith.negf %1102 : vector<2x32xf32>
    %1104 = math.exp %1103 : vector<2x32xf32>
    %cst_417 = arith.constant 1.000000e+00 : f32
    %1105 = vector.broadcast %cst_417 : f32 to vector<2x32xf32>
    %1106 = arith.addf %1105, %1104 : vector<2x32xf32>
    %1107 = arith.divf %1105, %1106 : vector<2x32xf32>
    %1108 = arith.mulf %1099, %1080 : vector<2x32xf32>
    %1109 = arith.mulf %1093, %1101 : vector<2x32xf32>
    %1110 = arith.addf %1108, %1109 : vector<2x32xf32>
    %1111 = math.tanh %1110 : vector<2x32xf32>
    %1112 = arith.mulf %1107, %1111 : vector<2x32xf32>
    %c3_418 = arith.constant 3 : index
    %c0_419 = arith.constant 0 : index
    %c0_420 = arith.constant 0 : index
    %1113 = vector.load %arg19[%c3_418, %c0_419, %c0_420] : memref<8x2x32xf32, #tpu.memory_space<vmem>>, vector<1x2x32xf32>
    %1114 = vector.shape_cast %1113 : vector<1x2x32xf32> to vector<2x32xf32>
    %1115 = vector.shape_cast %1112 : vector<2x32xf32> to vector<1x2x32xf32>
    tpu.vector_store %arg19[%c3_418, %c0_419, %c0_420], %1115 {strides = array<i32>} : memref<8x2x32xf32, #tpu.memory_space<vmem>>, vector<1x2x32xf32>,
    %cst_421 = arith.constant dense<0.000000e+00> : vector<2x128xf32>
    %1116 = tpu.matmul %1112, %888, %cst_421 {dimension_numbers = #tpu.dot_dimension_numbers<[1], [0], [0], [1], [0, 0, 1, 1], [], []>} : vector<2x32xf32>, vector<32x128xf32>, vector<2x128xf32> -> vector<2x128xf32>
    %1117 = arith.addf %918, %1116 : vector<2x128xf32>
    %1118 = vector.extract_strided_slice %1117 {offsets = [0, 0], sizes = [2, 32], strides = [1, 1]} : vector<2x128xf32> to vector<2x32xf32>
    %1119 = arith.negf %1118 : vector<2x32xf32>
    %1120 = math.exp %1119 : vector<2x32xf32>
    %cst_422 = arith.constant 1.000000e+00 : f32
    %1121 = vector.broadcast %cst_422 : f32 to vector<2x32xf32>
    %1122 = arith.addf %1121, %1120 : vector<2x32xf32>
    %1123 = arith.divf %1121, %1122 : vector<2x32xf32>
    %1124 = vector.extract_strided_slice %1117 {offsets = [0, 32], sizes = [2, 32], strides = [1, 1]} : vector<2x128xf32> to vector<2x32xf32>
    %1125 = arith.negf %1124 : vector<2x32xf32>
    %1126 = math.exp %1125 : vector<2x32xf32>
    %cst_423 = arith.constant 1.000000e+00 : f32
    %1127 = vector.broadcast %cst_423 : f32 to vector<2x32xf32>
    %1128 = arith.addf %1127, %1126 : vector<2x32xf32>
    %1129 = arith.divf %1127, %1128 : vector<2x32xf32>
    %1130 = vector.extract_strided_slice %1117 {offsets = [0, 64], sizes = [2, 32], strides = [1, 1]} : vector<2x128xf32> to vector<2x32xf32>
    %1131 = math.tanh %1130 : vector<2x32xf32>
    %1132 = vector.extract_strided_slice %1117 {offsets = [0, 96], sizes = [2, 32], strides = [1, 1]} : vector<2x128xf32> to vector<2x32xf32>
    %1133 = arith.negf %1132 : vector<2x32xf32>
    %1134 = math.exp %1133 : vector<2x32xf32>
    %cst_424 = arith.constant 1.000000e+00 : f32
    %1135 = vector.broadcast %cst_424 : f32 to vector<2x32xf32>
    %1136 = arith.addf %1135, %1134 : vector<2x32xf32>
    %1137 = arith.divf %1135, %1136 : vector<2x32xf32>
    %1138 = arith.mulf %1129, %1110 : vector<2x32xf32>
    %1139 = arith.mulf %1123, %1131 : vector<2x32xf32>
    %1140 = arith.addf %1138, %1139 : vector<2x32xf32>
    %1141 = math.tanh %1140 : vector<2x32xf32>
    %1142 = arith.mulf %1137, %1141 : vector<2x32xf32>
    %c2_425 = arith.constant 2 : index
    %c0_426 = arith.constant 0 : index
    %c0_427 = arith.constant 0 : index
    %1143 = vector.load %arg19[%c2_425, %c0_426, %c0_427] : memref<8x2x32xf32, #tpu.memory_space<vmem>>, vector<1x2x32xf32>
    %1144 = vector.shape_cast %1143 : vector<1x2x32xf32> to vector<2x32xf32>
    %1145 = vector.shape_cast %1142 : vector<2x32xf32> to vector<1x2x32xf32>
    tpu.vector_store %arg19[%c2_425, %c0_426, %c0_427], %1145 {strides = array<i32>} : memref<8x2x32xf32, #tpu.memory_space<vmem>>, vector<1x2x32xf32>,
    %cst_428 = arith.constant dense<0.000000e+00> : vector<2x128xf32>
    %1146 = tpu.matmul %1142, %888, %cst_428 {dimension_numbers = #tpu.dot_dimension_numbers<[1], [0], [0], [1], [0, 0, 1, 1], [], []>} : vector<2x32xf32>, vector<32x128xf32>, vector<2x128xf32> -> vector<2x128xf32>
    %1147 = arith.addf %909, %1146 : vector<2x128xf32>
    %1148 = vector.extract_strided_slice %1147 {offsets = [0, 0], sizes = [2, 32], strides = [1, 1]} : vector<2x128xf32> to vector<2x32xf32>
    %1149 = arith.negf %1148 : vector<2x32xf32>
    %1150 = math.exp %1149 : vector<2x32xf32>
    %cst_429 = arith.constant 1.000000e+00 : f32
    %1151 = vector.broadcast %cst_429 : f32 to vector<2x32xf32>
    %1152 = arith.addf %1151, %1150 : vector<2x32xf32>
    %1153 = arith.divf %1151, %1152 : vector<2x32xf32>
    %1154 = vector.extract_strided_slice %1147 {offsets = [0, 32], sizes = [2, 32], strides = [1, 1]} : vector<2x128xf32> to vector<2x32xf32>
    %1155 = arith.negf %1154 : vector<2x32xf32>
    %1156 = math.exp %1155 : vector<2x32xf32>
    %cst_430 = arith.constant 1.000000e+00 : f32
    %1157 = vector.broadcast %cst_430 : f32 to vector<2x32xf32>
    %1158 = arith.addf %1157, %1156 : vector<2x32xf32>
    %1159 = arith.divf %1157, %1158 : vector<2x32xf32>
    %1160 = vector.extract_strided_slice %1147 {offsets = [0, 64], sizes = [2, 32], strides = [1, 1]} : vector<2x128xf32> to vector<2x32xf32>
    %1161 = math.tanh %1160 : vector<2x32xf32>
    %1162 = vector.extract_strided_slice %1147 {offsets = [0, 96], sizes = [2, 32], strides = [1, 1]} : vector<2x128xf32> to vector<2x32xf32>
    %1163 = arith.negf %1162 : vector<2x32xf32>
    %1164 = math.exp %1163 : vector<2x32xf32>
    %cst_431 = arith.constant 1.000000e+00 : f32
    %1165 = vector.broadcast %cst_431 : f32 to vector<2x32xf32>
    %1166 = arith.addf %1165, %1164 : vector<2x32xf32>
    %1167 = arith.divf %1165, %1166 : vector<2x32xf32>
    %1168 = arith.mulf %1159, %1140 : vector<2x32xf32>
    %1169 = arith.mulf %1153, %1161 : vector<2x32xf32>
    %1170 = arith.addf %1168, %1169 : vector<2x32xf32>
    %1171 = math.tanh %1170 : vector<2x32xf32>
    %1172 = arith.mulf %1167, %1171 : vector<2x32xf32>
    %c1_432 = arith.constant 1 : index
    %c0_433 = arith.constant 0 : index
    %c0_434 = arith.constant 0 : index
    %1173 = vector.load %arg19[%c1_432, %c0_433, %c0_434] : memref<8x2x32xf32, #tpu.memory_space<vmem>>, vector<1x2x32xf32>
    %1174 = vector.shape_cast %1173 : vector<1x2x32xf32> to vector<2x32xf32>
    %1175 = vector.shape_cast %1172 : vector<2x32xf32> to vector<1x2x32xf32>
    tpu.vector_store %arg19[%c1_432, %c0_433, %c0_434], %1175 {strides = array<i32>} : memref<8x2x32xf32, #tpu.memory_space<vmem>>, vector<1x2x32xf32>,
    %cst_435 = arith.constant dense<0.000000e+00> : vector<2x128xf32>
    %1176 = tpu.matmul %1172, %888, %cst_435 {dimension_numbers = #tpu.dot_dimension_numbers<[1], [0], [0], [1], [0, 0, 1, 1], [], []>} : vector<2x32xf32>, vector<32x128xf32>, vector<2x128xf32> -> vector<2x128xf32>
    %1177 = arith.addf %900, %1176 : vector<2x128xf32>
    %1178 = vector.extract_strided_slice %1177 {offsets = [0, 0], sizes = [2, 32], strides = [1, 1]} : vector<2x128xf32> to vector<2x32xf32>
    %1179 = arith.negf %1178 : vector<2x32xf32>
    %1180 = math.exp %1179 : vector<2x32xf32>
    %cst_436 = arith.constant 1.000000e+00 : f32
    %1181 = vector.broadcast %cst_436 : f32 to vector<2x32xf32>
    %1182 = arith.addf %1181, %1180 : vector<2x32xf32>
    %1183 = arith.divf %1181, %1182 : vector<2x32xf32>
    %1184 = vector.extract_strided_slice %1177 {offsets = [0, 32], sizes = [2, 32], strides = [1, 1]} : vector<2x128xf32> to vector<2x32xf32>
    %1185 = arith.negf %1184 : vector<2x32xf32>
    %1186 = math.exp %1185 : vector<2x32xf32>
    %cst_437 = arith.constant 1.000000e+00 : f32
    %1187 = vector.broadcast %cst_437 : f32 to vector<2x32xf32>
    %1188 = arith.addf %1187, %1186 : vector<2x32xf32>
    %1189 = arith.divf %1187, %1188 : vector<2x32xf32>
    %1190 = vector.extract_strided_slice %1177 {offsets = [0, 64], sizes = [2, 32], strides = [1, 1]} : vector<2x128xf32> to vector<2x32xf32>
    %1191 = math.tanh %1190 : vector<2x32xf32>
    %1192 = vector.extract_strided_slice %1177 {offsets = [0, 96], sizes = [2, 32], strides = [1, 1]} : vector<2x128xf32> to vector<2x32xf32>
    %1193 = arith.negf %1192 : vector<2x32xf32>
    %1194 = math.exp %1193 : vector<2x32xf32>
    %cst_438 = arith.constant 1.000000e+00 : f32
    %1195 = vector.broadcast %cst_438 : f32 to vector<2x32xf32>
    %1196 = arith.addf %1195, %1194 : vector<2x32xf32>
    %1197 = arith.divf %1195, %1196 : vector<2x32xf32>
    %1198 = arith.mulf %1189, %1170 : vector<2x32xf32>
    %1199 = arith.mulf %1183, %1191 : vector<2x32xf32>
    %1200 = arith.addf %1198, %1199 : vector<2x32xf32>
    %1201 = math.tanh %1200 : vector<2x32xf32>
    %1202 = arith.mulf %1197, %1201 : vector<2x32xf32>
    %c0_439 = arith.constant 0 : index
    %c0_440 = arith.constant 0 : index
    %c0_441 = arith.constant 0 : index
    %1203 = vector.load %arg19[%c0_439, %c0_440, %c0_441] : memref<8x2x32xf32, #tpu.memory_space<vmem>>, vector<1x2x32xf32>
    %1204 = vector.shape_cast %1203 : vector<1x2x32xf32> to vector<2x32xf32>
    %1205 = vector.shape_cast %1202 : vector<2x32xf32> to vector<1x2x32xf32>
    tpu.vector_store %arg19[%c0_439, %c0_440, %c0_441], %1205 {strides = array<i32>} : memref<8x2x32xf32, #tpu.memory_space<vmem>>, vector<1x2x32xf32>,
    %c0_442 = arith.constant 0 : index
    %1206 = memref.load %arg1[%c0_442] : memref<2xi32, #tpu.memory_space<smem>>
    %c1_i32 = arith.constant 1 : i32
    %1207 = arith.subi %1206, %c1_i32 : i32
    %1208 = arith.index_cast %1207 : i32 to index
    %c0_443 = arith.constant 0 : index
    %c0_444 = arith.constant 0 : index
    %1209 = vector.load %arg18[%1208, %c0_443, %c0_444] : memref<8x2x32xf32, #tpu.memory_space<vmem>>, vector<1x2x32xf32>
    %1210 = vector.shape_cast %1209 : vector<1x2x32xf32> to vector<2x32xf32>
    %1211 = vector.extract_strided_slice %1210 {offsets = [0, 0], sizes = [1, 32], strides = [1, 1]} : vector<2x32xf32> to vector<1x32xf32>
    %c0_445 = arith.constant 0 : index
    %c0_446 = arith.constant 0 : index
    %1212 = vector.load %arg15[%c0_445, %c0_446] : memref<2x64xf32, #tpu.memory_space<vmem>>, vector<1x32xf32>
    tpu.vector_store %arg15[%c0_445, %c0_446], %1211 {strides = array<i32>} : memref<2x64xf32, #tpu.memory_space<vmem>>, vector<1x32xf32>,
    %1213 = arith.index_cast %1207 : i32 to index
    %c0_447 = arith.constant 0 : index
    %c0_448 = arith.constant 0 : index
    %1214 = vector.load %arg19[%1213, %c0_447, %c0_448] : memref<8x2x32xf32, #tpu.memory_space<vmem>>, vector<1x2x32xf32>
    %1215 = vector.shape_cast %1214 : vector<1x2x32xf32> to vector<2x32xf32>
    %1216 = vector.extract_strided_slice %1215 {offsets = [0, 0], sizes = [1, 32], strides = [1, 1]} : vector<2x32xf32> to vector<1x32xf32>
    %c0_449 = arith.constant 0 : index
    %c32_450 = arith.constant 32 : index
    %1217 = vector.load %arg15[%c0_449, %c32_450] : memref<2x64xf32, #tpu.memory_space<vmem>>, vector<1x32xf32>
    tpu.vector_store %arg15[%c0_449, %c32_450], %1216 {strides = array<i32>} : memref<2x64xf32, #tpu.memory_space<vmem>>, vector<1x32xf32>,
    %c1_451 = arith.constant 1 : index
    %1218 = memref.load %arg1[%c1_451] : memref<2xi32, #tpu.memory_space<smem>>
    %c1_i32_452 = arith.constant 1 : i32
    %1219 = arith.subi %1218, %c1_i32_452 : i32
    %1220 = arith.index_cast %1219 : i32 to index
    %c0_453 = arith.constant 0 : index
    %c0_454 = arith.constant 0 : index
    %1221 = vector.load %arg18[%1220, %c0_453, %c0_454] : memref<8x2x32xf32, #tpu.memory_space<vmem>>, vector<1x2x32xf32>
    %1222 = vector.shape_cast %1221 : vector<1x2x32xf32> to vector<2x32xf32>
    %1223 = vector.extract_strided_slice %1222 {offsets = [1, 0], sizes = [1, 32], strides = [1, 1]} : vector<2x32xf32> to vector<1x32xf32>
    %c1_455 = arith.constant 1 : index
    %c0_456 = arith.constant 0 : index
    %1224 = vector.load %arg15[%c1_455, %c0_456] : memref<2x64xf32, #tpu.memory_space<vmem>>, vector<1x32xf32>
    tpu.vector_store %arg15[%c1_455, %c0_456], %1223 {strides = array<i32>} : memref<2x64xf32, #tpu.memory_space<vmem>>, vector<1x32xf32>,
    %1225 = arith.index_cast %1219 : i32 to index
    %c0_457 = arith.constant 0 : index
    %c0_458 = arith.constant 0 : index
    %1226 = vector.load %arg19[%1225, %c0_457, %c0_458] : memref<8x2x32xf32, #tpu.memory_space<vmem>>, vector<1x2x32xf32>
    %1227 = vector.shape_cast %1226 : vector<1x2x32xf32> to vector<2x32xf32>
    %1228 = vector.extract_strided_slice %1227 {offsets = [1, 0], sizes = [1, 32], strides = [1, 1]} : vector<2x32xf32> to vector<1x32xf32>
    %c1_459 = arith.constant 1 : index
    %c32_460 = arith.constant 32 : index
    %1229 = vector.load %arg15[%c1_459, %c32_460] : memref<2x64xf32, #tpu.memory_space<vmem>>, vector<1x32xf32>
    tpu.vector_store %arg15[%c1_459, %c32_460], %1228 {strides = array<i32>} : memref<2x64xf32, #tpu.memory_space<vmem>>, vector<1x32xf32>,
    return
  }
  func.func @transform_0(%arg0: i32, %arg1: memref<2xi32, #tpu.memory_space<smem>>) -> (i32, i32, i32) {
    %c0_i32 = arith.constant 0 : i32
    %c0_i32_0 = arith.constant 0 : i32
    %c0_i32_1 = arith.constant 0 : i32
    %c0_i32_2 = arith.constant 0 : i32
    return %c0_i32, %c0_i32_0, %c0_i32_1 : i32, i32, i32
  }
  func.func @transform_1(%arg0: i32, %arg1: memref<2xi32, #tpu.memory_space<smem>>) -> (i32, i32) {
    %c0_i32 = arith.constant 0 : i32
    %c0_i32_0 = arith.constant 0 : i32
    %c0_i32_1 = arith.constant 0 : i32
    return %c0_i32, %c0_i32_0 : i32, i32
  }
  func.func @transform_2(%arg0: i32, %arg1: memref<2xi32, #tpu.memory_space<smem>>) -> (i32, i32) {
    %c0_i32 = arith.constant 0 : i32
    %c0_i32_0 = arith.constant 0 : i32
    %c0_i32_1 = arith.constant 0 : i32
    return %c0_i32, %c0_i32_0 : i32, i32
  }
  func.func @transform_3(%arg0: i32, %arg1: memref<2xi32, #tpu.memory_space<smem>>) -> (i32, i32) {
    %c0_i32 = arith.constant 0 : i32
    %c0_i32_0 = arith.constant 0 : i32
    %c0_i32_1 = arith.constant 0 : i32
    return %c0_i32, %c0_i32_0 : i32, i32
  }
  func.func @transform_4(%arg0: i32, %arg1: memref<2xi32, #tpu.memory_space<smem>>) -> (i32, i32) {
    %c0_i32 = arith.constant 0 : i32
    %c0_i32_0 = arith.constant 0 : i32
    %c0_i32_1 = arith.constant 0 : i32
    return %c0_i32, %c0_i32_0 : i32, i32
  }
  func.func @transform_5(%arg0: i32, %arg1: memref<2xi32, #tpu.memory_space<smem>>) -> (i32, i32) {
    %c0_i32 = arith.constant 0 : i32
    %c0_i32_0 = arith.constant 0 : i32
    %c0_i32_1 = arith.constant 0 : i32
    return %c0_i32, %c0_i32_0 : i32, i32
  }
  func.func @transform_6(%arg0: i32, %arg1: memref<2xi32, #tpu.memory_space<smem>>) -> (i32, i32) {
    %c0_i32 = arith.constant 0 : i32
    %c0_i32_0 = arith.constant 0 : i32
    %c0_i32_1 = arith.constant 0 : i32
    return %c0_i32, %c0_i32_0 : i32, i32
  }
  func.func @transform_7(%arg0: i32, %arg1: memref<2xi32, #tpu.memory_space<smem>>) -> (i32, i32) {
    %c0_i32 = arith.constant 0 : i32
    %c0_i32_0 = arith.constant 0 : i32
    %c0_i32_1 = arith.constant 0 : i32
    return %c0_i32, %c0_i32_0 : i32, i32
  }
  func.func @transform_8(%arg0: i32, %arg1: memref<2xi32, #tpu.memory_space<smem>>) -> (i32, i32) {
    %c0_i32 = arith.constant 0 : i32
    %c0_i32_0 = arith.constant 0 : i32
    %c0_i32_1 = arith.constant 0 : i32
    return %c0_i32, %c0_i32_0 : i32, i32
  }
  func.func @transform_9(%arg0: i32, %arg1: memref<2xi32, #tpu.memory_space<smem>>) -> (i32, i32) {
    %c0_i32 = arith.constant 0 : i32
    %c0_i32_0 = arith.constant 0 : i32
    %c0_i32_1 = arith.constant 0 : i32
    return %c0_i32, %c0_i32_0 : i32, i32
  }
  func.func @transform_10(%arg0: i32, %arg1: memref<2xi32, #tpu.memory_space<smem>>) -> (i32, i32) {
    %c0_i32 = arith.constant 0 : i32
    %c0_i32_0 = arith.constant 0 : i32
    %c0_i32_1 = arith.constant 0 : i32
    return %c0_i32, %c0_i32_0 : i32, i32
  }
  func.func @transform_11(%arg0: i32, %arg1: memref<2xi32, #tpu.memory_space<smem>>) -> (i32, i32) {
    %c0_i32 = arith.constant 0 : i32
    %c0_i32_0 = arith.constant 0 : i32
    %c0_i32_1 = arith.constant 0 : i32
    return %c0_i32, %c0_i32_0 : i32, i32
  }
  func.func @transform_12(%arg0: i32, %arg1: memref<2xi32, #tpu.memory_space<smem>>) -> (i32, i32) {
    %c0_i32 = arith.constant 0 : i32
    %c0_i32_0 = arith.constant 0 : i32
    %c0_i32_1 = arith.constant 0 : i32
    return %c0_i32, %c0_i32_0 : i32, i32
  }
  func.func @transform_13(%arg0: i32, %arg1: memref<2xi32, #tpu.memory_space<smem>>) -> (i32, i32) {
    %c0_i32 = arith.constant 0 : i32
    %c0_i32_0 = arith.constant 0 : i32
    %c0_i32_1 = arith.constant 0 : i32
    return %c0_i32, %c0_i32_0 : i32, i32
  }
}

</mosaic_0001>

<bundles_post_ra>
// kernel: lstm_encoder_forward.1
= control target key start
LH: loop header
LB: loop body
LE: loop exit
PB: predicated region body
PF: predicated region fallthrough
CT: control target
= control target key end

     0   :  { %s10614_s0 = inlined_call_operand.vmem [shape: s32[2], index: 0, kind: input, shape index: {}]   ;;  %s10615_s1 = inlined_call_operand.vmem [shape: f32[8,2,16], index: 1, kind: input, shape index: {}]   ;;  %s10616_s2 = inlined_call_operand.hbm [shape: f32[16,128], index: 2, kind: input, shape index: {}]   ;;  %s10617_s3 = inlined_call_operand.hbm [shape: f32[32,128], index: 3, kind: input, shape index: {}]   ;;  %s10618_s4 = inlined_call_operand.vmem [shape: f32[1,128], index: 4, kind: input, shape index: {}]   ;;  %s10619_s5 = inlined_call_operand.hbm [shape: f32[16,128], index: 5, kind: input, shape index: {}]   ;;  %s10620_s6 = inlined_call_operand.hbm [shape: f32[32,128], index: 6, kind: input, shape index: {}]   ;;  %s10621_s7 = inlined_call_operand.vmem [shape: f32[1,128], index: 7, kind: input, shape index: {}]   ;;  %s10622_s8 = inlined_call_operand.hbm [shape: f32[64,128], index: 8, kind: input, shape index: {}]   ;;  %s10623_s9 = inlined_call_operand.hbm [shape: f32[32,128], index: 9, kind: input, shape index: {}]   ;;  %s10624_s10 = inlined_call_operand.vmem [shape: f32[1,128], index: 10, kind: input, shape index: {}]   ;;  %s10625_s11 = inlined_call_operand.vmem [shape: f32[64,128], index: 11, kind: input, shape index: {}]   ;;  %s10626_s12 = inlined_call_operand.hbm [shape: f32[32,128], index: 12, kind: input, shape index: {}]   ;;  %s10627_s13 = inlined_call_operand.vmem [shape: f32[1,128], index: 13, kind: input, shape index: {}]   ;;  %s10628_s14 = inlined_call_operand.hbm [shape: f32[2,64], index: 14, kind: output, shape index: {}]  }
   0x1   :  { %s19_s15 = sshll.u32 %s10614_s0, 4  ;;  %s20_s15 = int_to_ptr.vmem [resolvable:$true] %s19_s15 }
   0x2   :  { %s9297_s16 = scalar_lea.vmem %s20_s15, 16  ;;  %p9302_p1 = scmp.lt.s32.totalorder %s20_s15, %s20_s15 }
   0x3   :  { %p9298_p0 = scmp.ne.s32.totalorder %s20_s15, %s9297_s16  ;;  %p9303_p2 = scmp.lt.s32.totalorder %s9297_s16, %s9297_s16 }
   0x5   :  { %p9304_p3 = por %p9303_p2, %p9302_p1 }
   0x7   :  { %p9305_p4 = pnand %p9304_p3, %p9298_p0 }
   0x9   :  { %9308 = shalt.err (!%p9305_p4)  }
   0xa   :  { %s9497_s17 = smov [#allocation7]  }
   0xb   :  { %22 = dma.vmem_to_smem %s20_s15, 16, %s9497_s17, [#allocation6] }
   0xc   :  { %9485 = dma.done.wait [#allocation6], 16 }
   0xd   :  { %9486 = vsyncadd [#allocation6], 4294967280 }
   0xe   :  { %24 = sfence }
   0xf   :  { %25 = vsyncpa [#allocation9], 0 }
  0x10   :  { %26 = vsyncpa [#allocation12], 0 }
  0x11   :  { %27 = vsyncpa [#allocation15], 0 }
  0x12   :  { %28 = vsyncpa [#allocation18], 0 }
  0x13   :  { %29 = vsyncpa [#allocation10], 0  ;;  %s9498_s18 = smov [#allocation11]   ;;  %s9499_s19 = smov [#allocation14]  }
  0x14   :  { %s49_s0 = sshll.u32 %s9498_s18, 4  ;;  %s75_s20 = sshll.u32 %s9499_s19, 4  ;;  %s50_s0 = int_to_ptr.vmem [resolvable:$true] %s49_s0  ;;  %s9591_s20 = int_to_ptr.vmem [resolvable:$true] %s75_s20 }
  0x15   :  { %s9309_s23 = scalar_lea.hbm %s10617_s3, 512 }
  0x16   :  { %p9310_p5 = scmp.ne.s32.totalorder %s10617_s3, %s9309_s23  ;;  %p9313_p6 = scmp.lt.u32.totalorder %s9309_s23, %s10617_s3 }
  0x18   :  { %p9315_p7 = pnand %p9313_p6, %p9310_p5 }
  0x1a   :  { %9318 = shalt.err (!%p9315_p7)
}
  0x1b   :  { %s9319_s28 = scalar_lea.vmem %s50_s0, 512  ;;  %p9324_p9 = scmp.lt.s32.totalorder %s50_s0, %s50_s0 }
  0x1c   :  { %p9320_p8 = scmp.ne.s32.totalorder %s50_s0, %s9319_s28  ;;  %p9325_p10 = scmp.lt.s32.totalorder %s9319_s28, %s9319_s28 }
  0x1e   :  { %p9326_p11 = por %p9325_p10, %p9324_p9 }
  0x20   :  { %p9327_p12 = pnand %p9326_p11, %p9320_p8 }
  0x22   :  { %9330 = shalt.err (!%p9327_p12)
}
  0x23   :  { %s9500_s29 = smov 128   ;;  %s9501_s30 = smov 8  }
  0x24   :  { %55 = dma.hbm_to_vmem [thread:$0]  %s10617_s3, 512, %s50_s0, [#allocation12], %s9500_s29, %s9500_s29, %s9501_s30  }
  0x25   :  { %s9331_s19 = scalar_lea.hbm %s10620_s6, 512 }
  0x26   :  { %p9332_p13 = scmp.ne.s32.totalorder %s10620_s6, %s9331_s19  ;;  %p9335_p0 = scmp.lt.u32.totalorder %s9331_s19, %s10620_s6 }
  0x28   :  { %p9337_p1 = pnand %p9335_p0, %p9332_p13 }
  0x2a   :  { %9340 = shalt.err (!%p9337_p1)
}
  0x2b   :  { %s9341_s25 = scalar_lea.vmem %s9591_s20, 512  ;;  %p9346_p3 = scmp.lt.s32.totalorder %s9591_s20, %s9591_s20 }
  0x2c   :  { %p9342_p2 = scmp.ne.s32.totalorder %s9591_s20, %s9341_s25  ;;  %p9347_p4 = scmp.lt.s32.totalorder %s9341_s25, %s9341_s25 }
  0x2e   :  { %p9348_p5 = por %p9347_p4, %p9346_p3 }
  0x30   :  { %p9349_p6 = pnand %p9348_p5, %p9342_p2 }
  0x32   :  { %9352 = shalt.err (!%p9349_p6)
}
  0x33   :  { %81 = dma.hbm_to_vmem [thread:$0]  %s10620_s6, 512, %s9591_s20, [#allocation15], %s9500_s29, %s9500_s29, %s9501_s30  }
  0x34   :  { %s9502_s26 = smov [#allocation17]   ;;  %s9503_s28 = smov [#allocation8]  }
  0x35   :  { %s101_s27 = sshll.u32 %s9502_s26, 4  ;;  %s37_s15 = sshll.u32 %s9503_s28, 4  ;;  %s102_s27 = int_to_ptr.vmem [resolvable:$true] %s101_s27  ;;  %s9628_s15 = int_to_ptr.vmem [resolvable:$true] %s37_s15 }
  0x36   :  { %s9353_s18 = scalar_lea.hbm %s10623_s9, 512 }
  0x37   :  { %p9354_p7 = scmp.ne.s32.totalorder %s10623_s9, %s9353_s18  ;;  %p9357_p8 = scmp.lt.u32.totalorder %s9353_s18, %s10623_s9 }
  0x39   :  { %p9359_p9 = pnand %p9357_p8, %p9354_p7 }
  0x3b   :  { %9362 = shalt.err (!%p9359_p9)
}
  0x3c   :  { %s9363_s6 = scalar_lea.vmem %s102_s27, 512  ;;  %p9368_p11 = scmp.lt.s32.totalorder %s102_s27, %s102_s27 }
  0x3d   :  { %p9364_p10 = scmp.ne.s32.totalorder %s102_s27, %s9363_s6  ;;  %p9369_p12 = scmp.lt.s32.totalorder %s9363_s6, %s9363_s6 }
  0x3f   :  { %p9370_p13 = por %p9369_p12, %p9368_p11 }
  0x41   :  { %p9371_p0 = pnand %p9370_p13, %p9364_p10 }
  0x43   :  { %9374 = shalt.err (!%p9371_p0)
}
  0x44   :  { %107 = dma.hbm_to_vmem [thread:$0]  %s10623_s9, 512, %s102_s27, [#allocation18], %s9500_s29, %s9500_s29, %s9501_s30  }
  0x45   :  { %s9375_s0 = scalar_lea.hbm %s10616_s2, 256 }
  0x46   :  { %p9376_p1 = scmp.ne.s32.totalorder %s10616_s2, %s9375_s0  ;;  %p9379_p2 = scmp.lt.u32.totalorder %s9375_s0, %s10616_s2 }
  0x48   :  { %p9381_p3 = pnand %p9379_p2, %p9376_p1 }
  0x4a   :  { %9384 = shalt.err (!%p9381_p3)
}
  0x4b   :  { %s9385_s18 = scalar_lea.vmem %s9628_s15, 256  ;;  %p9390_p5 = scmp.lt.s32.totalorder %s9628_s15, %s9628_s15 }
  0x4c   :  { %p9386_p4 = scmp.ne.s32.totalorder %s9628_s15, %s9385_s18  ;;  %p9391_p6 = scmp.lt.s32.totalorder %s9385_s18, %s9385_s18 }
  0x4e   :  { %p9392_p7 = por %p9391_p6, %p9390_p5 }
  0x50   :  { %p9393_p8 = pnand %p9392_p7, %p9386_p4 }
  0x52   :  { %9396 = shalt.err (!%p9393_p8)
}
  0x53   :  { %43 = dma.hbm_to_vmem [thread:$0]  %s10616_s2, 256, %s9628_s15, [#allocation9], %s9500_s29, %s9500_s29, %s9501_s30  }
  0x54   :  { %s9504_s19 = smov [#allocation13]   ;;  %s9505_s22 = smov [#allocation16]  }
  0x55   :  { %s63_s21 = sshll.u32 %s9504_s19, 4  ;;  %s89_s23 = sshll.u32 %s9505_s22, 4  ;;  %s64_s21 = int_to_ptr.vmem [resolvable:$true] %s63_s21  ;;  %s9665_s23 = int_to_ptr.vmem [resolvable:$true] %s89_s23 }
  0x56   :  { %s9397_s24 = scalar_lea.hbm %s10619_s5, 256 }
  0x57   :  { %p9398_p9 = scmp.ne.s32.totalorder %s10619_s5, %s9397_s24  ;;  %p9401_p10 = scmp.lt.u32.totalorder %s9397_s24, %s10619_s5 }
  0x59   :  { %p9403_p11 = pnand %p9401_p10, %p9398_p9 }
  0x5b   :  { %9406 = shalt.err (!%p9403_p11)
}
  0x5c   :  { %s9407_s2 = scalar_lea.vmem %s64_s21, 256  ;;  %p9412_p13 = scmp.lt.s32.totalorder %s64_s21, %s64_s21 }
  0x5d   :  { %p9408_p12 = scmp.ne.s32.totalorder %s64_s21, %s9407_s2  ;;  %p9413_p0 = scmp.lt.s32.totalorder %s9407_s2, %s9407_s2 }
  0x5f   :  { %p9414_p1 = por %p9413_p0, %p9412_p13 }
  0x61   :  { %p9415_p2 = pnand %p9414_p1, %p9408_p12 }
  0x63   :  { %9418 = shalt.err (!%p9415_p2)
}
  0x64   :  { %69 = dma.hbm_to_vmem [thread:$0]  %s10619_s5, 256, %s64_s21, [#allocation12], %s9500_s29, %s9500_s29, %s9501_s30  }
  0x65   :  { %s9419_s18 = scalar_lea.hbm %s10622_s8, 1024 }
  0x66   :  { %p9420_p3 = scmp.ne.s32.totalorder %s10622_s8, %s9419_s18  ;;  %p9423_p4 = scmp.lt.u32.totalorder %s9419_s18, %s10622_s8 }
  0x68   :  { %p9425_p5 = pnand %p9423_p4, %p9420_p3 }
  0x6a   :  { %9428 = shalt.err (!%p9425_p5)
}
  0x6b   :  { %s9429_s6 = scalar_lea.vmem %s9665_s23, 1024  ;;  %p9434_p7 = scmp.lt.s32.totalorder %s9665_s23, %s9665_s23 }
  0x6c   :  { %p9430_p6 = scmp.ne.s32.totalorder %s9665_s23, %s9429_s6  ;;  %p9435_p8 = scmp.lt.s32.totalorder %s9429_s6, %s9429_s6 }
  0x6e   :  { %p9436_p9 = por %p9435_p8, %p9434_p7 }
  0x70   :  { %p9437_p10 = pnand %p9436_p9, %p9430_p6 }
  0x72   :  { %9440 = shalt.err (!%p9437_p10)
}
  0x73   :  { %95 = dma.hbm_to_vmem [thread:$0]  %s10622_s8, 1024, %s9665_s23, [#allocation15], %s9500_s29, %s9500_s29, %s9501_s30  }
  0x74   :  { %s9506_s20 = smov [#allocation19]   ;;  %s9441_s0 = scalar_lea.hbm %s10626_s12, 512 }
  0x75   :  { %s117_s24 = sshll.u32 %s9506_s20, 4  ;;  %p9442_p11 = scmp.ne.s32.totalorder %s10626_s12, %s9441_s0  ;;  %s118_s24 = int_to_ptr.vmem [resolvable:$true] %s117_s24 }
  0x76   :  { %p9445_p12 = scmp.lt.u32.totalorder %s9441_s0, %s10626_s12 }
  0x78   :  { %p9447_p13 = pnand %p9445_p12, %p9442_p11 }
  0x7a   :  { %9450 = shalt.err (!%p9447_p13)
}
  0x7b   :  { %s9451_s16 = scalar_lea.vmem %s118_s24, 512  ;;  %p9456_p1 = scmp.lt.s32.totalorder %s118_s24, %s118_s24 }
  0x7c   :  { %p9452_p0 = scmp.ne.s32.totalorder %s118_s24, %s9451_s16  ;;  %p9457_p2 = scmp.lt.s32.totalorder %s9451_s16, %s9451_s16 }
  0x7e   :  { %p9458_p3 = por %p9457_p2, %p9456_p1 }
  0x80   :  { %p9459_p4 = pnand %p9458_p3, %p9452_p0 }
  0x82   :  { %9462 = shalt.err (!%p9459_p4)
}
  0x83   :  { %123 = dma.hbm_to_vmem [thread:$0]  %s10626_s12, 512, %s118_s24, [#allocation18], %s9500_s29, %s9500_s29, %s9501_s30  }
  0x84   :  { %9487 = dma.done.wait [#allocation9], 256  }
  0x85   :  { %9488 = vsyncadd [#allocation9], 4294967040 }
  0x86   :  { %9489 = dma.done.wait [#allocation12], 768  }
  0x87   :  { %9490 = vsyncadd [#allocation12], 4294966528 }
  0x88   :  { %9491 = dma.done.wait [#allocation15], 1536  }
  0x89   :  { %9492 = vsyncadd [#allocation15], 4294965760 }
  0x8a   :  { %9493 = dma.done.wait [#allocation18], 1024  }
  0x8b   :  { %9494 = vsyncadd [#allocation18], 4294966272  ;;  %v9507_v0 = vmov 0.0|0.0   ;;  %vm9508_vm0 = vmmov 0   ;;  %v9509_v1 = vmov 0.0   ;;  %v152_v2 = vld [vmem:[#allocation8] sm:$0xff] }
  0x8c   :  { %8463 = vmatprep.subr.bf16.mxu0 %v9507_v0  ;;  %7651 = vmatprep.mubr.msk.f32.mxu0 %vm9508_vm0, %v9509_v1  ;;  %v153_v3 = vld [vmem:[#allocation8 + $0x8] sm:$0xff]  ;;  %v154_v5 = vld [vmem:[%s10615_s1] sm:$0x3]  ;;  %vm161_vm1 = vcmask 130048   ;;  %v7152_v6 = vld [vmem:[%s10615_s1 + $0x4] sm:$0x3] }
  0x8d   :  { %8466 = vmatprep.subr.bf16.mxu1 %v9507_v0  ;;  %7658 = vmatprep.mubr.msk.f32.mxu1 %vm9508_vm0, %v9509_v1  ;;  %v9723_v4 = vpack.c.bf16 %v153_v3, %v152_v2  ;;  %v7156_v7 = vld [vmem:[%s10615_s1 + $0x8] sm:$0x3]  ;;  %v147_v8 = vld [vmem:[#allocation11] sm:$0xff]  ;;  %v148_v9 = vld [vmem:[#allocation11 + $0x8] sm:$0xff]  ;;  %s9510_s5 = smov 64   ;;  %s9511_s21 = smov 32  }
  0x8e   :  { %v7160_v10 = vld [vmem:[%s10615_s1 + $0xc] sm:$0x3]  ;;  %v9755_v11 = vpack.c.bf16 %v148_v9, %v147_v8  ;;  %v149_v12 = vld [vmem:[#allocation11 + $0x10] sm:$0xff]  ;;  %v7158_v31 = vld [vmem:[%s10615_s1 + $0xa] sm:$0x3]  ;;  %vm863_vm2 = vcmask 254976  }
  0x8f   :  { %8465 = vmatpush3.bf16.msra.mxu0 %v9723_v4  ;;  %8468 = vmatpush3.bf16.msra.mxu1 %v9723_v4  ;;  %v150_v13 = vld [vmem:[#allocation11 + $0x18] sm:$0xff]  ;;  %v9777_v15 = vld [vmem:[%s10618_s4] ss:$0 sm:$0xff]  ;;  %v7150_v29 = vld [vmem:[%s10615_s1 + $0x2] sm:$0x3]  ;;  %vm760_vm3 = vcmask 261120  }
  0x90   :  { %8469 = vmatprep.subr.bf16.mxu0 %v9507_v0  ;;  %8472 = vmatprep.subr.bf16.mxu1 %v9507_v0  ;;  %v9760_v14 = vpack.c.bf16 %v150_v13, %v149_v12  ;;  %v7154_v30 = vld [vmem:[%s10615_s1 + $0x6] sm:$0x3]  ;;  %v7162_v33 = vld [vmem:[%s10615_s1 + $0xe] sm:$0x3]  ;;  %s7092_s20 = sld [smem:[#allocation7]]  ;;  %vm7097_vm4 = vcmask 253952  }
  0x91   :  { %vm7112_vm5 = vcmask 254977   ;;  %s9512_s15 = smov [#allocation20]   ;;  %vm7105_vm6 = vcmask 516352   ;;  %vm7120_vm7 = vcmask 517377  }
  0x92   :  { %7652 = vmatmul.mubr.msk.f32.vlgmr.msra.gmra.mrb[0].mxu0 %vm161_vm1, %v154_v5  ;;  %7659 = vmatmul.mubr.msk.f32.vlgmr.msra.gmra.mrb[0].mxu1 %vm161_vm1, %v7150_v29  ;;  %s7128_s28 = sshll.u32 %s9512_s15, 4  ;;  %s7129_s28 = int_to_ptr.vmem [resolvable:$true] %s7128_s28 }
  0x93   :  { %8471 = vmatpush3.bf16.msra.mxu0 %v9723_v4  ;;  %7665 = vmatprep.mubr.msk.f32.mxu0 %vm9508_vm0, %v9509_v1  ;;  %p9468_p6 = scmp.lt.s32.totalorder %s7129_s28, %s7129_s28 }
  0x94   :  { %8475 = vmatprep.subr.bf16.mxu0 %v9507_v0  ;;  %8474 = vmatpush3.bf16.msra.mxu1 %v9723_v4 }
  0x95   :  { %7672 = vmatprep.mubr.msk.f32.mxu1 %vm9508_vm0, %v9509_v1  ;;  %8478 = vmatprep.subr.bf16.mxu1 %v9507_v0 }
  0x96   :  { %7666 = vmatmul.mubr.msk.f32.vlgmr.msra.gmra.mrb[2].mxu0 %vm161_vm1, %v7152_v6  ;;  %s7274_s25 = sadd.s32 4294967295, %s7092_s20 }
  0x97   :  { %8477 = vmatpush3.bf16.msra.mxu0 %v9723_v4  ;;  %7679 = vmatprep.mubr.msk.f32.mxu0 %vm9508_vm0, %v9509_v1  ;;  %s7275_s3 = sshll.u32 %s7274_s25, 1 }
  0x98   :  { %8481 = vmatprep.subr.bf16.mxu0 %v9507_v0  ;;  %7673 = vmatmul.mubr.msk.f32.vlgmr.msra.gmra.mrb[2].mxu1 %vm161_vm1, %v7154_v30  ;;  %s7099_s2 = scalar_lea.vmem [#allocation5], %s7275_s3 }
  0x99   :  { %8480 = vmatpush3.bf16.msra.mxu1 %v9723_v4  ;;  %7686 = vmatprep.mubr.msk.f32.mxu1 %vm9508_vm0, %v9509_v1 }
  0x9a   :  { %7680 = vmatmul.mubr.msk.f32.vlgmr.msra.gmra.mrb[4].mxu0 %vm161_vm1, %v7156_v7  ;;  %8484 = vmatprep.subr.bf16.mxu1 %v9507_v0 }
  0x9b   :  { %8483 = vmatpush3.bf16.msra.mxu0 %v9723_v4  ;;  %7693 = vmatprep.mubr.msk.f32.mxu0 %vm9508_vm0, %v9509_v1 }
  0x9c   :  { %8487 = vmatprep.subr.bf16.mxu0 %v9507_v0  ;;  %7687 = vmatmul.mubr.msk.f32.vlgmr.msra.gmra.mrb[4].mxu1 %vm161_vm1, %v7158_v31 }
  0x9d   :  { %8486 = vmatpush3.bf16.msra.mxu1 %v9723_v4  ;;  %7700 = vmatprep.mubr.msk.f32.mxu1 %vm9508_vm0, %v9509_v1 }
  0x9e   :  { %7694 = vmatmul.mubr.msk.f32.vlgmr.msra.gmra.mrb[6].mxu0 %vm161_vm1, %v7160_v10  ;;  %8493 = vmatprep.subr.bf16.mxu1 %v9507_v0 }
  0x9f   :  { %8489 = vmatpush3.bf16.msra.mxu0 %v9755_v11  ;;  %7711 = vmatprep.mubr.msk.f32.mxu0 %vm9508_vm0, %v9509_v1 }
  0xa0   :  { %8490 = vmatprep.subr.bf16.mxu0 %v9507_v0  ;;  %7701 = vmatmul.mubr.msk.f32.vlgmr.msra.gmra.mrb[6].mxu1 %vm161_vm1, %v7162_v33 }
  0xa1   :  { %8495 = vmatpush3.bf16.msra.mxu1 %v9755_v11  ;;  %7722 = vmatprep.mubr.msk.f32.mxu1 %vm9508_vm0, %v9509_v1 }
  0xa2   :  { %8496 = vmatprep.subr.bf16.mxu1 %v9507_v0 }
  0xa3   :  { %8492 = vmatpush3.bf16.msra.mxu0 %v9760_v14 }
  0xa4   :  { %8499 = vmatprep.subr.bf16.mxu0 %v9507_v0 }
  0xa5   :  { %8498 = vmatpush3.bf16.msra.mxu1 %v9760_v14 }
  0xa6   :  { %7712 = vmatmul.mubr.f32.vlgmr.msra.gmra.mrb[0].mxu0 %v9509_v1  ;;  %8505 = vmatprep.subr.bf16.mxu1 %v9507_v0 }
  0xa7   :  { %8501 = vmatpush3.bf16.msra.mxu0 %v9755_v11  ;;  %7733 = vmatprep.mubr.msk.f32.mxu0 %vm9508_vm0, %v9509_v1 }
  0xa8   :  { %8502 = vmatprep.subr.bf16.mxu0 %v9507_v0 }
  0xab   :  { %8504 = vmatpush3.bf16.msra.mxu0 %v9760_v14 }
  0xac   :  { %8511 = vmatprep.subr.bf16.mxu0 %v9507_v0 }
 0x179   :  { %v830_v16 = vpop.f32.mrb[0].mxu0 }
 0x17a   :  { %v8895_v17 = vadd.f32 %v9777_v15, %v830_v16  ;;  %v7713_v18 = vpop.f32.mrb[1].mxu0 }
 0x17c   :  { %9039 = vtanh.f32 %v8895_v17  ;;  %v7164_v20 = vmul.f32 -1.442695, %v8895_v17 }
 0x17e   :  { %9041 = vpow2.f32 %v7164_v20 }
 0x186   :  { %v9040_v19 = vpop.eup %9039 }
 0x187   :  { %844 = vrot.lane.b32.xlu0 %v9040_v19, %s9510_s5 }
 0x188   :  { %v9042_v21 = vpop.eup %9041 }
 0x189   :  { %v838_v22 = vadd.f32 1.0, %v9042_v21 }
 0x18b   :  { %9043 = vrcp.f32 %v838_v22 }
 0x195   :  { %v9044_v23 = vpop.eup %9043 }
 0x196   :  { %v842_v26 = vmul.f32 0.0, %v9044_v23 }
 0x1f9   :  { %v845_v24 = vpop.permute.xlu0 %844 }
 0x1fa   :  { %v847_v25 = vmul.f32 %v9044_v23, %v845_v24 }
 0x1fc   :  { %849 = vrot.lane.b32.xlu0 %v847_v25, %s9511_s21 }
 0x26e   :  { %v850_v27 = vpop.permute.xlu0 %849 }
 0x26f   :  { %v852_v28 = vadd.f32 %v850_v27, %v842_v26 }
 0x271   :  { %9045 = vtanh.f32 %v852_v28 }
 0x27b   :  { %v9046_v32 = vpop.eup %9045 }
 0x27c   :  { %855 = vrot.lane.b32.xlu1 %v9046_v32, %s9510_s5 }
 0x2ee   :  { %v856_v34 = vpop.permute.xlu1 %855 }
 0x2ef   :  { %v858_v35 = vmul.f32 %v9044_v23, %v856_v34 }
 0x2f1   :  { %860 = vrot.lane.b32.xlu1 %v858_v35, %s9511_s21 }
 0x363   :  { %v861_v36 = vpop.permute.xlu1 %860 }
 0x364   :  { %864 = vst.msk [vmem:[#allocation2] sm:$0x3] %vm863_vm2, %v861_v36  ;;  %7723 = vmatmul.mubr.msk.f32.vlgmr.msra.gmra.mrb[0].mxu1 %vm760_vm3, %v861_v36 }
 0x365   :  { %8507 = vmatpush3.bf16.msra.mxu1 %v9755_v11  ;;  %7744 = vmatprep.mubr.msk.f32.mxu1 %vm9508_vm0, %v9509_v1 }
 0x366   :  { %8508 = vmatprep.subr.bf16.mxu1 %v9507_v0 }
 0x369   :  { %8510 = vmatpush3.bf16.msra.mxu1 %v9760_v14 }
 0x36a   :  { %8517 = vmatprep.subr.bf16.mxu1 %v9507_v0 }
 0x437   :  { %v933_v37 = vpop.f32.mrb[0].mxu1 }
 0x438   :  { %v8896_v38 = vadd.f32 %v9777_v15, %v933_v37  ;;  %v7724_v39 = vpop.f32.mrb[1].mxu1 }
 0x43a   :  { %9047 = vtanh.f32 %v8896_v38  ;;  %v7166_v41 = vmul.f32 -1.442695, %v8896_v38 }
 0x43c   :  { %9049 = vpow2.f32 %v7166_v41 }
 0x444   :  { %v9048_v40 = vpop.eup %9047 }
 0x445   :  { %947 = vrot.lane.b32.xlu0 %v9048_v40, %s9510_s5 }
 0x446   :  { %v9050_v42 = vpop.eup %9049 }
 0x447   :  { %v941_v43 = vadd.f32 1.0, %v9050_v42 }
 0x449   :  { %9051 = vrcp.f32 %v941_v43 }
 0x453   :  { %v9052_v44 = vpop.eup %9051 }
 0x454   :  { %v945_v47 = vmul.f32 %v9052_v44, %v852_v28 }
 0x4b7   :  { %v948_v45 = vpop.permute.xlu0 %947 }
 0x4b8   :  { %v950_v46 = vmul.f32 %v9052_v44, %v948_v45 }
 0x4ba   :  { %952 = vrot.lane.b32.xlu1 %v950_v46, %s9511_s21 }
 0x52c   :  { %v953_v48 = vpop.permute.xlu1 %952 }
 0x52d   :  { %v955_v49 = vadd.f32 %v953_v48, %v945_v47 }
 0x52f   :  { %9053 = vtanh.f32 %v955_v49 }
 0x539   :  { %v9054_v50 = vpop.eup %9053 }
 0x53a   :  { %958 = vrot.lane.b32.xlu0 %v9054_v50, %s9510_s5 }
 0x5ac   :  { %v959_v51 = vpop.permute.xlu0 %958 }
 0x5ad   :  { %v961_v52 = vmul.f32 %v9052_v44, %v959_v51 }
 0x5af   :  { %963 = vrot.lane.b32.xlu1 %v961_v52, %s9511_s21 }
 0x621   :  { %v964_v53 = vpop.permute.xlu1 %963 }
 0x622   :  { %967 = vst.msk [vmem:[#allocation2 + $0x2] sm:$0x3] %vm863_vm2, %v964_v53  ;;  %7734 = vmatmul.mubr.msk.f32.vlgmr.msra.gmra.mrb[2].mxu0 %vm760_vm3, %v964_v53 }
 0x623   :  { %8513 = vmatpush3.bf16.msra.mxu0 %v9755_v11  ;;  %7755 = vmatprep.mubr.msk.f32.mxu0 %vm9508_vm0, %v9509_v1 }
 0x624   :  { %8514 = vmatprep.subr.bf16.mxu0 %v9507_v0 }
 0x627   :  { %8516 = vmatpush3.bf16.msra.mxu0 %v9760_v14 }
 0x628   :  { %8523 = vmatprep.subr.bf16.mxu0 %v9507_v0 }
 0x6f5   :  { %v1036_v54 = vpop.f32.mrb[2].mxu0 }
 0x6f6   :  { %v8897_v55 = vadd.f32 %v9777_v15, %v1036_v54  ;;  %v7735_v56 = vpop.f32.mrb[3].mxu0 }
 0x6f8   :  { %9055 = vtanh.f32 %v8897_v55  ;;  %v7168_v58 = vmul.f32 -1.442695, %v8897_v55 }
 0x6fa   :  { %9057 = vpow2.f32 %v7168_v58 }
 0x702   :  { %v9056_v57 = vpop.eup %9055 }
 0x703   :  { %1050 = vrot.lane.b32.xlu0 %v9056_v57, %s9510_s5 }
 0x704   :  { %v9058_v59 = vpop.eup %9057 }
 0x705   :  { %v1044_v60 = vadd.f32 1.0, %v9058_v59 }
 0x707   :  { %9059 = vrcp.f32 %v1044_v60 }
 0x711   :  { %v9060_v61 = vpop.eup %9059 }
 0x712   :  { %v1048_v2 = vmul.f32 %v9060_v61, %v955_v49 }
 0x775   :  { %v1051_v62 = vpop.permute.xlu0 %1050 }
 0x776   :  { %v1053_v63 = vmul.f32 %v9060_v61, %v1051_v62 }
 0x778   :  { %1055 = vrot.lane.b32.xlu1 %v1053_v63, %s9511_s21 }
 0x7ea   :  { %v1056_v3 = vpop.permute.xlu1 %1055 }
 0x7eb   :  { %v1058_v4 = vadd.f32 %v1056_v3, %v1048_v2 }
 0x7ed   :  { %9061 = vtanh.f32 %v1058_v4 }
 0x7f7   :  { %v9062_v5 = vpop.eup %9061 }
 0x7f8   :  { %1061 = vrot.lane.b32.xlu0 %v9062_v5, %s9510_s5 }
 0x86a   :  { %v1062_v6 = vpop.permute.xlu0 %1061 }
 0x86b   :  { %v1064_v7 = vmul.f32 %v9060_v61, %v1062_v6 }
 0x86d   :  { %1066 = vrot.lane.b32.xlu1 %v1064_v7, %s9511_s21 }
 0x8df   :  { %v1067_v8 = vpop.permute.xlu1 %1066 }
 0x8e0   :  { %1070 = vst.msk [vmem:[#allocation2 + $0x4] sm:$0x3] %vm863_vm2, %v1067_v8  ;;  %7745 = vmatmul.mubr.msk.f32.vlgmr.msra.gmra.mrb[2].mxu1 %vm760_vm3, %v1067_v8 }
 0x8e1   :  { %8519 = vmatpush3.bf16.msra.mxu1 %v9755_v11  ;;  %7766 = vmatprep.mubr.msk.f32.mxu1 %vm9508_vm0, %v9509_v1 }
 0x8e2   :  { %8520 = vmatprep.subr.bf16.mxu1 %v9507_v0 }
 0x8e5   :  { %8522 = vmatpush3.bf16.msra.mxu1 %v9760_v14 }
 0x8e6   :  { %8529 = vmatprep.subr.bf16.mxu1 %v9507_v0 }
 0x9b3   :  { %v1139_v9 = vpop.f32.mrb[2].mxu1 }
 0x9b4   :  { %v8898_v10 = vadd.f32 %v9777_v15, %v1139_v9  ;;  %v7746_v12 = vpop.f32.mrb[3].mxu1 }
 0x9b6   :  { %9063 = vtanh.f32 %v8898_v10  ;;  %v7170_v16 = vmul.f32 -1.442695, %v8898_v10 }
 0x9b8   :  { %9065 = vpow2.f32 %v7170_v16  ;;  %v1592_v16 = vld [vmem:[#allocation13 + $0x8] sm:$0xff] }
 0x9c0   :  { %v9064_v13 = vpop.eup %9063 }
 0x9c1   :  { %1153 = vrot.lane.b32.xlu0 %v9064_v13, %s9510_s5  ;;  %v1591_v13 = vld [vmem:[#allocation13] sm:$0xff] }
 0x9c2   :  { %v9066_v17 = vpop.eup %9065 }
 0x9c3   :  { %v1147_v18 = vadd.f32 1.0, %v9066_v17  ;;  %v9894_v17 = vpack.c.bf16 %v1592_v16, %v1591_v13 }
 0x9c5   :  { %9067 = vrcp.f32 %v1147_v18 }
 0x9cf   :  { %v9068_v19 = vpop.eup %9067 }
 0x9d0   :  { %v1151_v22 = vmul.f32 %v9068_v19, %v1058_v4 }
 0xa33   :  { %v1154_v20 = vpop.permute.xlu0 %1153 }
 0xa34   :  { %v1156_v21 = vmul.f32 %v9068_v19, %v1154_v20 }
 0xa36   :  { %1158 = vrot.lane.b32.xlu1 %v1156_v21, %s9511_s21  ;;  %v7181_v21 = vld [vmem:[%s10615_s1 + $0x2] sm:$0x3] }
 0xaa8   :  { %v1159_v23 = vpop.permute.xlu1 %1158 }
 0xaa9   :  { %v1161_v24 = vadd.f32 %v1159_v23, %v1151_v22  ;;  %v7185_v22 = vld [vmem:[%s10615_s1 + $0x6] sm:$0x3]  ;;  %v7189_v23 = vld [vmem:[%s10615_s1 + $0xa] sm:$0x3] }
 0xaab   :  { %9069 = vtanh.f32 %v1161_v24 }
 0xab5   :  { %v9070_v25 = vpop.eup %9069 }
 0xab6   :  { %1164 = vrot.lane.b32.xlu0 %v9070_v25, %s9510_s5  ;;  %v1587_v25 = vld [vmem:[#allocation14 + $0x8] sm:$0xff] }
 0xb28   :  { %v1165_v26 = vpop.permute.xlu0 %1164 }
 0xb29   :  { %v1167_v27 = vmul.f32 %v9068_v19, %v1165_v26  ;;  %v7193_v26 = vld [vmem:[%s10615_s1 + $0xe] sm:$0x3] }
 0xb2b   :  { %1169 = vrot.lane.b32.xlu1 %v1167_v27, %s9511_s21 }
 0xb9d   :  { %v1170_v28 = vpop.permute.xlu1 %1169 }
 0xb9e   :  { %1173 = vst.msk [vmem:[#allocation2 + $0x6] sm:$0x3] %vm863_vm2, %v1170_v28  ;;  %7756 = vmatmul.mubr.msk.f32.vlgmr.msra.gmra.mrb[4].mxu0 %vm760_vm3, %v1170_v28  ;;  %v1588_v28 = vld [vmem:[#allocation14 + $0x10] sm:$0xff] }
 0xb9f   :  { %8525 = vmatpush3.bf16.msra.mxu0 %v9755_v11  ;;  %7777 = vmatprep.mubr.msk.f32.mxu0 %vm9508_vm0, %v9509_v1 }
 0xba0   :  { %8526 = vmatprep.subr.bf16.mxu0 %v9507_v0 }
 0xba3   :  { %8528 = vmatpush3.bf16.msra.mxu0 %v9760_v14 }
 0xba4   :  { %8535 = vmatprep.subr.bf16.mxu0 %v9507_v0 }
 0xc71   :  { %v1242_v29 = vpop.f32.mrb[4].mxu0 }
 0xc72   :  { %v8899_v30 = vadd.f32 %v9777_v15, %v1242_v29  ;;  %v7757_v31 = vpop.f32.mrb[5].mxu0  ;;  %v1589_v29 = vld [vmem:[#allocation14 + $0x18] sm:$0xff] }
 0xc74   :  { %9071 = vtanh.f32 %v8899_v30  ;;  %v7172_v33 = vmul.f32 -1.442695, %v8899_v30  ;;  %v9936_v30 = vpack.c.bf16 %v1589_v29, %v1588_v28 }
 0xc76   :  { %9073 = vpow2.f32 %v7172_v33  ;;  %v9955_v33 = vld [vmem:[%s10621_s7] ss:$0 sm:$0xff] }
 0xc7e   :  { %v9072_v32 = vpop.eup %9071 }
 0xc7f   :  { %1256 = vrot.lane.b32.xlu0 %v9072_v32, %s9510_s5 }
 0xc80   :  { %v9074_v34 = vpop.eup %9073 }
 0xc81   :  { %v1250_v35 = vadd.f32 1.0, %v9074_v34 }
 0xc83   :  { %9075 = vrcp.f32 %v1250_v35 }
 0xc8d   :  { %v9076_v36 = vpop.eup %9075 }
 0xc8e   :  { %v1254_v39 = vmul.f32 %v9076_v36, %v1161_v24  ;;  %v1586_v24 = vld [vmem:[#allocation14] sm:$0xff] }
 0xc8f   :  { %v9931_v27 = vpack.c.bf16 %v1587_v25, %v1586_v24 }
 0xcf1   :  { %v1257_v37 = vpop.permute.xlu0 %1256 }
 0xcf2   :  { %v1259_v38 = vmul.f32 %v9076_v36, %v1257_v37 }
 0xcf4   :  { %1261 = vrot.lane.b32.xlu1 %v1259_v38, %s9511_s21 }
 0xd66   :  { %v1262_v40 = vpop.permute.xlu1 %1261 }
 0xd67   :  { %v1264_v41 = vadd.f32 %v1262_v40, %v1254_v39 }
 0xd69   :  { %9077 = vtanh.f32 %v1264_v41 }
 0xd73   :  { %v9078_v42 = vpop.eup %9077 }
 0xd74   :  { %1267 = vrot.lane.b32.xlu0 %v9078_v42, %s9510_s5 }
 0xde6   :  { %v1268_v43 = vpop.permute.xlu0 %1267 }
 0xde7   :  { %v1270_v44 = vmul.f32 %v9076_v36, %v1268_v43 }
 0xde9   :  { %1272 = vrot.lane.b32.xlu1 %v1270_v44, %s9511_s21 }
 0xe5b   :  { %v1273_v45 = vpop.permute.xlu1 %1272 }
 0xe5c   :  { %1276 = vst.msk [vmem:[#allocation2 + $0x8] sm:$0x3] %vm863_vm2, %v1273_v45  ;;  %7767 = vmatmul.mubr.msk.f32.vlgmr.msra.gmra.mrb[4].mxu1 %vm760_vm3, %v1273_v45 }
 0xe5d   :  { %8531 = vmatpush3.bf16.msra.mxu1 %v9755_v11  ;;  %7788 = vmatprep.mubr.msk.f32.mxu1 %vm9508_vm0, %v9509_v1 }
 0xe5e   :  { %8532 = vmatprep.subr.bf16.mxu1 %v9507_v0 }
 0xe61   :  { %8534 = vmatpush3.bf16.msra.mxu1 %v9760_v14 }
 0xe62   :  { %8538 = vmatprep.subr.bf16.mxu1 %v9507_v0 }
 0xf2f   :  { %v1345_v46 = vpop.f32.mrb[4].mxu1 }
 0xf30   :  { %v8900_v47 = vadd.f32 %v9777_v15, %v1345_v46  ;;  %v7768_v48 = vpop.f32.mrb[5].mxu1 }
 0xf31   :  { %v7183_v48 = vld [vmem:[%s10615_s1 + $0x4] sm:$0x3] }
 0xf32   :  { %9079 = vtanh.f32 %v8900_v47  ;;  %v7174_v50 = vmul.f32 -1.442695, %v8900_v47  ;;  %v1593_v47 = vld [vmem:[%s10615_s1] sm:$0x3] }
 0xf34   :  { %9081 = vpow2.f32 %v7174_v50 }
 0xf3c   :  { %v9080_v49 = vpop.eup %9079 }
 0xf3d   :  { %1359 = vrot.lane.b32.xlu0 %v9080_v49, %s9510_s5  ;;  %v7187_v49 = vld [vmem:[%s10615_s1 + $0x8] sm:$0x3] }
 0xf3e   :  { %v9082_v11 = vpop.eup %9081 }
 0xf3f   :  { %v1353_v51 = vadd.f32 1.0, %v9082_v11  ;;  %v7191_v11 = vld [vmem:[%s10615_s1 + $0xc] sm:$0x3] }
 0xf41   :  { %9083 = vrcp.f32 %v1353_v51 }
 0xf4b   :  { %v9084_v52 = vpop.eup %9083 }
 0xf4c   :  { %v1357_v14 = vmul.f32 %v9084_v52, %v1264_v41 }
 0xfaf   :  { %v1360_v53 = vpop.permute.xlu0 %1359 }
 0xfb0   :  { %v1362_v54 = vmul.f32 %v9084_v52, %v1360_v53 }
 0xfb2   :  { %1364 = vrot.lane.b32.xlu1 %v1362_v54, %s9511_s21 }
0x1024   :  { %v1365_v55 = vpop.permute.xlu1 %1364 }
0x1025   :  { %v1367_v56 = vadd.f32 %v1365_v55, %v1357_v14 }
0x1027   :  { %9085 = vtanh.f32 %v1367_v56 }
0x1031   :  { %v9086_v57 = vpop.eup %9085 }
0x1032   :  { %1370 = vrot.lane.b32.xlu0 %v9086_v57, %s9510_s5 }
0x10a4   :  { %v1371_v58 = vpop.permute.xlu0 %1370 }
0x10a5   :  { %v1373_v59 = vmul.f32 %v9084_v52, %v1371_v58 }
0x10a7   :  { %1375 = vrot.lane.b32.xlu1 %v1373_v59, %s9511_s21 }
0x1119   :  { %v1376_v60 = vpop.permute.xlu1 %1375 }
0x111a   :  { %1379 = vst.msk [vmem:[#allocation2 + $0xa] sm:$0x3] %vm863_vm2, %v1376_v60  ;;  %7778 = vmatmul.mubr.msk.f32.vlgmr.msra.gmra.mrb[6].mxu0 %vm760_vm3, %v1376_v60 }
0x111b   :  { %7795 = vmatprep.mubr.msk.f32.mxu0 %vm9508_vm0, %v9509_v1  ;;  %8537 = vmatpush3.bf16.msra.mxu0 %v9894_v17 }
0x111c   :  { %8541 = vmatprep.subr.bf16.mxu0 %v9507_v0 }
0x111e   :  { %7796 = vmatmul.mubr.msk.f32.vlgmr.msra.gmra.mrb[8].mxu0 %vm161_vm1, %v1593_v47 }
0x111f   :  { %8543 = vmatpush3.bf16.msra.mxu0 %v9894_v17  ;;  %7809 = vmatprep.mubr.msk.f32.mxu0 %vm9508_vm0, %v9509_v1 }
0x1120   :  { %8547 = vmatprep.subr.bf16.mxu0 %v9507_v0 }
0x1122   :  { %7810 = vmatmul.mubr.msk.f32.vlgmr.msra.gmra.mrb[10].mxu0 %vm161_vm1, %v7183_v48 }
0x1123   :  { %8549 = vmatpush3.bf16.msra.mxu0 %v9894_v17  ;;  %7823 = vmatprep.mubr.msk.f32.mxu0 %vm9508_vm0, %v9509_v1 }
0x1124   :  { %8553 = vmatprep.subr.bf16.mxu0 %v9507_v0 }
0x1126   :  { %7824 = vmatmul.mubr.msk.f32.vlgmr.msra.gmra.mrb[12].mxu0 %vm161_vm1, %v7187_v49 }
0x1127   :  { %8555 = vmatpush3.bf16.msra.mxu0 %v9894_v17  ;;  %7837 = vmatprep.mubr.msk.f32.mxu0 %vm9508_vm0, %v9509_v1 }
0x1128   :  { %8565 = vmatprep.subr.bf16.mxu0 %v9507_v0 }
0x112a   :  { %7838 = vmatmul.mubr.msk.f32.vlgmr.msra.gmra.mrb[14].mxu0 %vm161_vm1, %v7191_v11 }
0x112b   :  { %8567 = vmatpush3.bf16.msra.mxu0 %v9931_v27  ;;  %7866 = vmatprep.mubr.msk.f32.mxu0 %vm9508_vm0, %v9509_v1 }
0x112c   :  { %8568 = vmatprep.subr.bf16.mxu0 %v9507_v0 }
0x112f   :  { %8570 = vmatpush3.bf16.msra.mxu0 %v9936_v30 }
0x1130   :  { %8577 = vmatprep.subr.bf16.mxu0 %v9507_v0 }
0x11ed   :  { %v1448_v61 = vpop.f32.mrb[6].mxu0 }
0x11ee   :  { %v8901_v62 = vadd.f32 %v9777_v15, %v1448_v61  ;;  %v7779_v63 = vpop.f32.mrb[7].mxu0 }
0x11f0   :  { %9087 = vtanh.f32 %v8901_v62  ;;  %v7176_v3 = vmul.f32 -1.442695, %v8901_v62 }
0x11f2   :  { %9089 = vpow2.f32 %v7176_v3 }
0x11fa   :  { %v9088_v2 = vpop.eup %9087 }
0x11fb   :  { %1462 = vrot.lane.b32.xlu0 %v9088_v2, %s9510_s5 }
0x11fc   :  { %v9090_v4 = vpop.eup %9089 }
0x11fd   :  { %v1456_v5 = vadd.f32 1.0, %v9090_v4 }
0x11ff   :  { %9091 = vrcp.f32 %v1456_v5 }
0x1209   :  { %v9092_v6 = vpop.eup %9091 }
0x120a   :  { %v1460_v9 = vmul.f32 %v9092_v6, %v1367_v56 }
0x126d   :  { %v1463_v7 = vpop.permute.xlu0 %1462 }
0x126e   :  { %v1465_v8 = vmul.f32 %v9092_v6, %v1463_v7 }
0x1270   :  { %1467 = vrot.lane.b32.xlu1 %v1465_v8, %s9511_s21 }
0x12e2   :  { %v1468_v10 = vpop.permute.xlu1 %1467 }
0x12e3   :  { %v9890_v12 = vadd.f32 %v1468_v10, %v1460_v9 }
0x12e5   :  { %9093 = vtanh.f32 %v9890_v12 }
0x12ef   :  { %v9094_v15 = vpop.eup %9093 }
0x12f0   :  { %1473 = vrot.lane.b32.xlu0 %v9094_v15, %s9510_s5 }
0x1362   :  { %v1474_v18 = vpop.permute.xlu0 %1473 }
0x1363   :  { %v1476_v19 = vmul.f32 %v9092_v6, %v1474_v18 }
0x1365   :  { %1478 = vrot.lane.b32.xlu1 %v1476_v19, %s9511_s21 }
0x13d7   :  { %v1479_v20 = vpop.permute.xlu1 %1478 }
0x13d8   :  { %1482 = vst.msk [vmem:[#allocation2 + $0xc] sm:$0x3] %vm863_vm2, %v1479_v20  ;;  %7789 = vmatmul.mubr.msk.f32.vlgmr.msra.gmra.mrb[6].mxu1 %vm760_vm3, %v1479_v20 }
0x13d9   :  { %8540 = vmatpush3.bf16.msra.mxu1 %v9894_v17  ;;  %7802 = vmatprep.mubr.msk.f32.mxu1 %vm9508_vm0, %v9509_v1 }
0x13da   :  { %8544 = vmatprep.subr.bf16.mxu1 %v9507_v0 }
0x13dc   :  { %7803 = vmatmul.mubr.msk.f32.vlgmr.msra.gmra.mrb[8].mxu1 %vm161_vm1, %v7181_v21 }
0x13dd   :  { %8546 = vmatpush3.bf16.msra.mxu1 %v9894_v17  ;;  %7816 = vmatprep.mubr.msk.f32.mxu1 %vm9508_vm0, %v9509_v1 }
0x13de   :  { %8550 = vmatprep.subr.bf16.mxu1 %v9507_v0 }
0x13e0   :  { %7817 = vmatmul.mubr.msk.f32.vlgmr.msra.gmra.mrb[10].mxu1 %vm161_vm1, %v7185_v22 }
0x13e1   :  { %8552 = vmatpush3.bf16.msra.mxu1 %v9894_v17  ;;  %7830 = vmatprep.mubr.msk.f32.mxu1 %vm9508_vm0, %v9509_v1 }
0x13e2   :  { %8556 = vmatprep.subr.bf16.mxu1 %v9507_v0 }
0x13e4   :  { %7831 = vmatmul.mubr.msk.f32.vlgmr.msra.gmra.mrb[12].mxu1 %vm161_vm1, %v7189_v23 }
0x13e5   :  { %8558 = vmatpush3.bf16.msra.mxu1 %v9894_v17  ;;  %7844 = vmatprep.mubr.msk.f32.mxu1 %vm9508_vm0, %v9509_v1 }
0x13e6   :  { %8559 = vmatprep.subr.bf16.mxu1 %v9507_v0 }
0x13e8   :  { %7845 = vmatmul.mubr.msk.f32.vlgmr.msra.gmra.mrb[14].mxu1 %vm161_vm1, %v7193_v26 }
0x13e9   :  { %8561 = vmatpush3.bf16.msra.mxu1 %v9931_v27  ;;  %7855 = vmatprep.mubr.msk.f32.mxu1 %vm9508_vm0, %v9509_v1 }
0x13ea   :  { %8562 = vmatprep.subr.bf16.mxu1 %v9507_v0 }
0x13ed   :  { %8564 = vmatpush3.bf16.msra.mxu1 %v9936_v30 }
0x13ee   :  { %8571 = vmatprep.subr.bf16.mxu1 %v9507_v0 }
0x13f0   :  { %7856 = vmatmul.mubr.f32.vlgmr.msra.gmra.mrb[14].mxu1 %v9509_v1 }
0x13f1   :  { %8573 = vmatpush3.bf16.msra.mxu1 %v9931_v27  ;;  %7877 = vmatprep.mubr.msk.f32.mxu1 %vm9508_vm0, %v9509_v1 }
0x13f2   :  { %8574 = vmatprep.subr.bf16.mxu1 %v9507_v0 }
0x13f5   :  { %8576 = vmatpush3.bf16.msra.mxu1 %v9936_v30 }
0x13f6   :  { %8583 = vmatprep.subr.bf16.mxu1 %v9507_v0 }
0x14ab   :  { %v9950_v31 = vpop.f32.mrb[6].mxu1 }
0x14ac   :  { %v7790_v32 = vpop.f32.mrb[7].mxu1 }
0x14c3   :  { %v2257_v34 = vpop.f32.mrb[14].mxu1 }
0x14c4   :  { %v8910_v35 = vadd.f32 %v9955_v33, %v2257_v34  ;;  %v7857_v36 = vpop.f32.mrb[15].mxu1 }
0x14c6   :  { %9095 = vtanh.f32 %v8910_v35  ;;  %v7195_v38 = vmul.f32 -1.442695, %v8910_v35 }
0x14c8   :  { %9097 = vpow2.f32 %v7195_v38 }
0x14d0   :  { %v9096_v37 = vpop.eup %9095 }
0x14d1   :  { %2271 = vrot.lane.b32.xlu0 %v9096_v37, %s9510_s5 }
0x14d2   :  { %v9098_v39 = vpop.eup %9097 }
0x14d3   :  { %v2265_v40 = vadd.f32 1.0, %v9098_v39 }
0x14d5   :  { %9099 = vrcp.f32 %v2265_v40 }
0x14df   :  { %v9100_v41 = vpop.eup %9099 }
0x14e0   :  { %v2269_v44 = vmul.f32 0.0, %v9100_v41 }
0x1543   :  { %v2272_v42 = vpop.permute.xlu0 %2271 }
0x1544   :  { %v2274_v43 = vmul.f32 %v9100_v41, %v2272_v42 }
0x1546   :  { %2276 = vrot.lane.b32.xlu1 %v2274_v43, %s9511_s21 }
0x15b8   :  { %v2277_v45 = vpop.permute.xlu1 %2276 }
0x15b9   :  { %v2279_v46 = vadd.f32 %v2277_v45, %v2269_v44 }
0x15bb   :  { %9101 = vtanh.f32 %v2279_v46 }
0x15c5   :  { %v9102_v50 = vpop.eup %9101 }
0x15c6   :  { %2282 = vrot.lane.b32.xlu0 %v9102_v50, %s9510_s5 }
0x1638   :  { %v2283_v51 = vpop.permute.xlu0 %2282 }
0x1639   :  { %v2285_v52 = vmul.f32 %v9100_v41, %v2283_v51 }
0x163b   :  { %2287 = vrot.lane.b32.xlu1 %v2285_v52, %s9511_s21 }
0x16ad   :  { %v2288_v53 = vpop.permute.xlu1 %2287 }
0x16ae   :  { %2291 = vst.msk [vmem:[#allocation3 + $0xe] sm:$0x3] %vm863_vm2, %v2288_v53  ;;  %7867 = vmatmul.mubr.msk.f32.vlgmr.msra.gmra.mrb[14].mxu0 %vm760_vm3, %v2288_v53 }
0x16af   :  { %8579 = vmatpush3.bf16.msra.mxu0 %v9931_v27  ;;  %7888 = vmatprep.mubr.msk.f32.mxu0 %vm9508_vm0, %v9509_v1 }
0x16b0   :  { %8580 = vmatprep.subr.bf16.mxu0 %v9507_v0 }
0x16b3   :  { %8582 = vmatpush3.bf16.msra.mxu0 %v9936_v30 }
0x16b4   :  { %8589 = vmatprep.subr.bf16.mxu0 %v9507_v0 }
0x1781   :  { %v2360_v54 = vpop.f32.mrb[14].mxu0 }
0x1782   :  { %v8909_v14 = vadd.f32 %v9955_v33, %v2360_v54  ;;  %v7868_v55 = vpop.f32.mrb[15].mxu0 }
0x1784   :  { %9103 = vtanh.f32 %v8909_v14  ;;  %v7197_v57 = vmul.f32 -1.442695, %v8909_v14 }
0x1786   :  { %9105 = vpow2.f32 %v7197_v57 }
0x178e   :  { %v9104_v56 = vpop.eup %9103 }
0x178f   :  { %2374 = vrot.lane.b32.xlu0 %v9104_v56, %s9510_s5 }
0x1790   :  { %v9106_v58 = vpop.eup %9105 }
0x1791   :  { %v2368_v59 = vadd.f32 1.0, %v9106_v58 }
0x1793   :  { %9107 = vrcp.f32 %v2368_v59 }
0x179d   :  { %v9108_v60 = vpop.eup %9107 }
0x179e   :  { %v2372_v63 = vmul.f32 %v9108_v60, %v2279_v46 }
0x1801   :  { %v2375_v61 = vpop.permute.xlu0 %2374 }
0x1802   :  { %v2377_v62 = vmul.f32 %v9108_v60, %v2375_v61 }
0x1804   :  { %2379 = vrot.lane.b32.xlu1 %v2377_v62, %s9511_s21 }
0x1876   :  { %v2380_v2 = vpop.permute.xlu1 %2379 }
0x1877   :  { %v2382_v3 = vadd.f32 %v2380_v2, %v2372_v63 }
0x1879   :  { %9109 = vtanh.f32 %v2382_v3 }
0x1883   :  { %v9110_v4 = vpop.eup %9109 }
0x1884   :  { %2385 = vrot.lane.b32.xlu0 %v9110_v4, %s9510_s5 }
0x18f6   :  { %v2386_v5 = vpop.permute.xlu0 %2385 }
0x18f7   :  { %v2388_v6 = vmul.f32 %v9108_v60, %v2386_v5 }
0x18f9   :  { %2390 = vrot.lane.b32.xlu1 %v2388_v6, %s9511_s21 }
0x196b   :  { %v2391_v7 = vpop.permute.xlu1 %2390 }
0x196c   :  { %2394 = vst.msk [vmem:[#allocation3 + $0xc] sm:$0x3] %vm863_vm2, %v2391_v7  ;;  %7878 = vmatmul.mubr.msk.f32.vlgmr.msra.gmra.mrb[12].mxu1 %vm760_vm3, %v2391_v7 }
0x196d   :  { %8585 = vmatpush3.bf16.msra.mxu1 %v9931_v27  ;;  %7899 = vmatprep.mubr.msk.f32.mxu1 %vm9508_vm0, %v9509_v1 }
0x196e   :  { %8586 = vmatprep.subr.bf16.mxu1 %v9507_v0 }
0x1971   :  { %8588 = vmatpush3.bf16.msra.mxu1 %v9936_v30 }
0x1972   :  { %8595 = vmatprep.subr.bf16.mxu1 %v9507_v0 }
0x1a3f   :  { %v2463_v8 = vpop.f32.mrb[12].mxu1 }
0x1a40   :  { %v8908_v9 = vadd.f32 %v9955_v33, %v2463_v8  ;;  %v7879_v10 = vpop.f32.mrb[13].mxu1 }
0x1a42   :  { %9111 = vtanh.f32 %v8908_v9  ;;  %v7199_v13 = vmul.f32 -1.442695, %v8908_v9 }
0x1a44   :  { %9113 = vpow2.f32 %v7199_v13 }
0x1a4c   :  { %v9112_v15 = vpop.eup %9111 }
0x1a4d   :  { %2477 = vrot.lane.b32.xlu0 %v9112_v15, %s9510_s5 }
0x1a4e   :  { %v9114_v16 = vpop.eup %9113 }
0x1a4f   :  { %v2471_v17 = vadd.f32 1.0, %v9114_v16 }
0x1a51   :  { %9115 = vrcp.f32 %v2471_v17 }
0x1a5b   :  { %v9116_v18 = vpop.eup %9115 }
0x1a5c   :  { %v2475_v21 = vmul.f32 %v9116_v18, %v2382_v3 }
0x1abf   :  { %v2478_v19 = vpop.permute.xlu0 %2477 }
0x1ac0   :  { %v2480_v20 = vmul.f32 %v9116_v18, %v2478_v19  ;;  %v3017_v19 = vld [vmem:[#allocation16] sm:$0xff] }
0x1ac2   :  { %2482 = vrot.lane.b32.xlu1 %v2480_v20, %s9511_s21  ;;  %v3018_v20 = vld [vmem:[#allocation16 + $0x8] sm:$0xff] }
0x1b34   :  { %v2483_v22 = vpop.permute.xlu1 %2482 }
0x1b35   :  { %v2485_v23 = vadd.f32 %v2483_v22, %v2475_v21  ;;  %v10061_v21 = vpack.c.bf16 %v3018_v20, %v3017_v19  ;;  %v3019_v22 = vld [vmem:[#allocation16 + $0x10] sm:$0xff] }
0x1b37   :  { %9117 = vtanh.f32 %v2485_v23 }
0x1b41   :  { %v9118_v24 = vpop.eup %9117 }
0x1b42   :  { %2488 = vrot.lane.b32.xlu0 %v9118_v24, %s9510_s5 }
0x1bb4   :  { %v2489_v25 = vpop.permute.xlu0 %2488 }
0x1bb5   :  { %v2491_v26 = vmul.f32 %v9116_v18, %v2489_v25 }
0x1bb7   :  { %2493 = vrot.lane.b32.xlu1 %v2491_v26, %s9511_s21  ;;  %v3181_v26 = vld [vmem:[#allocation2 + $0x2] sm:$0x3] }
0x1c29   :  { %v2494_v28 = vpop.permute.xlu1 %2493 }
0x1c2a   :  { %2497 = vst.msk [vmem:[#allocation3 + $0xa] sm:$0x3] %vm863_vm2, %v2494_v28  ;;  %7889 = vmatmul.mubr.msk.f32.vlgmr.msra.gmra.mrb[12].mxu0 %vm760_vm3, %v2494_v28 }
0x1c2b   :  { %8591 = vmatpush3.bf16.msra.mxu0 %v9931_v27  ;;  %7910 = vmatprep.mubr.msk.f32.mxu0 %vm9508_vm0, %v9509_v1 }
0x1c2c   :  { %8592 = vmatprep.subr.bf16.mxu0 %v9507_v0 }
0x1c2f   :  { %8594 = vmatpush3.bf16.msra.mxu0 %v9936_v30 }
0x1c30   :  { %8601 = vmatprep.subr.bf16.mxu0 %v9507_v0 }
0x1cfd   :  { %v2566_v29 = vpop.f32.mrb[12].mxu0 }
0x1cfe   :  { %v8907_v32 = vadd.f32 %v9955_v33, %v2566_v29  ;;  %v7890_v34 = vpop.f32.mrb[13].mxu0 }
0x1d00   :  { %9119 = vtanh.f32 %v8907_v32  ;;  %v7201_v36 = vmul.f32 -1.442695, %v8907_v32 }
0x1d02   :  { %9121 = vpow2.f32 %v7201_v36 }
0x1d0a   :  { %v9120_v35 = vpop.eup %9119 }
0x1d0b   :  { %2580 = vrot.lane.b32.xlu0 %v9120_v35, %s9510_s5 }
0x1d0c   :  { %v9122_v37 = vpop.eup %9121 }
0x1d0d   :  { %v2574_v38 = vadd.f32 1.0, %v9122_v37 }
0x1d0f   :  { %9123 = vrcp.f32 %v2574_v38 }
0x1d19   :  { %v9124_v39 = vpop.eup %9123 }
0x1d1a   :  { %v2578_v42 = vmul.f32 %v9124_v39, %v2485_v23  ;;  %v3020_v23 = vld [vmem:[#allocation16 + $0x18] sm:$0xff] }
0x1d1b   :  { %v10066_v25 = vpack.c.bf16 %v3020_v23, %v3019_v22 }
0x1d7d   :  { %v2581_v40 = vpop.permute.xlu0 %2580 }
0x1d7e   :  { %v2583_v41 = vmul.f32 %v9124_v39, %v2581_v40 }
0x1d80   :  { %2585 = vrot.lane.b32.xlu1 %v2583_v41, %s9511_s21 }
0x1df2   :  { %v2586_v43 = vpop.permute.xlu1 %2585 }
0x1df3   :  { %v2588_v44 = vadd.f32 %v2586_v43, %v2578_v42 }
0x1df5   :  { %9125 = vtanh.f32 %v2588_v44 }
0x1dff   :  { %v9126_v45 = vpop.eup %9125 }
0x1e00   :  { %2591 = vrot.lane.b32.xlu0 %v9126_v45, %s9510_s5  ;;  %v3021_v45 = vld [vmem:[#allocation16 + $0x20] sm:$0xff] }
0x1e72   :  { %v2592_v46 = vpop.permute.xlu0 %2591 }
0x1e73   :  { %v2594_v47 = vmul.f32 %v9124_v39, %v2592_v46  ;;  %v3022_v46 = vld [vmem:[#allocation16 + $0x28] sm:$0xff] }
0x1e75   :  { %2596 = vrot.lane.b32.xlu1 %v2594_v47, %s9511_s21  ;;  %v10083_v47 = vpack.c.bf16 %v3022_v46, %v3021_v45  ;;  %v4156_v45 = vld [vmem:[#allocation3 + $0xe] sm:$0x3]  ;;  %v10241_v46 = vld [vmem:[%s10624_s10] ss:$0 sm:$0xff] }
0x1ee7   :  { %v2597_v48 = vpop.permute.xlu1 %2596 }
0x1ee8   :  { %2600 = vst.msk [vmem:[#allocation3 + $0x8] sm:$0x3] %vm863_vm2, %v2597_v48  ;;  %7900 = vmatmul.mubr.msk.f32.vlgmr.msra.gmra.mrb[10].mxu1 %vm760_vm3, %v2597_v48  ;;  %v3023_v48 = vld [vmem:[#allocation16 + $0x30] sm:$0xff] }
0x1ee9   :  { %8597 = vmatpush3.bf16.msra.mxu1 %v9931_v27  ;;  %7921 = vmatprep.mubr.msk.f32.mxu1 %vm9508_vm0, %v9509_v1 }
0x1eea   :  { %8598 = vmatprep.subr.bf16.mxu1 %v9507_v0 }
0x1eed   :  { %8600 = vmatpush3.bf16.msra.mxu1 %v9936_v30 }
0x1eee   :  { %8619 = vmatprep.subr.bf16.mxu1 %v9507_v0 }
0x1fbb   :  { %v2669_v49 = vpop.f32.mrb[10].mxu1 }
0x1fbc   :  { %v8906_v50 = vadd.f32 %v9955_v33, %v2669_v49  ;;  %v7901_v11 = vpop.f32.mrb[11].mxu1  ;;  %v3024_v49 = vld [vmem:[#allocation16 + $0x38] sm:$0xff] }
0x1fbe   :  { %9127 = vtanh.f32 %v8906_v50  ;;  %v7203_v52 = vmul.f32 -1.442695, %v8906_v50  ;;  %v10087_v50 = vpack.c.bf16 %v3024_v49, %v3023_v48 }
0x1fc0   :  { %9129 = vpow2.f32 %v7203_v52 }
0x1fc8   :  { %v9128_v51 = vpop.eup %9127 }
0x1fc9   :  { %2683 = vrot.lane.b32.xlu0 %v9128_v51, %s9510_s5 }
0x1fca   :  { %v9130_v53 = vpop.eup %9129 }
0x1fcb   :  { %v2677_v54 = vadd.f32 1.0, %v9130_v53  ;;  %v3025_v53 = vld [vmem:[#allocation2] sm:$0x3] }
0x1fcd   :  { %9131 = vrcp.f32 %v2677_v54 }
0x1fd7   :  { %v9132_v14 = vpop.eup %9131 }
0x1fd8   :  { %v2681_v57 = vmul.f32 %v9132_v14, %v2588_v44 }
0x203b   :  { %v2684_v55 = vpop.permute.xlu0 %2683 }
0x203c   :  { %v2686_v56 = vmul.f32 %v9132_v14, %v2684_v55 }
0x203e   :  { %2688 = vrot.lane.b32.xlu1 %v2686_v56, %s9511_s21  ;;  %v3781_v56 = vld [vmem:[#allocation2 + $0xa] sm:$0x3] }
0x20b0   :  { %v2689_v58 = vpop.permute.xlu1 %2688 }
0x20b1   :  { %v2691_v59 = vadd.f32 %v2689_v58, %v2681_v57  ;;  %v3856_v57 = vld [vmem:[#allocation3 + $0xa] sm:$0x3] }
0x20b3   :  { %9133 = vtanh.f32 %v2691_v59 }
0x20bd   :  { %v9134_v60 = vpop.eup %9133 }
0x20be   :  { %2694 = vrot.lane.b32.xlu0 %v9134_v60, %s9510_s5 }
0x2130   :  { %v2695_v61 = vpop.permute.xlu0 %2694 }
0x2131   :  { %v2697_v62 = vmul.f32 %v9132_v14, %v2695_v61  ;;  %v3481_v14 = vld [vmem:[#allocation2 + $0x6] sm:$0x3] }
0x2133   :  { %2699 = vrot.lane.b32.xlu1 %v2697_v62, %s9511_s21 }
0x21a5   :  { %v2700_v63 = vpop.permute.xlu1 %2699 }
0x21a6   :  { %2703 = vst.msk [vmem:[#allocation3 + $0x6] sm:$0x3] %vm863_vm2, %v2700_v63  ;;  %7911 = vmatmul.mubr.msk.f32.vlgmr.msra.gmra.mrb[10].mxu0 %vm760_vm3, %v2700_v63 }
0x21a7   :  { %8603 = vmatpush3.bf16.msra.mxu0 %v9931_v27  ;;  %7932 = vmatprep.mubr.msk.f32.mxu0 %vm9508_vm0, %v9509_v1 }
0x21a8   :  { %8604 = vmatprep.subr.bf16.mxu0 %v9507_v0 }
0x21ab   :  { %8606 = vmatpush3.bf16.msra.mxu0 %v9936_v30 }
0x21ac   :  { %8607 = vmatprep.subr.bf16.mxu0 %v9507_v0 }
0x21ad   :  { %v3556_v55 = vld [vmem:[#allocation3 + $0x6] sm:$0x3] }
0x2279   :  { %v2772_v2 = vpop.f32.mrb[10].mxu0 }
0x227a   :  { %v8905_v3 = vadd.f32 %v9955_v33, %v2772_v2  ;;  %v7912_v4 = vpop.f32.mrb[11].mxu0 }
0x227c   :  { %9135 = vtanh.f32 %v8905_v3  ;;  %v7205_v6 = vmul.f32 -1.442695, %v8905_v3 }
0x227e   :  { %9137 = vpow2.f32 %v7205_v6 }
0x2286   :  { %v9136_v5 = vpop.eup %9135 }
0x2287   :  { %2786 = vrot.lane.b32.xlu0 %v9136_v5, %s9510_s5 }
0x2288   :  { %v9138_v27 = vpop.eup %9137 }
0x2289   :  { %v2780_v7 = vadd.f32 1.0, %v9138_v27 }
0x228b   :  { %9139 = vrcp.f32 %v2780_v7 }
0x2295   :  { %v9140_v8 = vpop.eup %9139 }
0x2296   :  { %v2784_v30 = vmul.f32 %v9140_v8, %v2691_v59 }
0x22f9   :  { %v2787_v9 = vpop.permute.xlu0 %2786 }
0x22fa   :  { %v2789_v10 = vmul.f32 %v9140_v8, %v2787_v9 }
0x22fc   :  { %2791 = vrot.lane.b32.xlu1 %v2789_v10, %s9511_s21 }
0x236e   :  { %v2792_v15 = vpop.permute.xlu1 %2791 }
0x236f   :  { %v2794_v13 = vadd.f32 %v2792_v15, %v2784_v30 }
0x2371   :  { %9141 = vtanh.f32 %v2794_v13 }
0x237b   :  { %v9142_v16 = vpop.eup %9141 }
0x237c   :  { %2797 = vrot.lane.b32.xlu0 %v9142_v16, %s9510_s5 }
0x23ee   :  { %v2798_v17 = vpop.permute.xlu0 %2797 }
0x23ef   :  { %v2800_v18 = vmul.f32 %v9140_v8, %v2798_v17 }
0x23f1   :  { %2802 = vrot.lane.b32.xlu1 %v2800_v18, %s9511_s21 }
0x2463   :  { %v2803_v24 = vpop.permute.xlu1 %2802 }
0x2464   :  { %2806 = vst.msk [vmem:[#allocation3 + $0x4] sm:$0x3] %vm863_vm2, %v2803_v24  ;;  %7922 = vmatmul.mubr.msk.f32.vlgmr.msra.gmra.mrb[8].mxu1 %vm760_vm3, %v2803_v24 }
0x2465   :  { %8621 = vmatpush3.bf16.msra.mxu1 %v10061_v21  ;;  %7965 = vmatprep.mubr.msk.f32.mxu1 %vm9508_vm0, %v9509_v1 }
0x2466   :  { %8622 = vmatprep.subr.bf16.mxu1 %v9507_v0 }
0x2469   :  { %8624 = vmatpush3.bf16.msra.mxu1 %v10066_v25 }
0x246a   :  { %8625 = vmatprep.subr.bf16.mxu1 %v9507_v0 }
0x246c   :  { %7966 = vmatmul.mubr.msk.f32.vlgmr.msra.gmra.mrb[16].mxu1 %vm760_vm3, %v3181_v26 }
0x246d   :  { %7976 = vmatprep.mubr.msk.f32.mxu1 %vm9508_vm0, %v9509_v1  ;;  %8627 = vmatpush3.bf16.msra.mxu1 %v10083_v47 }
0x246e   :  { %8628 = vmatprep.subr.bf16.mxu1 %v9507_v0 }
0x2471   :  { %8630 = vmatpush3.bf16.msra.mxu1 %v10087_v50 }
0x2472   :  { %8643 = vmatprep.subr.bf16.mxu1 %v9507_v0 }
0x2537   :  { %v2875_v28 = vpop.f32.mrb[8].mxu1 }
0x2538   :  { %v8904_v29 = vadd.f32 %v9955_v33, %v2875_v28  ;;  %v7923_v32 = vpop.f32.mrb[9].mxu1  ;;  %v3331_v28 = vld [vmem:[#allocation2 + $0x4] sm:$0x3] }
0x2539   :  { %v3631_v32 = vld [vmem:[#allocation2 + $0x8] sm:$0x3] }
0x253a   :  { %9143 = vtanh.f32 %v8904_v29  ;;  %v7207_v35 = vmul.f32 -1.442695, %v8904_v29 }
0x253c   :  { %9145 = vpow2.f32 %v7207_v35  ;;  %v3931_v35 = vld [vmem:[#allocation2 + $0xc] sm:$0x3] }
0x2544   :  { %v9144_v34 = vpop.eup %9143 }
0x2545   :  { %2889 = vrot.lane.b32.xlu0 %v9144_v34, %s9510_s5  ;;  %v3706_v34 = vld [vmem:[#allocation3 + $0x8] sm:$0x3] }
0x2546   :  { %v9146_v36 = vpop.eup %9145 }
0x2547   :  { %v2883_v37 = vadd.f32 1.0, %v9146_v36  ;;  %v3013_v36 = vld [vmem:[#allocation17 + $0x8] sm:$0xff] }
0x2549   :  { %9147 = vrcp.f32 %v2883_v37 }
0x2553   :  { %v9148_v38 = vpop.eup %9147 }
0x2554   :  { %v2887_v41 = vmul.f32 %v9148_v38, %v2794_v13 }
0x25b7   :  { %v2890_v39 = vpop.permute.xlu0 %2889 }
0x25b8   :  { %v2892_v40 = vmul.f32 %v9148_v38, %v2890_v39  ;;  %v4006_v39 = vld [vmem:[#allocation3 + $0xc] sm:$0x3] }
0x25ba   :  { %2894 = vrot.lane.b32.xlu1 %v2892_v40, %s9511_s21 }
0x262c   :  { %v2895_v42 = vpop.permute.xlu1 %2894 }
0x262d   :  { %v10079_v43 = vadd.f32 %v2895_v42, %v2887_v41 }
0x262f   :  { %9149 = vtanh.f32 %v10079_v43 }
0x2639   :  { %v9150_v44 = vpop.eup %9149 }
0x263a   :  { %2900 = vrot.lane.b32.xlu0 %v9150_v44, %s9510_s5 }
0x26ac   :  { %v2901_v11 = vpop.permute.xlu0 %2900 }
0x26ad   :  { %v2903_v51 = vmul.f32 %v9148_v38, %v2901_v11  ;;  %v3015_v38 = vld [vmem:[#allocation17 + $0x18] sm:$0xff] }
0x26af   :  { %2905 = vrot.lane.b32.xlu1 %v2903_v51, %s9511_s21 }
0x2721   :  { %v2906_v52 = vpop.permute.xlu1 %2905 }
0x2722   :  { %2909 = vst.msk [vmem:[#allocation3 + $0x2] sm:$0x3] %vm863_vm2, %v2906_v52  ;;  %7933 = vmatmul.mubr.msk.f32.vlgmr.msra.gmra.mrb[8].mxu0 %vm760_vm3, %v2906_v52 }
0x2723   :  { %8609 = vmatpush3.bf16.msra.mxu0 %v10061_v21  ;;  %7943 = vmatprep.mubr.msk.f32.mxu0 %vm9508_vm0, %v9509_v1 }
0x2724   :  { %8610 = vmatprep.subr.bf16.mxu0 %v9507_v0 }
0x2727   :  { %8612 = vmatpush3.bf16.msra.mxu0 %v10066_v25 }
0x2728   :  { %8613 = vmatprep.subr.bf16.mxu0 %v9507_v0 }
0x2729   :  { %v3256_v54 = vld [vmem:[#allocation3 + $0x2] sm:$0x3] }
0x272a   :  { %7944 = vmatmul.mubr.msk.f32.vlgmr.msra.gmra.mrb[16].mxu0 %vm760_vm3, %v3025_v53  ;;  %7977 = vmatmul.mubr.msk.f32.vlgmr.msra.gmra.mrb[16].mxu1 %vm760_vm3, %v3256_v54 }
0x272b   :  { %8645 = vmatpush3.bf16.msra.mxu1 %v10061_v21  ;;  %8009 = vmatprep.mubr.msk.f32.mxu1 %vm9508_vm0, %v9509_v1 }
0x272c   :  { %8646 = vmatprep.subr.bf16.mxu1 %v9507_v0  ;;  %8615 = vmatpush3.bf16.msra.mxu0 %v10083_v47 }
0x272d   :  { %8616 = vmatprep.subr.bf16.mxu0 %v9507_v0  ;;  %7954 = vmatprep.mubr.msk.f32.mxu0 %vm9508_vm0, %v9509_v1 }
0x272f   :  { %8648 = vmatpush3.bf16.msra.mxu1 %v10066_v25 }
0x2730   :  { %8649 = vmatprep.subr.bf16.mxu1 %v9507_v0  ;;  %8618 = vmatpush3.bf16.msra.mxu0 %v10087_v50 }
0x2731   :  { %8631 = vmatprep.subr.bf16.mxu0 %v9507_v0 }
0x2732   :  { %8010 = vmatmul.mubr.msk.f32.vlgmr.msra.gmra.mrb[18].mxu1 %vm760_vm3, %v3481_v14 }
0x2733   :  { %8651 = vmatpush3.bf16.msra.mxu1 %v10083_v47  ;;  %8020 = vmatprep.mubr.msk.f32.mxu1 %vm9508_vm0, %v9509_v1 }
0x2734   :  { %8652 = vmatprep.subr.bf16.mxu1 %v9507_v0 }
0x2737   :  { %8654 = vmatpush3.bf16.msra.mxu1 %v10087_v50 }
0x2738   :  { %8667 = vmatprep.subr.bf16.mxu1 %v9507_v0 }
0x273a   :  { %8021 = vmatmul.mubr.msk.f32.vlgmr.msra.gmra.mrb[18].mxu1 %vm760_vm3, %v3556_v55 }
0x273b   :  { %8669 = vmatpush3.bf16.msra.mxu1 %v10061_v21  ;;  %8053 = vmatprep.mubr.msk.f32.mxu1 %vm9508_vm0, %v9509_v1 }
0x273c   :  { %8670 = vmatprep.subr.bf16.mxu1 %v9507_v0 }
0x273f   :  { %8672 = vmatpush3.bf16.msra.mxu1 %v10066_v25 }
0x2740   :  { %8673 = vmatprep.subr.bf16.mxu1 %v9507_v0 }
0x2742   :  { %8054 = vmatmul.mubr.msk.f32.vlgmr.msra.gmra.mrb[20].mxu1 %vm760_vm3, %v3781_v56 }
0x2743   :  { %8675 = vmatpush3.bf16.msra.mxu1 %v10083_v47  ;;  %8064 = vmatprep.mubr.msk.f32.mxu1 %vm9508_vm0, %v9509_v1 }
0x2744   :  { %8676 = vmatprep.subr.bf16.mxu1 %v9507_v0 }
0x2747   :  { %8678 = vmatpush3.bf16.msra.mxu1 %v10087_v50 }
0x2748   :  { %8691 = vmatprep.subr.bf16.mxu1 %v9507_v0 }
0x274a   :  { %8065 = vmatmul.mubr.msk.f32.vlgmr.msra.gmra.mrb[20].mxu1 %vm760_vm3, %v3856_v57 }
0x274b   :  { %8693 = vmatpush3.bf16.msra.mxu1 %v10061_v21  ;;  %8097 = vmatprep.mubr.msk.f32.mxu1 %vm9508_vm0, %v9509_v1 }
0x274c   :  { %8694 = vmatprep.subr.bf16.mxu1 %v9507_v0 }
0x274f   :  { %8696 = vmatpush3.bf16.msra.mxu1 %v10066_v25 }
0x2750   :  { %8697 = vmatprep.subr.bf16.mxu1 %v9507_v0 }
0x27f5   :  { %v2978_v58 = vpop.f32.mrb[8].mxu0 }
0x27f6   :  { %v8903_v59 = vadd.f32 %v9955_v33, %v2978_v58  ;;  %v7934_v60 = vpop.f32.mrb[9].mxu0  ;;  %v9295_v33 = vld [vmem:[%s10618_s4] ss:$0 sm:$0xff]  ;;  %s7095_s4 = scalar_lea.vmem [#allocation4], %s7275_s3 }
0x27f7   :  { %v8902_v8 = vadd.f32 %v9295_v33, %v9950_v31 }
0x27f8   :  { %9151 = vtanh.f32 %v8903_v59  ;;  %v7209_v62 = vmul.f32 -1.442695, %v8903_v59 }
0x27f9   :  { %v7178_v30 = vmul.f32 -1.442695, %v8902_v8 }
0x27fa   :  { %9153 = vpow2.f32 %v7209_v62 }
0x2802   :  { %v9152_v61 = vpop.eup %9151 }
0x2803   :  { %2992 = vrot.lane.b32.xlu0 %v9152_v61, %s9510_s5 }
0x2804   :  { %v9154_v63 = vpop.eup %9153 }
0x2805   :  { %v2986_v2 = vadd.f32 1.0, %v9154_v63 }
0x2807   :  { %9155 = vrcp.f32 %v2986_v2 }
0x2811   :  { %v9156_v3 = vpop.eup %9155 }
0x2812   :  { %v2990_v6 = vmul.f32 %v9156_v3, %v10079_v43 }
0x2875   :  { %v2993_v4 = vpop.permute.xlu0 %2992 }
0x2876   :  { %v2995_v5 = vmul.f32 %v9156_v3, %v2993_v4 }
0x2878   :  { %2997 = vrot.lane.b32.xlu1 %v2995_v5, %s9511_s21 }
0x28ea   :  { %v2998_v27 = vpop.permute.xlu1 %2997 }
0x28eb   :  { %v3000_v7 = vadd.f32 %v2998_v27, %v2990_v6 }
0x28ed   :  { %9157 = vtanh.f32 %v3000_v7 }
0x28ee   :  { %9159 = vtanh.f32 %v8902_v8 }
0x28ef   :  { %9161 = vpow2.f32 %v7178_v30 }
0x28f7   :  { %v9158_v9 = vpop.eup %9157 }
0x28f8   :  { %3003 = vrot.lane.b32.xlu0 %v9158_v9, %s9510_s5  ;;  %v9160_v10 = vpop.eup %9159 }
0x28f9   :  { %v9162_v15 = vpop.eup %9161 }
0x28fa   :  { %v1559_v13 = vadd.f32 1.0, %v9162_v15 }
0x28fc   :  { %1565 = vrot.lane.b32.xlu0 %v9160_v10, %s9510_s5  ;;  %9163 = vrcp.f32 %v1559_v13 }
0x2906   :  { %v10153_v18 = vpop.eup %9163 }
0x2907   :  { %v1563_v22 = vmul.f32 %v10153_v18, %v9890_v12  ;;  %v3406_v12 = vld [vmem:[#allocation3 + $0x4] sm:$0x3] }
0x296a   :  { %v3004_v16 = vpop.permute.xlu0 %3003 }
0x296b   :  { %v3006_v17 = vmul.f32 %v9156_v3, %v3004_v16 }
0x296d   :  { %3008 = vrot.lane.b32.xlu1 %v3006_v17, %s9511_s21 }
0x296e   :  { %v1566_v31 = vpop.permute.xlu0 %1565 }
0x296f   :  { %v1568_v19 = vmul.f32 %v10153_v18, %v1566_v31 }
0x2971   :  { %1570 = vrot.lane.b32.xlu0 %v1568_v19, %s9511_s21 }
0x29df   :  { %v3009_v20 = vpop.permute.xlu1 %3008 }
0x29e0   :  { %3011 = vst.msk [vmem:[#allocation3] sm:$0x3] %vm863_vm2, %v3009_v20 }
0x29e3   :  { %v1571_v23 = vpop.permute.xlu0 %1570 }
0x29e4   :  { %v1573_v24 = vadd.f32 %v1571_v23, %v1563_v22 }
0x29e6   :  { %9165 = vtanh.f32 %v1573_v24 }
0x29e7   :  { %v3106_v26 = vld [vmem:[#allocation3] sm:$0x3] }
0x29e8   :  { %7955 = vmatmul.mubr.msk.f32.vlgmr.msra.gmra.mrb[16].mxu0 %vm760_vm3, %v3106_v26 }
0x29e9   :  { %8633 = vmatpush3.bf16.msra.mxu0 %v10061_v21  ;;  %7987 = vmatprep.mubr.msk.f32.mxu0 %vm9508_vm0, %v9509_v1 }
0x29ea   :  { %8634 = vmatprep.subr.bf16.mxu0 %v9507_v0 }
0x29ed   :  { %8636 = vmatpush3.bf16.msra.mxu0 %v10066_v25 }
0x29ee   :  { %8637 = vmatprep.subr.bf16.mxu0 %v9507_v0 }
0x29f0   :  { %v9166_v29 = vpop.eup %9165  ;;  %7988 = vmatmul.mubr.msk.f32.vlgmr.msra.gmra.mrb[18].mxu0 %vm760_vm3, %v3331_v28 }
0x29f1   :  { %8639 = vmatpush3.bf16.msra.mxu0 %v10083_v47  ;;  %1576 = vrot.lane.b32.xlu0 %v9166_v29, %s9510_s5 }
0x29f2   :  { %8640 = vmatprep.subr.bf16.mxu0 %v9507_v0  ;;  %7998 = vmatprep.mubr.msk.f32.mxu0 %vm9508_vm0, %v9509_v1 }
0x29f5   :  { %8642 = vmatpush3.bf16.msra.mxu0 %v10087_v50 }
0x29f6   :  { %8655 = vmatprep.subr.bf16.mxu0 %v9507_v0 }
0x29f8   :  { %7999 = vmatmul.mubr.msk.f32.vlgmr.msra.gmra.mrb[18].mxu0 %vm760_vm3, %v3406_v12 }
0x29f9   :  { %8657 = vmatpush3.bf16.msra.mxu0 %v10061_v21  ;;  %8031 = vmatprep.mubr.msk.f32.mxu0 %vm9508_vm0, %v9509_v1 }
0x29fa   :  { %8658 = vmatprep.subr.bf16.mxu0 %v9507_v0 }
0x29fd   :  { %8660 = vmatpush3.bf16.msra.mxu0 %v10066_v25 }
0x29fe   :  { %8661 = vmatprep.subr.bf16.mxu0 %v9507_v0 }
0x2a00   :  { %8032 = vmatmul.mubr.msk.f32.vlgmr.msra.gmra.mrb[20].mxu0 %vm760_vm3, %v3631_v32 }
0x2a01   :  { %8663 = vmatpush3.bf16.msra.mxu0 %v10083_v47  ;;  %8042 = vmatprep.mubr.msk.f32.mxu0 %vm9508_vm0, %v9509_v1 }
0x2a02   :  { %8664 = vmatprep.subr.bf16.mxu0 %v9507_v0 }
0x2a05   :  { %8666 = vmatpush3.bf16.msra.mxu0 %v10087_v50 }
0x2a06   :  { %8679 = vmatprep.subr.bf16.mxu0 %v9507_v0 }
0x2a08   :  { %8043 = vmatmul.mubr.msk.f32.vlgmr.msra.gmra.mrb[20].mxu0 %vm760_vm3, %v3706_v34 }
0x2a09   :  { %8681 = vmatpush3.bf16.msra.mxu0 %v10061_v21  ;;  %8075 = vmatprep.mubr.msk.f32.mxu0 %vm9508_vm0, %v9509_v1  ;;  %v3012_v21 = vld [vmem:[#allocation17] sm:$0xff] }
0x2a0a   :  { %8682 = vmatprep.subr.bf16.mxu0 %v9507_v0  ;;  %v10202_v37 = vpack.c.bf16 %v3013_v36, %v3012_v21 }
0x2a0d   :  { %8684 = vmatpush3.bf16.msra.mxu0 %v10066_v25  ;;  %v3014_v25 = vld [vmem:[#allocation17 + $0x10] sm:$0xff] }
0x2a0e   :  { %8685 = vmatprep.subr.bf16.mxu0 %v9507_v0  ;;  %v10207_v40 = vpack.c.bf16 %v3015_v38, %v3014_v25 }
0x2a10   :  { %8076 = vmatmul.mubr.msk.f32.vlgmr.msra.gmra.mrb[22].mxu0 %vm760_vm3, %v3931_v35 }
0x2a11   :  { %8687 = vmatpush3.bf16.msra.mxu0 %v10083_v47  ;;  %8086 = vmatprep.mubr.msk.f32.mxu0 %vm9508_vm0, %v9509_v1 }
0x2a12   :  { %8688 = vmatprep.subr.bf16.mxu0 %v9507_v0 }
0x2a15   :  { %8690 = vmatpush3.bf16.msra.mxu0 %v10087_v50 }
0x2a16   :  { %8703 = vmatprep.subr.bf16.mxu0 %v9507_v0 }
0x2a18   :  { %8087 = vmatmul.mubr.msk.f32.vlgmr.msra.gmra.mrb[22].mxu0 %vm760_vm3, %v4006_v39 }
0x2a19   :  { %8705 = vmatpush3.bf16.msra.mxu0 %v10202_v37  ;;  %8119 = vmatprep.mubr.msk.f32.mxu0 %vm9508_vm0, %v9509_v1 }
0x2a1a   :  { %8706 = vmatprep.subr.bf16.mxu0 %v9507_v0 }
0x2a1d   :  { %8708 = vmatpush3.bf16.msra.mxu0 %v10207_v40 }
0x2a1e   :  { %8715 = vmatprep.subr.bf16.mxu0 %v9507_v0 }
0x2a20   :  { %8120 = vmatmul.mubr.f32.vlgmr.msra.gmra.mrb[16].mxu0 %v9509_v1 }
0x2a21   :  { %8717 = vmatpush3.bf16.msra.mxu0 %v10202_v37  ;;  %8141 = vmatprep.mubr.msk.f32.mxu0 %vm9508_vm0, %v9509_v1 }
0x2a22   :  { %8718 = vmatprep.subr.bf16.mxu0 %v9507_v0 }
0x2a25   :  { %8720 = vmatpush3.bf16.msra.mxu0 %v10207_v40 }
0x2a26   :  { %8727 = vmatprep.subr.bf16.mxu0 %v9507_v0 }
0x2a63   :  { %v1577_v41 = vpop.permute.xlu0 %1576 }
0x2a64   :  { %v1579_v42 = vmul.f32 %v10153_v18, %v1577_v41 }
0x2a66   :  { %1581 = vrot.lane.b32.xlu0 %v1579_v42, %s9511_s21 }
0x2ad8   :  { %v1582_v43 = vpop.permute.xlu0 %1581 }
0x2ad9   :  { %1585 = vst.msk [vmem:[#allocation2 + $0xe] sm:$0x3] %vm863_vm2, %v1582_v43 }
0x2ae0   :  { %v4081_v44 = vld [vmem:[#allocation2 + $0xe] sm:$0x3] }
0x2ae1   :  { %8098 = vmatmul.mubr.msk.f32.vlgmr.msra.gmra.mrb[22].mxu1 %vm760_vm3, %v4081_v44 }
0x2ae2   :  { %8699 = vmatpush3.bf16.msra.mxu1 %v10083_v47  ;;  %8108 = vmatprep.mubr.msk.f32.mxu1 %vm9508_vm0, %v9509_v1 }
0x2ae3   :  { %8700 = vmatprep.subr.bf16.mxu1 %v9507_v0 }
0x2ae6   :  { %8702 = vmatpush3.bf16.msra.mxu1 %v10087_v50 }
0x2ae7   :  { %8709 = vmatprep.subr.bf16.mxu1 %v9507_v0 }
0x2ae9   :  { %8109 = vmatmul.mubr.msk.f32.vlgmr.msra.gmra.mrb[22].mxu1 %vm760_vm3, %v4156_v45 }
0x2aea   :  { %8711 = vmatpush3.bf16.msra.mxu1 %v10202_v37  ;;  %8130 = vmatprep.mubr.msk.f32.mxu1 %vm9508_vm0, %v9509_v1 }
0x2aeb   :  { %8712 = vmatprep.subr.bf16.mxu1 %v9507_v0 }
0x2aee   :  { %8714 = vmatpush3.bf16.msra.mxu1 %v10207_v40 }
0x2aef   :  { %8721 = vmatprep.subr.bf16.mxu1 %v9507_v0 }
0x2af3   :  { %v4297_v47 = vpop.f32.mrb[16].mxu0 }
0x2af4   :  { %v8911_v48 = vadd.f32 %v10241_v46, %v4297_v47  ;;  %v8121_v49 = vpop.f32.mrb[17].mxu0 }
0x2af6   :  { %9167 = vtanh.f32 %v8911_v48  ;;  %v7227_v11 = vmul.f32 -1.442695, %v8911_v48 }
0x2af8   :  { %9169 = vpow2.f32 %v7227_v11 }
0x2b00   :  { %v9168_v50 = vpop.eup %9167 }
0x2b01   :  { %4311 = vrot.lane.b32.xlu1 %v9168_v50, %s9510_s5 }
0x2b02   :  { %v9170_v51 = vpop.eup %9169 }
0x2b03   :  { %v4305_v52 = vadd.f32 1.0, %v9170_v51 }
0x2b05   :  { %9171 = vrcp.f32 %v4305_v52 }
0x2b0f   :  { %v9172_v53 = vpop.eup %9171 }
0x2b10   :  { %v4309_v55 = vmul.f32 0.0, %v9172_v53 }
0x2b73   :  { %v4312_v54 = vpop.permute.xlu1 %4311 }
0x2b74   :  { %v4314_v14 = vmul.f32 %v9172_v53, %v4312_v54 }
0x2b76   :  { %4316 = vrot.lane.b32.xlu1 %v4314_v14, %s9511_s21 }
0x2be8   :  { %v4317_v56 = vpop.permute.xlu1 %4316 }
0x2be9   :  { %v4319_v57 = vadd.f32 %v4317_v56, %v4309_v55 }
0x2beb   :  { %9173 = vtanh.f32 %v4319_v57 }
0x2bf5   :  { %v9174_v58 = vpop.eup %9173 }
0x2bf6   :  { %4322 = vrot.lane.b32.xlu1 %v9174_v58, %s9510_s5 }
0x2c68   :  { %v4323_v59 = vpop.permute.xlu1 %4322 }
0x2c69   :  { %v4325_v60 = vmul.f32 %v9172_v53, %v4323_v59 }
0x2c6b   :  { %4327 = vrot.lane.b32.xlu1 %v4325_v60, %s9511_s21 }
0x2cdd   :  { %v4328_v61 = vpop.permute.xlu1 %4327 }
0x2cde   :  { %4330 = vst.msk [vmem:[#allocation4] sm:$0x3] %vm863_vm2, %v4328_v61  ;;  %8131 = vmatmul.mubr.msk.f32.vlgmr.msra.gmra.mrb[16].mxu1 %vm760_vm3, %v4328_v61 }
0x2cdf   :  { %8723 = vmatpush3.bf16.msra.mxu1 %v10202_v37  ;;  %8152 = vmatprep.mubr.msk.f32.mxu1 %vm9508_vm0, %v9509_v1 }
0x2ce0   :  { %8724 = vmatprep.subr.bf16.mxu1 %v9507_v0 }
0x2ce3   :  { %8726 = vmatpush3.bf16.msra.mxu1 %v10207_v40 }
0x2ce4   :  { %8733 = vmatprep.subr.bf16.mxu1 %v9507_v0 }
0x2db1   :  { %v4399_v62 = vpop.f32.mrb[16].mxu1 }
0x2db2   :  { %v8912_v63 = vadd.f32 %v10241_v46, %v4399_v62  ;;  %v8132_v2 = vpop.f32.mrb[17].mxu1 }
0x2db4   :  { %9175 = vtanh.f32 %v8912_v63  ;;  %v7229_v4 = vmul.f32 -1.442695, %v8912_v63 }
0x2db6   :  { %9177 = vpow2.f32 %v7229_v4 }
0x2dbe   :  { %v9176_v3 = vpop.eup %9175 }
0x2dbf   :  { %4413 = vrot.lane.b32.xlu0 %v9176_v3, %s9510_s5 }
0x2dc0   :  { %v9178_v5 = vpop.eup %9177 }
0x2dc1   :  { %v4407_v6 = vadd.f32 1.0, %v9178_v5 }
0x2dc3   :  { %9179 = vrcp.f32 %v4407_v6 }
0x2dcd   :  { %v9180_v27 = vpop.eup %9179 }
0x2dce   :  { %v4411_v8 = vmul.f32 %v9180_v27, %v4319_v57 }
0x2e31   :  { %v4414_v7 = vpop.permute.xlu0 %4413 }
0x2e32   :  { %v4416_v33 = vmul.f32 %v9180_v27, %v4414_v7 }
0x2e34   :  { %4418 = vrot.lane.b32.xlu1 %v4416_v33, %s9511_s21 }
0x2ea6   :  { %v4419_v9 = vpop.permute.xlu1 %4418 }
0x2ea7   :  { %v4421_v10 = vadd.f32 %v4419_v9, %v4411_v8 }
0x2ea9   :  { %9181 = vtanh.f32 %v4421_v10 }
0x2eb3   :  { %v9182_v30 = vpop.eup %9181 }
0x2eb4   :  { %4424 = vrot.lane.b32.xlu0 %v9182_v30, %s9510_s5 }
0x2f26   :  { %v4425_v15 = vpop.permute.xlu0 %4424 }
0x2f27   :  { %v4427_v13 = vmul.f32 %v9180_v27, %v4425_v15 }
0x2f29   :  { %4429 = vrot.lane.b32.xlu1 %v4427_v13, %s9511_s21 }
0x2f9b   :  { %v4430_v16 = vpop.permute.xlu1 %4429 }
0x2f9c   :  { %4433 = vst.msk [vmem:[#allocation4 + $0x2] sm:$0x3] %vm863_vm2, %v4430_v16  ;;  %8142 = vmatmul.mubr.msk.f32.vlgmr.msra.gmra.mrb[18].mxu0 %vm760_vm3, %v4430_v16 }
0x2f9d   :  { %8729 = vmatpush3.bf16.msra.mxu0 %v10202_v37  ;;  %8163 = vmatprep.mubr.msk.f32.mxu0 %vm9508_vm0, %v9509_v1 }
0x2f9e   :  { %8730 = vmatprep.subr.bf16.mxu0 %v9507_v0 }
0x2fa1   :  { %8732 = vmatpush3.bf16.msra.mxu0 %v10207_v40 }
0x2fa2   :  { %8739 = vmatprep.subr.bf16.mxu0 %v9507_v0 }
0x306f   :  { %v4502_v17 = vpop.f32.mrb[18].mxu0 }
0x3070   :  { %v8913_v18 = vadd.f32 %v10241_v46, %v4502_v17  ;;  %v8143_v31 = vpop.f32.mrb[19].mxu0 }
0x3072   :  { %9183 = vtanh.f32 %v8913_v18  ;;  %v7231_v20 = vmul.f32 -1.442695, %v8913_v18 }
0x3074   :  { %9185 = vpow2.f32 %v7231_v20 }
0x307c   :  { %v9184_v19 = vpop.eup %9183 }
0x307d   :  { %4516 = vrot.lane.b32.xlu0 %v9184_v19, %s9510_s5 }
0x307e   :  { %v9186_v22 = vpop.eup %9185 }
0x307f   :  { %v4510_v23 = vadd.f32 1.0, %v9186_v22 }
0x3081   :  { %9187 = vrcp.f32 %v4510_v23  ;;  %v5057_v23 = vld [vmem:[%s10625_s11] sm:$0xff] }
0x308b   :  { %v9188_v24 = vpop.eup %9187 }
0x308c   :  { %v4514_v29 = vmul.f32 %v9188_v24, %v4421_v10 }
0x30ef   :  { %v4517_v26 = vpop.permute.xlu0 %4516 }
0x30f0   :  { %v4519_v28 = vmul.f32 %v9188_v24, %v4517_v26 }
0x30f2   :  { %4521 = vrot.lane.b32.xlu1 %v4519_v28, %s9511_s21  ;;  %v5059_v28 = vld [vmem:[%s10625_s11 + $0x10] sm:$0xff] }
0x3164   :  { %v4522_v12 = vpop.permute.xlu1 %4521 }
0x3165   :  { %v4524_v32 = vadd.f32 %v4522_v12, %v4514_v29  ;;  %v5060_v29 = vld [vmem:[%s10625_s11 + $0x18] sm:$0xff] }
0x3167   :  { %9189 = vtanh.f32 %v4524_v32 }
0x3171   :  { %v9190_v34 = vpop.eup %9189 }
0x3172   :  { %4527 = vrot.lane.b32.xlu0 %v9190_v34, %s9510_s5  ;;  %v5061_v34 = vld [vmem:[%s10625_s11 + $0x20] sm:$0xff] }
0x31e4   :  { %v4528_v35 = vpop.permute.xlu0 %4527 }
0x31e5   :  { %v4530_v21 = vmul.f32 %v9188_v24, %v4528_v35  ;;  %v5058_v24 = vld [vmem:[%s10625_s11 + $0x8] sm:$0xff] }
0x31e6   :  { %v10322_v26 = vpack.c.bf16 %v5058_v24, %v5057_v23  ;;  %v5062_v35 = vld [vmem:[%s10625_s11 + $0x28] sm:$0xff] }
0x31e7   :  { %4532 = vrot.lane.b32.xlu1 %v4530_v21, %s9511_s21  ;;  %v10345_v21 = vpack.c.bf16 %v5062_v35, %v5061_v34 }
0x3259   :  { %v4533_v36 = vpop.permute.xlu1 %4532 }
0x325a   :  { %4536 = vst.msk [vmem:[#allocation4 + $0x4] sm:$0x3] %vm863_vm2, %v4533_v36  ;;  %8153 = vmatmul.mubr.msk.f32.vlgmr.msra.gmra.mrb[18].mxu1 %vm760_vm3, %v4533_v36  ;;  %v5063_v36 = vld [vmem:[%s10625_s11 + $0x30] sm:$0xff] }
0x325b   :  { %8735 = vmatpush3.bf16.msra.mxu1 %v10202_v37  ;;  %8174 = vmatprep.mubr.msk.f32.mxu1 %vm9508_vm0, %v9509_v1 }
0x325c   :  { %8736 = vmatprep.subr.bf16.mxu1 %v9507_v0 }
0x325f   :  { %8738 = vmatpush3.bf16.msra.mxu1 %v10207_v40 }
0x3260   :  { %8745 = vmatprep.subr.bf16.mxu1 %v9507_v0 }
0x332d   :  { %v4605_v25 = vpop.f32.mrb[18].mxu1 }
0x332e   :  { %v8914_v38 = vadd.f32 %v10241_v46, %v4605_v25  ;;  %v8154_v39 = vpop.f32.mrb[19].mxu1  ;;  %v5064_v25 = vld [vmem:[%s10625_s11 + $0x38] sm:$0xff] }
0x332f   :  { %v10356_v39 = vpack.c.bf16 %v5064_v25, %v5063_v36 }
0x3330   :  { %9191 = vtanh.f32 %v8914_v38  ;;  %v7233_v42 = vmul.f32 -1.442695, %v8914_v38  ;;  %v5065_v38 = vld [vmem:[#allocation2] sm:$0x3] }
0x3332   :  { %9193 = vpow2.f32 %v7233_v42  ;;  %v5371_v42 = vld [vmem:[#allocation2 + $0x4] sm:$0x3] }
0x333a   :  { %v9192_v41 = vpop.eup %9191 }
0x333b   :  { %4619 = vrot.lane.b32.xlu0 %v9192_v41, %s9510_s5  ;;  %v5146_v41 = vld [vmem:[#allocation3] sm:$0x3] }
0x333c   :  { %v9194_v43 = vpop.eup %9193 }
0x333d   :  { %v4613_v44 = vadd.f32 1.0, %v9194_v43  ;;  %v5446_v43 = vld [vmem:[#allocation3 + $0x4] sm:$0x3] }
0x333f   :  { %9195 = vrcp.f32 %v4613_v44  ;;  %v5671_v44 = vld [vmem:[#allocation2 + $0x8] sm:$0x3] }
0x3349   :  { %v9196_v45 = vpop.eup %9195 }
0x334a   :  { %v4617_v49 = vmul.f32 %v9196_v45, %v4524_v32  ;;  %v10333_v32 = vpack.c.bf16 %v5060_v29, %v5059_v28 }
0x33ad   :  { %v4620_v47 = vpop.permute.xlu0 %4619 }
0x33ae   :  { %v4622_v48 = vmul.f32 %v9196_v45, %v4620_v47  ;;  %v5971_v47 = vld [vmem:[#allocation2 + $0xc] sm:$0x3] }
0x33b0   :  { %4624 = vrot.lane.b32.xlu1 %v4622_v48, %s9511_s21  ;;  %v6046_v48 = vld [vmem:[#allocation3 + $0xc] sm:$0x3] }
0x3422   :  { %v4625_v50 = vpop.permute.xlu1 %4624 }
0x3423   :  { %v4627_v11 = vadd.f32 %v4625_v50, %v4617_v49 }
0x3425   :  { %9197 = vtanh.f32 %v4627_v11 }
0x342f   :  { %v9198_v51 = vpop.eup %9197 }
0x3430   :  { %4630 = vrot.lane.b32.xlu0 %v9198_v51, %s9510_s5 }
0x34a2   :  { %v4631_v52 = vpop.permute.xlu0 %4630 }
0x34a3   :  { %v4633_v53 = vmul.f32 %v9196_v45, %v4631_v52  ;;  %v5746_v45 = vld [vmem:[#allocation3 + $0x8] sm:$0x3] }
0x34a5   :  { %4635 = vrot.lane.b32.xlu1 %v4633_v53, %s9511_s21 }
0x3517   :  { %v4636_v54 = vpop.permute.xlu1 %4635 }
0x3518   :  { %4639 = vst.msk [vmem:[#allocation4 + $0x6] sm:$0x3] %vm863_vm2, %v4636_v54  ;;  %8164 = vmatmul.mubr.msk.f32.vlgmr.msra.gmra.mrb[20].mxu0 %vm760_vm3, %v4636_v54 }
0x3519   :  { %8741 = vmatpush3.bf16.msra.mxu0 %v10202_v37  ;;  %8185 = vmatprep.mubr.msk.f32.mxu0 %vm9508_vm0, %v9509_v1 }
0x351a   :  { %8742 = vmatprep.subr.bf16.mxu0 %v9507_v0 }
0x351d   :  { %8744 = vmatpush3.bf16.msra.mxu0 %v10207_v40 }
0x351e   :  { %8751 = vmatprep.subr.bf16.mxu0 %v9507_v0 }
0x35eb   :  { %v4708_v14 = vpop.f32.mrb[20].mxu0 }
0x35ec   :  { %v8915_v55 = vadd.f32 %v10241_v46, %v4708_v14  ;;  %v8165_v56 = vpop.f32.mrb[21].mxu0 }
0x35ee   :  { %9199 = vtanh.f32 %v8915_v55  ;;  %v7235_v58 = vmul.f32 -1.442695, %v8915_v55 }
0x35f0   :  { %9201 = vpow2.f32 %v7235_v58 }
0x35f8   :  { %v9200_v57 = vpop.eup %9199 }
0x35f9   :  { %4722 = vrot.lane.b32.xlu0 %v9200_v57, %s9510_s5 }
0x35fa   :  { %v9202_v59 = vpop.eup %9201 }
0x35fb   :  { %v4716_v60 = vadd.f32 1.0, %v9202_v59 }
0x35fd   :  { %9203 = vrcp.f32 %v4716_v60 }
0x3607   :  { %v9204_v61 = vpop.eup %9203 }
0x3608   :  { %v4720_v2 = vmul.f32 %v9204_v61, %v4627_v11 }
0x366b   :  { %v4723_v62 = vpop.permute.xlu0 %4722 }
0x366c   :  { %v4725_v63 = vmul.f32 %v9204_v61, %v4723_v62  ;;  %v5052_v62 = vld [vmem:[#allocation19] sm:$0xff] }
0x366e   :  { %4727 = vrot.lane.b32.xlu1 %v4725_v63, %s9511_s21  ;;  %v5053_v63 = vld [vmem:[#allocation19 + $0x8] sm:$0xff] }
0x36e0   :  { %v4728_v3 = vpop.permute.xlu1 %4727 }
0x36e1   :  { %v4730_v4 = vadd.f32 %v4728_v3, %v4720_v2  ;;  %v10417_v2 = vpack.c.bf16 %v5053_v63, %v5052_v62  ;;  %v5054_v3 = vld [vmem:[#allocation19 + $0x10] sm:$0xff] }
0x36e3   :  { %9205 = vtanh.f32 %v4730_v4 }
0x36ed   :  { %v9206_v5 = vpop.eup %9205 }
0x36ee   :  { %4733 = vrot.lane.b32.xlu0 %v9206_v5, %s9510_s5 }
0x3760   :  { %v4734_v6 = vpop.permute.xlu0 %4733 }
0x3761   :  { %v4736_v27 = vmul.f32 %v9204_v61, %v4734_v6 }
0x3763   :  { %4738 = vrot.lane.b32.xlu1 %v4736_v27, %s9511_s21  ;;  %v5221_v27 = vld [vmem:[#allocation2 + $0x2] sm:$0x3] }
0x37d5   :  { %v4739_v7 = vpop.permute.xlu1 %4738 }
0x37d6   :  { %4742 = vst.msk [vmem:[#allocation4 + $0x8] sm:$0x3] %vm863_vm2, %v4739_v7  ;;  %8175 = vmatmul.mubr.msk.f32.vlgmr.msra.gmra.mrb[20].mxu1 %vm760_vm3, %v4739_v7  ;;  %v5296_v7 = vld [vmem:[#allocation3 + $0x2] sm:$0x3] }
0x37d7   :  { %8747 = vmatpush3.bf16.msra.mxu1 %v10202_v37  ;;  %8196 = vmatprep.mubr.msk.f32.mxu1 %vm9508_vm0, %v9509_v1 }
0x37d8   :  { %8748 = vmatprep.subr.bf16.mxu1 %v9507_v0 }
0x37db   :  { %8750 = vmatpush3.bf16.msra.mxu1 %v10207_v40 }
0x37dc   :  { %8763 = vmatprep.subr.bf16.mxu1 %v9507_v0 }
0x38a9   :  { %v4811_v33 = vpop.f32.mrb[20].mxu1 }
0x38aa   :  { %v8916_v8 = vadd.f32 %v10241_v46, %v4811_v33  ;;  %v8176_v9 = vpop.f32.mrb[21].mxu1  ;;  %v5521_v33 = vld [vmem:[#allocation2 + $0x6] sm:$0x3] }
0x38ab   :  { %v5821_v9 = vld [vmem:[#allocation2 + $0xa] sm:$0x3] }
0x38ac   :  { %9207 = vtanh.f32 %v8916_v8  ;;  %v7237_v30 = vmul.f32 -1.442695, %v8916_v8  ;;  %v5596_v8 = vld [vmem:[#allocation3 + $0x6] sm:$0x3] }
0x38ae   :  { %9209 = vpow2.f32 %v7237_v30  ;;  %v6121_v30 = vld [vmem:[#allocation2 + $0xe] sm:$0x3] }
0x38b6   :  { %v9208_v10 = vpop.eup %9207 }
0x38b7   :  { %4825 = vrot.lane.b32.xlu0 %v9208_v10, %s9510_s5  ;;  %v5896_v10 = vld [vmem:[#allocation3 + $0xa] sm:$0x3] }
0x38b8   :  { %v9210_v37 = vpop.eup %9209 }
0x38b9   :  { %v4819_v15 = vadd.f32 1.0, %v9210_v37  ;;  %v6196_v37 = vld [vmem:[#allocation3 + $0xe] sm:$0x3] }
0x38bb   :  { %9211 = vrcp.f32 %v4819_v15 }
0x38c5   :  { %v9212_v13 = vpop.eup %9211 }
0x38c6   :  { %v4823_v40 = vmul.f32 %v9212_v13, %v4730_v4  ;;  %v5055_v4 = vld [vmem:[#allocation19 + $0x18] sm:$0xff] }
0x38c7   :  { %v10421_v5 = vpack.c.bf16 %v5055_v4, %v5054_v3 }
0x3929   :  { %v4826_v16 = vpop.permute.xlu0 %4825 }
0x392a   :  { %v4828_v17 = vmul.f32 %v9212_v13, %v4826_v16  ;;  %v10501_v16 = vld [vmem:[%s10627_s13] ss:$0 sm:$0xff] }
0x392c   :  { %4830 = vrot.lane.b32.xlu1 %v4828_v17, %s9511_s21 }
0x399e   :  { %v4831_v18 = vpop.permute.xlu1 %4830 }
0x399f   :  { %v10311_v31 = vadd.f32 %v4831_v18, %v4823_v40 }
0x39a1   :  { %9213 = vtanh.f32 %v10311_v31 }
0x39ab   :  { %v9214_v19 = vpop.eup %9213 }
0x39ac   :  { %4836 = vrot.lane.b32.xlu0 %v9214_v19, %s9510_s5 }
0x3a1e   :  { %v4837_v20 = vpop.permute.xlu0 %4836 }
0x3a1f   :  { %v4839_v22 = vmul.f32 %v9212_v13, %v4837_v20 }
0x3a21   :  { %4841 = vrot.lane.b32.xlu1 %v4839_v22, %s9511_s21 }
0x3a93   :  { %v4842_v12 = vpop.permute.xlu1 %4841 }
0x3a94   :  { %4845 = vst.msk [vmem:[#allocation4 + $0xa] sm:$0x3] %vm863_vm2, %v4842_v12  ;;  %8186 = vmatmul.mubr.msk.f32.vlgmr.msra.gmra.mrb[22].mxu0 %vm760_vm3, %v4842_v12 }
0x3a95   :  { %8753 = vmatpush3.bf16.msra.mxu0 %v10322_v26  ;;  %8207 = vmatprep.mubr.msk.f32.mxu0 %vm9508_vm0, %v9509_v1 }
0x3a96   :  { %8754 = vmatprep.subr.bf16.mxu0 %v9507_v0 }
0x3a99   :  { %8756 = vmatpush3.bf16.msra.mxu0 %v10333_v32 }
0x3a9a   :  { %8757 = vmatprep.subr.bf16.mxu0 %v9507_v0 }
0x3a9c   :  { %8208 = vmatmul.mubr.msk.f32.vlgmr.msra.gmra.mrb[24].mxu0 %vm760_vm3, %v5065_v38 }
0x3a9d   :  { %8759 = vmatpush3.bf16.msra.mxu0 %v10345_v21  ;;  %8218 = vmatprep.mubr.msk.f32.mxu0 %vm9508_vm0, %v9509_v1 }
0x3a9e   :  { %8760 = vmatprep.subr.bf16.mxu0 %v9507_v0 }
0x3aa1   :  { %8762 = vmatpush3.bf16.msra.mxu0 %v10356_v39 }
0x3aa2   :  { %8775 = vmatprep.subr.bf16.mxu0 %v9507_v0 }
0x3aa4   :  { %8219 = vmatmul.mubr.msk.f32.vlgmr.msra.gmra.mrb[24].mxu0 %vm760_vm3, %v5146_v41 }
0x3aa5   :  { %8777 = vmatpush3.bf16.msra.mxu0 %v10322_v26  ;;  %8251 = vmatprep.mubr.msk.f32.mxu0 %vm9508_vm0, %v9509_v1 }
0x3aa6   :  { %8778 = vmatprep.subr.bf16.mxu0 %v9507_v0 }
0x3aa9   :  { %8780 = vmatpush3.bf16.msra.mxu0 %v10333_v32 }
0x3aaa   :  { %8781 = vmatprep.subr.bf16.mxu0 %v9507_v0 }
0x3aac   :  { %8252 = vmatmul.mubr.msk.f32.vlgmr.msra.gmra.mrb[26].mxu0 %vm760_vm3, %v5371_v42 }
0x3aad   :  { %8783 = vmatpush3.bf16.msra.mxu0 %v10345_v21  ;;  %8262 = vmatprep.mubr.msk.f32.mxu0 %vm9508_vm0, %v9509_v1 }
0x3aae   :  { %8784 = vmatprep.subr.bf16.mxu0 %v9507_v0 }
0x3ab1   :  { %8786 = vmatpush3.bf16.msra.mxu0 %v10356_v39 }
0x3ab2   :  { %8799 = vmatprep.subr.bf16.mxu0 %v9507_v0 }
0x3ab4   :  { %8263 = vmatmul.mubr.msk.f32.vlgmr.msra.gmra.mrb[26].mxu0 %vm760_vm3, %v5446_v43 }
0x3ab5   :  { %8801 = vmatpush3.bf16.msra.mxu0 %v10322_v26  ;;  %8295 = vmatprep.mubr.msk.f32.mxu0 %vm9508_vm0, %v9509_v1 }
0x3ab6   :  { %8802 = vmatprep.subr.bf16.mxu0 %v9507_v0 }
0x3ab9   :  { %8804 = vmatpush3.bf16.msra.mxu0 %v10333_v32 }
0x3aba   :  { %8805 = vmatprep.subr.bf16.mxu0 %v9507_v0 }
0x3abc   :  { %8296 = vmatmul.mubr.msk.f32.vlgmr.msra.gmra.mrb[28].mxu0 %vm760_vm3, %v5671_v44 }
0x3abd   :  { %8807 = vmatpush3.bf16.msra.mxu0 %v10345_v21  ;;  %8306 = vmatprep.mubr.msk.f32.mxu0 %vm9508_vm0, %v9509_v1 }
0x3abe   :  { %8808 = vmatprep.subr.bf16.mxu0 %v9507_v0 }
0x3ac1   :  { %8810 = vmatpush3.bf16.msra.mxu0 %v10356_v39 }
0x3ac2   :  { %8823 = vmatprep.subr.bf16.mxu0 %v9507_v0 }
0x3ac4   :  { %8307 = vmatmul.mubr.msk.f32.vlgmr.msra.gmra.mrb[28].mxu0 %vm760_vm3, %v5746_v45 }
0x3ac5   :  { %8825 = vmatpush3.bf16.msra.mxu0 %v10322_v26  ;;  %8339 = vmatprep.mubr.msk.f32.mxu0 %vm9508_vm0, %v9509_v1 }
0x3ac6   :  { %8826 = vmatprep.subr.bf16.mxu0 %v9507_v0 }
0x3ac9   :  { %8828 = vmatpush3.bf16.msra.mxu0 %v10333_v32 }
0x3aca   :  { %8829 = vmatprep.subr.bf16.mxu0 %v9507_v0 }
0x3acc   :  { %8340 = vmatmul.mubr.msk.f32.vlgmr.msra.gmra.mrb[30].mxu0 %vm760_vm3, %v5971_v47 }
0x3acd   :  { %8831 = vmatpush3.bf16.msra.mxu0 %v10345_v21  ;;  %8350 = vmatprep.mubr.msk.f32.mxu0 %vm9508_vm0, %v9509_v1 }
0x3ace   :  { %8832 = vmatprep.subr.bf16.mxu0 %v9507_v0 }
0x3ad1   :  { %8834 = vmatpush3.bf16.msra.mxu0 %v10356_v39 }
0x3ad2   :  { %8853 = vmatprep.subr.bf16.mxu0 %v9507_v0 }
0x3ad4   :  { %8351 = vmatmul.mubr.msk.f32.vlgmr.msra.gmra.mrb[30].mxu0 %vm760_vm3, %v6046_v48 }
0x3ad5   :  { %8394 = vmatprep.mubr.msk.f32.mxu0 %vm9508_vm0, %v9509_v1  ;;  %8855 = vmatpush3.bf16.msra.mxu0 %v10417_v2 }
0x3ad6   :  { %8856 = vmatprep.subr.bf16.mxu0 %v9507_v0 }
0x3ad9   :  { %8858 = vmatpush3.bf16.msra.mxu0 %v10421_v5 }
0x3ada   :  { %8865 = vmatprep.subr.bf16.mxu0 %v9507_v0 }
0x3b67   :  { %v4914_v49 = vpop.f32.mrb[22].mxu0 }
0x3b68   :  { %v8917_v50 = vadd.f32 %v10241_v46, %v4914_v49  ;;  %v8187_v11 = vpop.f32.mrb[23].mxu0 }
0x3b6a   :  { %9215 = vtanh.f32 %v8917_v50  ;;  %v7239_v52 = vmul.f32 -1.442695, %v8917_v50 }
0x3b6c   :  { %9217 = vpow2.f32 %v7239_v52 }
0x3b74   :  { %v9216_v51 = vpop.eup %9215 }
0x3b75   :  { %4928 = vrot.lane.b32.xlu0 %v9216_v51, %s9510_s5 }
0x3b76   :  { %v9218_v53 = vpop.eup %9217 }
0x3b77   :  { %v4922_v54 = vadd.f32 1.0, %v9218_v53 }
0x3b79   :  { %9219 = vrcp.f32 %v4922_v54 }
0x3b83   :  { %v9220_v14 = vpop.eup %9219 }
0x3b84   :  { %v4926_v57 = vmul.f32 %v9220_v14, %v10311_v31 }
0x3be7   :  { %v4929_v55 = vpop.permute.xlu0 %4928 }
0x3be8   :  { %v4931_v56 = vmul.f32 %v9220_v14, %v4929_v55 }
0x3bea   :  { %4933 = vrot.lane.b32.xlu1 %v4931_v56, %s9511_s21 }
0x3c5c   :  { %v4934_v58 = vpop.permute.xlu1 %4933 }
0x3c5d   :  { %v10412_v59 = vadd.f32 %v4934_v58, %v4926_v57 }
0x3c5f   :  { %9221 = vtanh.f32 %v10412_v59 }
0x3c69   :  { %v9222_v46 = vpop.eup %9221 }
0x3c6a   :  { %4939 = vrot.lane.b32.xlu0 %v9222_v46, %s9510_s5 }
0x3cdc   :  { %v4940_v60 = vpop.permute.xlu0 %4939 }
0x3cdd   :  { %v4942_v61 = vmul.f32 %v9220_v14, %v4940_v60 }
0x3cdf   :  { %4944 = vrot.lane.b32.xlu1 %v4942_v61, %s9511_s21 }
0x3d51   :  { %v4945_v6 = vpop.permute.xlu1 %4944 }
0x3d52   :  { %4948 = vst.msk [vmem:[#allocation4 + $0xc] sm:$0x3] %vm863_vm2, %v4945_v6  ;;  %8197 = vmatmul.mubr.msk.f32.vlgmr.msra.gmra.mrb[22].mxu1 %vm760_vm3, %v4945_v6 }
0x3d53   :  { %8765 = vmatpush3.bf16.msra.mxu1 %v10322_v26  ;;  %8229 = vmatprep.mubr.msk.f32.mxu1 %vm9508_vm0, %v9509_v1 }
0x3d54   :  { %8766 = vmatprep.subr.bf16.mxu1 %v9507_v0 }
0x3d57   :  { %8768 = vmatpush3.bf16.msra.mxu1 %v10333_v32 }
0x3d58   :  { %8769 = vmatprep.subr.bf16.mxu1 %v9507_v0 }
0x3d5a   :  { %8230 = vmatmul.mubr.msk.f32.vlgmr.msra.gmra.mrb[24].mxu1 %vm760_vm3, %v5221_v27 }
0x3d5b   :  { %8771 = vmatpush3.bf16.msra.mxu1 %v10345_v21  ;;  %8240 = vmatprep.mubr.msk.f32.mxu1 %vm9508_vm0, %v9509_v1 }
0x3d5c   :  { %8772 = vmatprep.subr.bf16.mxu1 %v9507_v0 }
0x3d5f   :  { %8774 = vmatpush3.bf16.msra.mxu1 %v10356_v39 }
0x3d60   :  { %8787 = vmatprep.subr.bf16.mxu1 %v9507_v0 }
0x3d62   :  { %8241 = vmatmul.mubr.msk.f32.vlgmr.msra.gmra.mrb[24].mxu1 %vm760_vm3, %v5296_v7 }
0x3d63   :  { %8789 = vmatpush3.bf16.msra.mxu1 %v10322_v26  ;;  %8273 = vmatprep.mubr.msk.f32.mxu1 %vm9508_vm0, %v9509_v1 }
0x3d64   :  { %8790 = vmatprep.subr.bf16.mxu1 %v9507_v0 }
0x3d67   :  { %8792 = vmatpush3.bf16.msra.mxu1 %v10333_v32 }
0x3d68   :  { %8793 = vmatprep.subr.bf16.mxu1 %v9507_v0 }
0x3d6a   :  { %8274 = vmatmul.mubr.msk.f32.vlgmr.msra.gmra.mrb[26].mxu1 %vm760_vm3, %v5521_v33 }
0x3d6b   :  { %8795 = vmatpush3.bf16.msra.mxu1 %v10345_v21  ;;  %8284 = vmatprep.mubr.msk.f32.mxu1 %vm9508_vm0, %v9509_v1 }
0x3d6c   :  { %8796 = vmatprep.subr.bf16.mxu1 %v9507_v0 }
0x3d6f   :  { %8798 = vmatpush3.bf16.msra.mxu1 %v10356_v39 }
0x3d70   :  { %8811 = vmatprep.subr.bf16.mxu1 %v9507_v0 }
0x3d72   :  { %8285 = vmatmul.mubr.msk.f32.vlgmr.msra.gmra.mrb[26].mxu1 %vm760_vm3, %v5596_v8 }
0x3d73   :  { %8813 = vmatpush3.bf16.msra.mxu1 %v10322_v26  ;;  %8317 = vmatprep.mubr.msk.f32.mxu1 %vm9508_vm0, %v9509_v1 }
0x3d74   :  { %8814 = vmatprep.subr.bf16.mxu1 %v9507_v0 }
0x3d77   :  { %8816 = vmatpush3.bf16.msra.mxu1 %v10333_v32 }
0x3d78   :  { %8817 = vmatprep.subr.bf16.mxu1 %v9507_v0 }
0x3d7a   :  { %8318 = vmatmul.mubr.msk.f32.vlgmr.msra.gmra.mrb[28].mxu1 %vm760_vm3, %v5821_v9 }
0x3d7b   :  { %8819 = vmatpush3.bf16.msra.mxu1 %v10345_v21  ;;  %8328 = vmatprep.mubr.msk.f32.mxu1 %vm9508_vm0, %v9509_v1 }
0x3d7c   :  { %8820 = vmatprep.subr.bf16.mxu1 %v9507_v0 }
0x3d7f   :  { %8822 = vmatpush3.bf16.msra.mxu1 %v10356_v39 }
0x3d80   :  { %8835 = vmatprep.subr.bf16.mxu1 %v9507_v0 }
0x3d82   :  { %8329 = vmatmul.mubr.msk.f32.vlgmr.msra.gmra.mrb[28].mxu1 %vm760_vm3, %v5896_v10 }
0x3d83   :  { %8837 = vmatpush3.bf16.msra.mxu1 %v10322_v26  ;;  %8361 = vmatprep.mubr.msk.f32.mxu1 %vm9508_vm0, %v9509_v1 }
0x3d84   :  { %8838 = vmatprep.subr.bf16.mxu1 %v9507_v0 }
0x3d87   :  { %8840 = vmatpush3.bf16.msra.mxu1 %v10333_v32 }
0x3d88   :  { %8841 = vmatprep.subr.bf16.mxu1 %v9507_v0 }
0x3d8a   :  { %8362 = vmatmul.mubr.msk.f32.vlgmr.msra.gmra.mrb[30].mxu1 %vm760_vm3, %v6121_v30 }
0x3d8b   :  { %8843 = vmatpush3.bf16.msra.mxu1 %v10345_v21  ;;  %8372 = vmatprep.mubr.msk.f32.mxu1 %vm9508_vm0, %v9509_v1 }
0x3d8c   :  { %8844 = vmatprep.subr.bf16.mxu1 %v9507_v0 }
0x3d8f   :  { %8846 = vmatpush3.bf16.msra.mxu1 %v10356_v39 }
0x3d90   :  { %8847 = vmatprep.subr.bf16.mxu1 %v9507_v0 }
0x3d92   :  { %8373 = vmatmul.mubr.msk.f32.vlgmr.msra.gmra.mrb[30].mxu1 %vm760_vm3, %v6196_v37 }
0x3d93   :  { %8849 = vmatpush3.bf16.msra.mxu1 %v10417_v2  ;;  %8383 = vmatprep.mubr.msk.f32.mxu1 %vm9508_vm0, %v9509_v1 }
0x3d94   :  { %8850 = vmatprep.subr.bf16.mxu1 %v9507_v0 }
0x3d97   :  { %8852 = vmatpush3.bf16.msra.mxu1 %v10421_v5 }
0x3d98   :  { %8859 = vmatprep.subr.bf16.mxu1 %v9507_v0 }
0x3d9a   :  { %8384 = vmatmul.mubr.f32.vlgmr.msra.gmra.mrb[30].mxu1 %v9509_v1 }
0x3d9b   :  { %8861 = vmatpush3.bf16.msra.mxu1 %v10417_v2  ;;  %8405 = vmatprep.mubr.msk.f32.mxu1 %vm9508_vm0, %v9509_v1 }
0x3d9c   :  { %8862 = vmatprep.subr.bf16.mxu1 %v9507_v0 }
0x3d9f   :  { %8864 = vmatpush3.bf16.msra.mxu1 %v10421_v5 }
0x3da0   :  { %8871 = vmatprep.subr.bf16.mxu1 %v9507_v0 }
0x3e25   :  { %v10496_v15 = vpop.f32.mrb[22].mxu1 }
0x3e26   :  { %v8198_v13 = vpop.f32.mrb[23].mxu1 }
0x3e6d   :  { %v6337_v17 = vpop.f32.mrb[30].mxu1 }
0x3e6e   :  { %v8926_v40 = vadd.f32 %v10501_v16, %v6337_v17  ;;  %v8385_v18 = vpop.f32.mrb[31].mxu1 }
0x3e70   :  { %9223 = vtanh.f32 %v8926_v40  ;;  %v7259_v19 = vmul.f32 -1.442695, %v8926_v40 }
0x3e72   :  { %9225 = vpow2.f32 %v7259_v19 }
0x3e7a   :  { %v9224_v31 = vpop.eup %9223 }
0x3e7b   :  { %6351 = vrot.lane.b32.xlu0 %v9224_v31, %s9510_s5 }
0x3e7c   :  { %v9226_v20 = vpop.eup %9225 }
0x3e7d   :  { %v6345_v22 = vadd.f32 1.0, %v9226_v20 }
0x3e7f   :  { %9227 = vrcp.f32 %v6345_v22 }
0x3e89   :  { %v9228_v23 = vpop.eup %9227 }
0x3e8a   :  { %v6349_v28 = vmul.f32 0.0, %v9228_v23 }
0x3eed   :  { %v6352_v24 = vpop.permute.xlu0 %6351 }
0x3eee   :  { %v6354_v26 = vmul.f32 %v9228_v23, %v6352_v24 }
0x3ef0   :  { %6356 = vrot.lane.b32.xlu1 %v6354_v26, %s9511_s21 }
0x3f62   :  { %v6357_v29 = vpop.permute.xlu1 %6356 }
0x3f63   :  { %v6359_v12 = vadd.f32 %v6357_v29, %v6349_v28 }
0x3f65   :  { %9229 = vtanh.f32 %v6359_v12 }
0x3f6f   :  { %v9230_v32 = vpop.eup %9229 }
0x3f70   :  { %6362 = vrot.lane.b32.xlu0 %v9230_v32, %s9510_s5 }
0x3fe2   :  { %v6363_v34 = vpop.permute.xlu0 %6362 }
0x3fe3   :  { %v6365_v35 = vmul.f32 %v9228_v23, %v6363_v34 }
0x3fe5   :  { %6367 = vrot.lane.b32.xlu1 %v6365_v35, %s9511_s21 }
0x4057   :  { %v6368_v21 = vpop.permute.xlu1 %6367 }
0x4058   :  { %6371 = vst.msk [vmem:[#allocation5 + $0xe] sm:$0x3] %vm863_vm2, %v6368_v21  ;;  %8395 = vmatmul.mubr.msk.f32.vlgmr.msra.gmra.mrb[30].mxu0 %vm760_vm3, %v6368_v21 }
0x4059   :  { %8867 = vmatpush3.bf16.msra.mxu0 %v10417_v2  ;;  %8416 = vmatprep.mubr.msk.f32.mxu0 %vm9508_vm0, %v9509_v1 }
0x405a   :  { %8868 = vmatprep.subr.bf16.mxu0 %v9507_v0 }
0x405d   :  { %8870 = vmatpush3.bf16.msra.mxu0 %v10421_v5 }
0x405e   :  { %8877 = vmatprep.subr.bf16.mxu0 %v9507_v0 }
0x412b   :  { %v6440_v36 = vpop.f32.mrb[30].mxu0 }
0x412c   :  { %v8925_v25 = vadd.f32 %v10501_v16, %v6440_v36  ;;  %v8396_v38 = vpop.f32.mrb[31].mxu0 }
0x412e   :  { %9231 = vtanh.f32 %v8925_v25  ;;  %v7261_v41 = vmul.f32 -1.442695, %v8925_v25 }
0x4130   :  { %9233 = vpow2.f32 %v7261_v41 }
0x4138   :  { %v9232_v39 = vpop.eup %9231 }
0x4139   :  { %6454 = vrot.lane.b32.xlu0 %v9232_v39, %s9510_s5 }
0x413a   :  { %v9234_v42 = vpop.eup %9233 }
0x413b   :  { %v6448_v43 = vadd.f32 1.0, %v9234_v42 }
0x413d   :  { %9235 = vrcp.f32 %v6448_v43 }
0x4147   :  { %v9236_v44 = vpop.eup %9235 }
0x4148   :  { %v6452_v48 = vmul.f32 %v9236_v44, %v6359_v12 }
0x41ab   :  { %v6455_v45 = vpop.permute.xlu0 %6454 }
0x41ac   :  { %v6457_v47 = vmul.f32 %v9236_v44, %v6455_v45 }
0x41ae   :  { %6459 = vrot.lane.b32.xlu1 %v6457_v47, %s9511_s21 }
0x4220   :  { %v6460_v49 = vpop.permute.xlu1 %6459 }
0x4221   :  { %v6462_v50 = vadd.f32 %v6460_v49, %v6452_v48 }
0x4223   :  { %9237 = vtanh.f32 %v6462_v50 }
0x422d   :  { %v9238_v11 = vpop.eup %9237 }
0x422e   :  { %6465 = vrot.lane.b32.xlu0 %v9238_v11, %s9510_s5 }
0x42a0   :  { %v6466_v51 = vpop.permute.xlu0 %6465 }
0x42a1   :  { %v6468_v52 = vmul.f32 %v9236_v44, %v6466_v51 }
0x42a3   :  { %6470 = vrot.lane.b32.xlu1 %v6468_v52, %s9511_s21 }
0x4315   :  { %v6471_v53 = vpop.permute.xlu1 %6470 }
0x4316   :  { %6474 = vst.msk [vmem:[#allocation5 + $0xc] sm:$0x3] %vm863_vm2, %v6471_v53  ;;  %8406 = vmatmul.mubr.msk.f32.vlgmr.msra.gmra.mrb[28].mxu1 %vm760_vm3, %v6471_v53 }
0x4317   :  { %8873 = vmatpush3.bf16.msra.mxu1 %v10417_v2  ;;  %8427 = vmatprep.mubr.msk.f32.mxu1 %vm9508_vm0, %v9509_v1 }
0x4318   :  { %8874 = vmatprep.subr.bf16.mxu1 %v9507_v0 }
0x431b   :  { %8876 = vmatpush3.bf16.msra.mxu1 %v10421_v5 }
0x431c   :  { %8883 = vmatprep.subr.bf16.mxu1 %v9507_v0 }
0x43e9   :  { %v6543_v54 = vpop.f32.mrb[28].mxu1 }
0x43ea   :  { %v8924_v14 = vadd.f32 %v10501_v16, %v6543_v54  ;;  %v8407_v55 = vpop.f32.mrb[29].mxu1 }
0x43ec   :  { %9239 = vtanh.f32 %v8924_v14  ;;  %v7263_v57 = vmul.f32 -1.442695, %v8924_v14 }
0x43ee   :  { %9241 = vpow2.f32 %v7263_v57 }
0x43f6   :  { %v9240_v56 = vpop.eup %9239 }
0x43f7   :  { %6557 = vrot.lane.b32.xlu0 %v9240_v56, %s9510_s5 }
0x43f8   :  { %v9242_v58 = vpop.eup %9241 }
0x43f9   :  { %v6551_v46 = vadd.f32 1.0, %v9242_v58 }
0x43fb   :  { %9243 = vrcp.f32 %v6551_v46 }
0x4405   :  { %v9244_v60 = vpop.eup %9243 }
0x4406   :  { %v6555_v63 = vmul.f32 %v9244_v60, %v6462_v50 }
0x4469   :  { %v6558_v61 = vpop.permute.xlu0 %6557 }
0x446a   :  { %v6560_v62 = vmul.f32 %v9244_v60, %v6558_v61 }
0x446c   :  { %6562 = vrot.lane.b32.xlu1 %v6560_v62, %s9511_s21 }
0x44de   :  { %v6563_v3 = vpop.permute.xlu1 %6562 }
0x44df   :  { %v6565_v4 = vadd.f32 %v6563_v3, %v6555_v63 }
0x44e1   :  { %9245 = vtanh.f32 %v6565_v4 }
0x44eb   :  { %v9246_v6 = vpop.eup %9245 }
0x44ec   :  { %6568 = vrot.lane.b32.xlu0 %v9246_v6, %s9510_s5 }
0x455e   :  { %v6569_v27 = vpop.permute.xlu0 %6568 }
0x455f   :  { %v6571_v7 = vmul.f32 %v9244_v60, %v6569_v27 }
0x4561   :  { %6573 = vrot.lane.b32.xlu1 %v6571_v7, %s9511_s21 }
0x45d3   :  { %v6574_v33 = vpop.permute.xlu1 %6573 }
0x45d4   :  { %6577 = vst.msk [vmem:[#allocation5 + $0xa] sm:$0x3] %vm863_vm2, %v6574_v33  ;;  %8417 = vmatmul.mubr.msk.f32.vlgmr.msra.gmra.mrb[28].mxu0 %vm760_vm3, %v6574_v33 }
0x45d5   :  { %8879 = vmatpush3.bf16.msra.mxu0 %v10417_v2  ;;  %8438 = vmatprep.mubr.msk.f32.mxu0 %vm9508_vm0, %v9509_v1 }
0x45d6   :  { %8880 = vmatprep.subr.bf16.mxu0 %v9507_v0 }
0x45d9   :  { %8882 = vmatpush3.bf16.msra.mxu0 %v10421_v5 }
0x45da   :  { %8889 = vmatprep.subr.bf16.mxu0 %v9507_v0 }
0x46a7   :  { %v6646_v8 = vpop.f32.mrb[28].mxu0 }
0x46a8   :  { %v8923_v9 = vadd.f32 %v10501_v16, %v6646_v8  ;;  %v8418_v10 = vpop.f32.mrb[29].mxu0 }
0x46aa   :  { %9247 = vtanh.f32 %v8923_v9  ;;  %v7265_v37 = vmul.f32 -1.442695, %v8923_v9 }
0x46ac   :  { %9249 = vpow2.f32 %v7265_v37  ;;  %v9296_v37 = vld [vmem:[%s10624_s10] ss:$0 sm:$0xff]  ;;  %s7276_s10 = sld [smem:[#allocation7 + $0x1]] }
0x46b2   :  { %s7277_s24 = sadd.s32 4294967295, %s7276_s10 }
0x46b3   :  { %s7278_s1 = sshll.u32 %s7277_s24, 1 }
0x46b4   :  { %v9248_v30 = vpop.eup %9247  ;;  %s7110_s0 = scalar_lea.vmem [#allocation4], %s7278_s1  ;;  %s7114_s26 = scalar_lea.vmem [#allocation5], %s7278_s1 }
0x46b5   :  { %6660 = vrot.lane.b32.xlu0 %v9248_v30, %s9510_s5 }
0x46b6   :  { %v9250_v13 = vpop.eup %9249 }
0x46b7   :  { %v6654_v17 = vadd.f32 1.0, %v9250_v13  ;;  %v8918_v13 = vadd.f32 %v9296_v37, %v10496_v15 }
0x46b9   :  { %9251 = vrcp.f32 %v6654_v17 }
0x46c3   :  { %v9252_v40 = vpop.eup %9251 }
0x46c4   :  { %v6658_v19 = vmul.f32 %v9252_v40, %v6565_v4 }
0x4727   :  { %v6661_v18 = vpop.permute.xlu0 %6660 }
0x4728   :  { %v6663_v31 = vmul.f32 %v9252_v40, %v6661_v18 }
0x472a   :  { %6665 = vrot.lane.b32.xlu1 %v6663_v31, %s9511_s21  ;;  %v7241_v31 = vmul.f32 -1.442695, %v8918_v13 }
0x479c   :  { %v6666_v20 = vpop.permute.xlu1 %6665 }
0x479d   :  { %v6668_v22 = vadd.f32 %v6666_v20, %v6658_v19 }
0x479f   :  { %9253 = vtanh.f32 %v6668_v22 }
0x47a9   :  { %v9254_v23 = vpop.eup %9253 }
0x47aa   :  { %6671 = vrot.lane.b32.xlu0 %v9254_v23, %s9510_s5 }
0x481c   :  { %v6672_v24 = vpop.permute.xlu0 %6671 }
0x481d   :  { %v6674_v26 = vmul.f32 %v9252_v40, %v6672_v24 }
0x481f   :  { %6676 = vrot.lane.b32.xlu1 %v6674_v26, %s9511_s21 }
0x4891   :  { %v6677_v28 = vpop.permute.xlu1 %6676 }
0x4892   :  { %6680 = vst.msk [vmem:[#allocation5 + $0x8] sm:$0x3] %vm863_vm2, %v6677_v28  ;;  %8428 = vmatmul.mubr.msk.f32.vlgmr.msra.gmra.mrb[26].mxu1 %vm760_vm3, %v6677_v28 }
0x4893   :  { %8885 = vmatpush3.bf16.msra.mxu1 %v10417_v2  ;;  %8449 = vmatprep.mubr.msk.f32.mxu1 %vm9508_vm0, %v9509_v1 }
0x4894   :  { %8886 = vmatprep.subr.bf16.mxu1 %v9507_v0 }
0x4897   :  { %8888 = vmatpush3.bf16.msra.mxu1 %v10421_v5 }
0x4965   :  { %v6749_v29 = vpop.f32.mrb[26].mxu1 }
0x4966   :  { %v8922_v12 = vadd.f32 %v10501_v16, %v6749_v29  ;;  %v8429_v32 = vpop.f32.mrb[27].mxu1 }
0x4968   :  { %9255 = vtanh.f32 %v8922_v12  ;;  %v7267_v35 = vmul.f32 -1.442695, %v8922_v12 }
0x496a   :  { %9257 = vpow2.f32 %v7267_v35 }
0x4972   :  { %v9256_v34 = vpop.eup %9255 }
0x4973   :  { %6763 = vrot.lane.b32.xlu0 %v9256_v34, %s9510_s5 }
0x4974   :  { %v9258_v21 = vpop.eup %9257 }
0x4975   :  { %v6757_v36 = vadd.f32 1.0, %v9258_v21 }
0x4977   :  { %9259 = vrcp.f32 %v6757_v36 }
0x4981   :  { %v9260_v25 = vpop.eup %9259 }
0x4982   :  { %v6761_v41 = vmul.f32 %v9260_v25, %v6668_v22 }
0x49e5   :  { %v6764_v38 = vpop.permute.xlu0 %6763 }
0x49e6   :  { %v6766_v39 = vmul.f32 %v9260_v25, %v6764_v38 }
0x49e8   :  { %6768 = vrot.lane.b32.xlu1 %v6766_v39, %s9511_s21 }
0x4a5a   :  { %v6769_v42 = vpop.permute.xlu1 %6768 }
0x4a5b   :  { %v6771_v43 = vadd.f32 %v6769_v42, %v6761_v41 }
0x4a5d   :  { %9261 = vtanh.f32 %v6771_v43 }
0x4a67   :  { %v9262_v44 = vpop.eup %9261 }
0x4a68   :  { %6774 = vrot.lane.b32.xlu0 %v9262_v44, %s9510_s5 }
0x4ada   :  { %v6775_v45 = vpop.permute.xlu0 %6774 }
0x4adb   :  { %v6777_v47 = vmul.f32 %v9260_v25, %v6775_v45 }
0x4add   :  { %6779 = vrot.lane.b32.xlu1 %v6777_v47, %s9511_s21 }
0x4b4f   :  { %v6780_v48 = vpop.permute.xlu1 %6779 }
0x4b50   :  { %6783 = vst.msk [vmem:[#allocation5 + $0x6] sm:$0x3] %vm863_vm2, %v6780_v48  ;;  %8439 = vmatmul.mubr.msk.f32.vlgmr.msra.gmra.mrb[26].mxu0 %vm760_vm3, %v6780_v48 }
0x4b51   :  { %8891 = vmatpush3.bf16.msra.mxu0 %v10417_v2  ;;  %8460 = vmatprep.mubr.msk.f32.mxu0 %vm9508_vm0, %v9509_v1 }
0x4b52   :  { %8892 = vmatprep.subr.bf16.mxu0 %v9507_v0 }
0x4b55   :  { %8894 = vmatpush3.bf16.msra.mxu0 %v10421_v5 }
0x4c23   :  { %v6852_v49 = vpop.f32.mrb[26].mxu0 }
0x4c24   :  { %v8921_v50 = vadd.f32 %v10501_v16, %v6852_v49  ;;  %v8440_v11 = vpop.f32.mrb[27].mxu0 }
0x4c26   :  { %9263 = vtanh.f32 %v8921_v50  ;;  %v7269_v52 = vmul.f32 -1.442695, %v8921_v50 }
0x4c28   :  { %9265 = vpow2.f32 %v7269_v52 }
0x4c30   :  { %v9264_v51 = vpop.eup %9263 }
0x4c31   :  { %6866 = vrot.lane.b32.xlu0 %v9264_v51, %s9510_s5 }
0x4c32   :  { %v9266_v53 = vpop.eup %9265 }
0x4c33   :  { %v6860_v54 = vadd.f32 1.0, %v9266_v53 }
0x4c35   :  { %9267 = vrcp.f32 %v6860_v54 }
0x4c3f   :  { %v9268_v2 = vpop.eup %9267 }
0x4c40   :  { %v6864_v0 = vmul.f32 %v9268_v2, %v6771_v43 }
0x4ca3   :  { %v6867_v14 = vpop.permute.xlu0 %6866 }
0x4ca4   :  { %v6869_v1 = vmul.f32 %v9268_v2, %v6867_v14 }
0x4ca6   :  { %6871 = vrot.lane.b32.xlu1 %v6869_v1, %s9511_s21 }
0x4d18   :  { %v6872_v5 = vpop.permute.xlu1 %6871 }
0x4d19   :  { %v6874_v55 = vadd.f32 %v6872_v5, %v6864_v0 }
0x4d1b   :  { %9269 = vtanh.f32 %v6874_v55 }
0x4d25   :  { %v9270_v56 = vpop.eup %9269 }
0x4d26   :  { %6877 = vrot.lane.b32.xlu0 %v9270_v56, %s9510_s5 }
0x4d98   :  { %v6878_v57 = vpop.permute.xlu0 %6877 }
0x4d99   :  { %v6880_v58 = vmul.f32 %v9268_v2, %v6878_v57 }
0x4d9b   :  { %6882 = vrot.lane.b32.xlu1 %v6880_v58, %s9511_s21 }
0x4e0d   :  { %v6883_v46 = vpop.permute.xlu1 %6882 }
0x4e0e   :  { %6886 = vst.msk [vmem:[#allocation5 + $0x4] sm:$0x3] %vm863_vm2, %v6883_v46  ;;  %8450 = vmatmul.mubr.msk.f32.vlgmr.msra.gmra.mrb[24].mxu1 %vm760_vm3, %v6883_v46 }
0x4ee1   :  { %v6955_v60 = vpop.f32.mrb[24].mxu1 }
0x4ee2   :  { %v8920_v61 = vadd.f32 %v10501_v16, %v6955_v60  ;;  %v8451_v62 = vpop.f32.mrb[25].mxu1 }
0x4ee4   :  { %9271 = vtanh.f32 %v8920_v61  ;;  %v7271_v3 = vmul.f32 -1.442695, %v8920_v61 }
0x4ee6   :  { %9273 = vpow2.f32 %v7271_v3 }
0x4eee   :  { %v9272_v63 = vpop.eup %9271 }
0x4eef   :  { %6969 = vrot.lane.b32.xlu0 %v9272_v63, %s9510_s5 }
0x4ef0   :  { %v9274_v4 = vpop.eup %9273 }
0x4ef1   :  { %v6963_v6 = vadd.f32 1.0, %v9274_v4 }
0x4ef3   :  { %9275 = vrcp.f32 %v6963_v6 }
0x4efd   :  { %v9276_v27 = vpop.eup %9275 }
0x4efe   :  { %v6967_v8 = vmul.f32 %v9276_v27, %v6874_v55 }
0x4f61   :  { %v6970_v7 = vpop.permute.xlu0 %6969 }
0x4f62   :  { %v6972_v33 = vmul.f32 %v9276_v27, %v6970_v7 }
0x4f64   :  { %6974 = vrot.lane.b32.xlu1 %v6972_v33, %s9511_s21 }
0x4fd6   :  { %v6975_v9 = vpop.permute.xlu1 %6974 }
0x4fd7   :  { %v10576_v10 = vadd.f32 %v6975_v9, %v6967_v8 }
0x4fd9   :  { %9277 = vtanh.f32 %v10576_v10 }
0x4fda   :  { %9279 = vtanh.f32 %v8918_v13 }
0x4fdb   :  { %9281 = vpow2.f32 %v7241_v31 }
0x4fe3   :  { %v9278_v30 = vpop.eup %9277 }
0x4fe4   :  { %6980 = vrot.lane.b32.xlu0 %v9278_v30, %s9510_s5  ;;  %v9280_v18 = vpop.eup %9279 }
0x4fe5   :  { %v9282_v19 = vpop.eup %9281 }
0x4fe6   :  { %v5025_v20 = vadd.f32 1.0, %v9282_v19 }
0x4fe8   :  { %9283 = vrcp.f32 %v5025_v20 }
0x4ff2   :  { %v9284_v23 = vpop.eup %9283 }
0x4ff3   :  { %v5029_v26 = vmul.f32 %v9284_v23, %v10412_v59 }
0x5056   :  { %v6981_v17 = vpop.permute.xlu0 %6980 }
0x5057   :  { %v6983_v40 = vmul.f32 %v9276_v27, %v6981_v17 }
0x5059   :  { %6985 = vrot.lane.b32.xlu1 %v6983_v40, %s9511_s21 }
0x505d   :  { %5031 = vrot.lane.b32.xlu1 %v9280_v18, %s9510_s5 }
0x50cb   :  { %v6986_v22 = vpop.permute.xlu1 %6985 }
0x50cc   :  { %6989 = vst.msk [vmem:[#allocation5 + $0x2] sm:$0x3] %vm863_vm2, %v6986_v22  ;;  %8461 = vmatmul.mubr.msk.f32.vlgmr.msra.gmra.mrb[24].mxu0 %vm760_vm3, %v6986_v22 }
0x50cf   :  { %v5032_v15 = vpop.permute.xlu1 %5031 }
0x50d0   :  { %v5034_v24 = vmul.f32 %v9284_v23, %v5032_v15 }
0x50d2   :  { %5036 = vrot.lane.b32.xlu1 %v5034_v24, %s9511_s21 }
0x5144   :  { %v5037_v28 = vpop.permute.xlu1 %5036 }
0x5145   :  { %v5039_v29 = vadd.f32 %v5037_v28, %v5029_v26 }
0x5147   :  { %9285 = vtanh.f32 %v5039_v29 }
0x5151   :  { %v9286_v12 = vpop.eup %9285 }
0x5152   :  { %5042 = vrot.lane.b32.xlu1 %v9286_v12, %s9510_s5 }
0x519f   :  { %v7058_v32 = vpop.f32.mrb[24].mxu0 }
0x51a0   :  { %v8919_v34 = vadd.f32 %v10501_v16, %v7058_v32  ;;  %v8462_v35 = vpop.f32.mrb[25].mxu0 }
0x51a2   :  { %9287 = vtanh.f32 %v8919_v34  ;;  %v7273_v38 = vmul.f32 -1.442695, %v8919_v34 }
0x51a4   :  { %9289 = vpow2.f32 %v7273_v38 }
0x51ac   :  { %v9288_v21 = vpop.eup %9287 }
0x51ad   :  { %7072 = vrot.lane.b32.xlu0 %v9288_v21, %s9510_s5 }
0x51ae   :  { %v9290_v59 = vpop.eup %9289 }
0x51af   :  { %v7066_v39 = vadd.f32 1.0, %v9290_v59 }
0x51b1   :  { %9291 = vrcp.f32 %v7066_v39 }
0x51bb   :  { %v9292_v41 = vpop.eup %9291 }
0x51bc   :  { %v7070_v47 = vmul.f32 %v9292_v41, %v10576_v10 }
0x51c4   :  { %v5043_v36 = vpop.permute.xlu1 %5042 }
0x51c5   :  { %v5045_v25 = vmul.f32 %v9284_v23, %v5043_v36 }
0x51c7   :  { %5047 = vrot.lane.b32.xlu1 %v5045_v25, %s9511_s21 }
0x521f   :  { %v7073_v42 = vpop.permute.xlu0 %7072 }
0x5220   :  { %v7075_v43 = vmul.f32 %v9292_v41, %v7073_v42 }
0x5222   :  { %7077 = vrot.lane.b32.xlu0 %v7075_v43, %s9511_s21 }
0x5239   :  { %v5048_v16 = vpop.permute.xlu1 %5047 }
0x523a   :  { %5051 = vst.msk [vmem:[#allocation4 + $0xe] sm:$0x3] %vm863_vm2, %v5048_v16 }
0x5241   :  { %v7096_v44 = vld [vmem:[%s7095_s4] sm:$0x3] }
0x5242   :  { %v7111_v45 = vld [vmem:[%s7110_s0] sm:$0x3]  ;;  %7098 = vst.msk [vmem:[#allocation20] sm:$0x1] %vm7097_vm4, %v7096_v44 }
0x5243   :  { %7113 = vst.msk [vmem:[#allocation20] sm:$0x2] %vm7112_vm5, %v7111_v45 }
0x5294   :  { %v7078_v48 = vpop.permute.xlu0 %7077 }
0x5295   :  { %v7080_v49 = vadd.f32 %v7078_v48, %v7070_v47 }
0x5297   :  { %9293 = vtanh.f32 %v7080_v49 }
0x52a1   :  { %v9294_v50 = vpop.eup %9293 }
0x52a2   :  { %7083 = vrot.lane.b32.xlu0 %v9294_v50, %s9510_s5  ;;  %s9463_s5 = scalar_lea.vmem %s7129_s28, 32 }
0x52a3   :  { %p9464_p5 = scmp.ne.s32.totalorder %s7129_s28, %s9463_s5  ;;  %p9469_p7 = scmp.lt.s32.totalorder %s9463_s5, %s9463_s5 }
0x52a5   :  { %p9470_p8 = por %p9469_p7, %p9468_p6 }
0x52a7   :  { %p9471_p9 = pnand %p9470_p8, %p9464_p5 }
0x5314   :  { %v7084_v11 = vpop.permute.xlu0 %7083 }
0x5315   :  { %v7086_v51 = vmul.f32 %v9292_v41, %v7084_v11 }
0x5317   :  { %7088 = vrot.lane.b32.xlu0 %v7086_v51, %s9511_s21 }
0x5389   :  { %v7089_v52 = vpop.permute.xlu0 %7088 }
0x538a   :  { %7091 = vst.msk [vmem:[#allocation5] sm:$0x3] %vm863_vm2, %v7089_v52 }
0x5391   :  { %v7115_v53 = vld [vmem:[%s7114_s26] sm:$0x3] }
0x5392   :  { %v7100_v54 = vld [vmem:[%s7099_s2] sm:$0x3]  ;;  %7117 = vrot.lane.b32.xlu1 %v7115_v53, %s9511_s21 }
0x5393   :  { %7102 = vrot.lane.b32.xlu0 %v7100_v54, %s9511_s21 }
0x5404   :  { %v7118_v2 = vpop.permute.xlu1 %7117 }
0x5405   :  { %v7103_v14 = vpop.permute.xlu0 %7102  ;;  %7121 = vst.msk [vmem:[#allocation20] sm:$0x2] %vm7120_vm7, %v7118_v2 }
0x5406   :  { %7106 = vst.msk [vmem:[#allocation20] sm:$0x1] %vm7105_vm6, %v7103_v14 }
0x5407   :  { %9474 = shalt.err (!%p9471_p9)
}
0x5408   :  { %s9475_s21 = scalar_lea.hbm %s10628_s14, 32 }
0x5409   :  { %p9476_p10 = scmp.ne.s32.totalorder %s10628_s14, %s9475_s21  ;;  %p9479_p11 = scmp.lt.u32.totalorder %s9475_s21, %s10628_s14 }
0x540b   :  { %p9481_p12 = pnand %p9479_p11, %p9476_p10 }
0x540d   :  { %9484 = shalt.err (!%p9481_p12)
}
0x540e   :  { %7131 = dma.vmem_to_hbm [thread:$0]  %s7129_s28, 32, %s10628_s14, [#allocation10]  }
0x540f   :  { %9495 = dma.done.wait [#allocation10], 32  }
0x5410   :  { %9496 = vsyncadd [#allocation10], 4294967264 }
0x5411   :  { %7135 = vsyncpa [#allocation9], 1 }
0x5412   :  { %7136 = vsyncpa [#allocation12], 1 }
0x5413   :  { %7137 = vsyncpa [#allocation15], 1 }
0x5414   :  { %7138 = vsyncpa [#allocation18], 1 }
0x5415   :  { %7139 = vsyncpa [#allocation10], 1 }

</bundles_post_ra>
